<compile_context>
chip_gen: v7x
topology: tpu7x:2x2x1
jax: 0.10.0
libtpu: 0.0.40
codegen_flags: <defaults>
</compile_context>

<pallas_src>
import numpy as np
import jax
import jax.numpy as jnp
from jax import lax
from jax.experimental import pallas as pl
from jax.experimental.pallas import tpu as pltpu

MAX_LENGTH = 10
SOS_token = 0


def _decoder_kernel(
    # ---- inputs ----
    enc_ref,                 # (B, S, H) encoder outputs
    h0_ref,                  # (B, H)    initial decoder hidden
    ua_ref, bua_ref,         # (H, H) = Ua.T, (1, H)
    va_ref,                  # (1, H)    Va weight row (bias cancels in softmax)
    wh4_ref, bh4_ref,        # (H, 4H) = [Wa | W_hr | W_hz | W_hn].T, (1, 4H)
    wie_ref,                 # (V, 3H) = emb @ W_ih[:, :H].T  (embedding folded in)
    wic_ref,                 # (H, 3H) = W_ih[:, H:].T
    bi3_ref,                 # (1, 3H) = b_ih
    wout_ref, bout_ref,      # (H, V), (1, V)
    # ---- outputs ----
    logp_ref,                # (T, B, V) log-softmax logits, time-major
    attn_ref,                # (T, B, S) attention weights, time-major
    hid_ref,                 # (B, H)    final hidden state
):
  B, S, H = enc_ref.shape
  V = wout_ref.shape[1]
  T = logp_ref.shape[0]
  f32 = jnp.float32

  iota_v = lax.broadcasted_iota(jnp.int32, (B, V), 1)

  # Hoist all weights / loop invariants into vregs once.
  ua, bua, va = ua_ref[...], bua_ref[...], va_ref[...]
  wh4, bh4 = wh4_ref[...], bh4_ref[...]
  wie, wic, bi3 = wie_ref[...], wic_ref[...], bi3_ref[...]
  wout, bout = wout_ref[...], bout_ref[...]

  keys = [enc_ref[b] for b in range(B)]                        # B x (S, H)
  ku = [jnp.dot(k, ua, preferred_element_type=f32) + bua for k in keys]

  h = h0_ref[...]                                              # (B, H)
  onehot = (iota_v == SOS_token).astype(f32)                   # (B, V), SOS

  # TODO(synk): teacher-forcing path (target_tensor) not implemented.
  # TODO(synk): training-mode dropout on the embedding not implemented (eval).
  for t in range(T):                                           # fully unrolled
    # Attention query + GRU hidden-gate pre-activations in one lane-dense
    # (H, 4H=128) MXU matmul.
    qgh = jnp.dot(h, wh4, preferred_element_type=f32) + bh4    # (B, 4H)
    q = qgh[:, 0 * H:1 * H]
    h_r = qgh[:, 1 * H:2 * H]
    h_z = qgh[:, 2 * H:3 * H]
    h_n = qgh[:, 3 * H:4 * H]

    # Bahdanau attention.  The Va reduction is an MXU matmul (va @ e_b^T) so
    # scores come out with S on the lane axis; softmax is issued once on (B,S).
    srows = []
    for b in range(B):
      e_b = jnp.tanh(q[b:b + 1, :] + ku[b])                    # (S, H)
      srows.append(lax.dot_general(                            # (1, S)
          va, e_b, (((1,), (1,)), ((), ())), preferred_element_type=f32))
    scores = jnp.concatenate(srows, axis=0)                    # (B, S)
    m_s = jnp.max(scores, axis=-1, keepdims=True)
    ex = jnp.exp(scores - m_s)
    w = ex * pl.reciprocal(jnp.sum(ex, axis=-1, keepdims=True), approx=True)
    attn_ref[t] = w                                            # lane-dense (B, S)

    ctx = jnp.concatenate(
        [jnp.dot(w[b:b + 1, :], keys[b], preferred_element_type=f32)
         for b in range(B)], axis=0)                           # (B, H)

    # GRU input-gate pre-activations; embedding lookup folded into wie.
    gi = (jnp.dot(onehot, wie, preferred_element_type=f32)
          + jnp.dot(ctx, wic, preferred_element_type=f32) + bi3)    # (B, 3H)
    i_r = gi[:, 0 * H:1 * H]
    i_z = gi[:, 1 * H:2 * H]
    i_n = gi[:, 2 * H:3 * H]

    r = jax.nn.sigmoid(i_r + h_r)
    z = jax.nn.sigmoid(i_z + h_z)
    n = jnp.tanh(i_n + r * h_n)
    h = (1.0 - z) * n + z * h

    # Output projection + log_softmax over vocab.
    logits = jnp.dot(h, wout, preferred_element_type=f32) + bout    # (B, V)
    m_l = jnp.max(logits, axis=-1, keepdims=True)
    lse = jnp.log(jnp.sum(jnp.exp(logits - m_l), axis=-1, keepdims=True)) + m_l
    logp_ref[t] = logits - lse

    # Greedy next token (first max index, matches torch.topk(1)/argmax).
    idx = jnp.min(jnp.where(logits == m_l, iota_v, V), axis=-1, keepdims=True)
    onehot = (iota_v == idx).astype(f32)

  hid_ref[...] = h


def attn_decoder_forward(params, encoder_outputs, encoder_hidden):
  B, S, H = encoder_outputs.shape
  V = params["emb"].shape[0]
  T = MAX_LENGTH

  w_ih, b_ih = params["gru_w_ih"], params["gru_b_ih"]   # (3H, 2H), (3H,)
  w_hh, b_hh = params["gru_w_hh"], params["gru_b_hh"]   # (3H, H),  (3H,)
  emb = params["emb"].astype(jnp.float32)

  # Wa fused with hidden->gate weights: h @ (H, 4H) -> [q | h_r | h_z | h_n].
  wh4 = jnp.concatenate([params["Wa_w"], w_hh], axis=0).T            # (H, 4H)
  bh4 = jnp.concatenate([params["Wa_b"], b_hh], axis=0).reshape(1, 4 * H)

  # Embedding folded into the input->gate matmul (eval-mode dropout == id).
  wie = emb @ w_ih[:, :H].T                                          # (V, 3H)
  wic = w_ih[:, H:].T                                                # (H, 3H)
  bi3 = b_ih.reshape(1, 3 * H)

  inputs = [
      encoder_outputs.astype(jnp.float32),
      encoder_hidden.reshape(B, H).astype(jnp.float32),
      params["Ua_w"].T, params["Ua_b"].reshape(1, H),
      params["Va_w"].reshape(1, H),                # Va bias dropped (softmax-invariant)
      wh4, bh4, wie, wic, bi3,
      params["out_w"].T, params["out_b"].reshape(1, V),
  ]

  vmem = lambda: pl.BlockSpec(memory_space=pltpu.MemorySpace.VMEM)
  logp_tbv, attn_tbs, hid = pl.pallas_call(
      _decoder_kernel,
      out_shape=(
          jax.ShapeDtypeStruct((T, B, V), jnp.float32),
          jax.ShapeDtypeStruct((T, B, S), jnp.float32),
          jax.ShapeDtypeStruct((B, H), jnp.float32),
      ),
      in_specs=[vmem() for _ in inputs],
      out_specs=(vmem(), vmem(), vmem()),
  )(*inputs)

  decoder_outputs = jnp.transpose(logp_tbv, (1, 0, 2))   # (B, T, V)
  attentions = jnp.transpose(attn_tbs, (1, 0, 2))        # (B, T, S)
  decoder_hidden = hid.reshape(1, B, H)
  return decoder_outputs, decoder_hidden, attentions


def reference_forward(params, encoder_outputs, encoder_hidden):
  """Pure-JAX reference mirroring the PyTorch module (eval mode, greedy)."""
  B, S, H = encoder_outputs.shape
  h = encoder_hidden[0]
  x_idx = jnp.full((B,), SOS_token, jnp.int32)
  outs, attns = [], []
  for _ in range(MAX_LENGTH):
    embedded = params["emb"][x_idx]
    q = h @ params["Wa_w"].T + params["Wa_b"]
    ku = encoder_outputs @ params["Ua_w"].T + params["Ua_b"]
    e = jnp.tanh(q[:, None, :] + ku)
    scores = jnp.squeeze(e @ params["Va_w"].T, -1) + params["Va_b"]
    w = jax.nn.softmax(scores, axis=-1)
    context = jnp.einsum("bs,bsh->bh", w, encoder_outputs)
    x = jnp.concatenate([embedded, context], axis=-1)
    gi = x @ params["gru_w_ih"].T + params["gru_b_ih"]
    gh = h @ params["gru_w_hh"].T + params["gru_b_hh"]
    i_r, i_z, i_n = gi[:, :H], gi[:, H:2 * H], gi[:, 2 * H:]
    h_r, h_z, h_n = gh[:, :H], gh[:, H:2 * H], gh[:, 2 * H:]
    r = jax.nn.sigmoid(i_r + h_r)
    z = jax.nn.sigmoid(i_z + h_z)
    n = jnp.tanh(i_n + r * h_n)
    h = (1.0 - z) * n + z * h
    logits = h @ params["out_w"].T + params["out_b"]
    outs.append(logits)
    attns.append(w)
    x_idx = jnp.argmax(logits, axis=-1)
  out = jax.nn.log_softmax(jnp.stack(outs, axis=1), axis=-1)
  return out, h[None], jnp.stack(attns, axis=1)


if __name__ == "__main__":
  B, S, H, V = 2, 8, 32, 20   # batch, encoder seq len, hidden_size, output_size

  key = jax.random.PRNGKey(0)
  ks = jax.random.split(key, 16)

  def u(k, shape, fan_in):
    bound = 1.0 / np.sqrt(fan_in)
    return jax.random.uniform(k, shape, jnp.float32, -bound, bound)

  params = {
      "emb": jax.random.normal(ks[0], (V, H), jnp.float32),
      "Wa_w": u(ks[1], (H, H), H), "Wa_b": u(ks[2], (H,), H),
      "Ua_w": u(ks[3], (H, H), H), "Ua_b": u(ks[4], (H,), H),
      "Va_w": u(ks[5], (1, H), H), "Va_b": u(ks[6], (1,), H),
      "gru_w_ih": u(ks[7], (3 * H, 2 * H), H), "gru_b_ih": u(ks[8], (3 * H,), H),
      "gru_w_hh": u(ks[9], (3 * H, H), H), "gru_b_hh": u(ks[10], (3 * H,), H),
      "out_w": u(ks[11], (V, H), H), "out_b": u(ks[12], (V,), H),
  }
  encoder_outputs = jax.random.normal(ks[13], (B, S, H), jnp.float32)
  encoder_hidden = jax.random.normal(ks[14], (1, B, H), jnp.float32)

  dec_out, dec_hid, attn = jax.block_until_ready(
      attn_decoder_forward(params, encoder_outputs, encoder_hidden))

  assert dec_out.shape == (B, MAX_LENGTH, V)
  assert dec_hid.shape == (1, B, H)
  assert attn.shape == (B, MAX_LENGTH, S)

  ref_out, ref_hid, ref_attn = reference_forward(params, encoder_outputs, encoder_hidden)
  # 2e-3 tolerance: the attention softmax uses the EUP approximate reciprocal
  # (pl.reciprocal(approx=True)), which adds a few-1e-4 relative error.
  np.testing.assert_allclose(np.asarray(dec_out), np.asarray(ref_out), atol=2e-3, rtol=2e-3)
  np.testing.assert_allclose(np.asarray(dec_hid), np.asarray(ref_hid), atol=2e-3, rtol=2e-3)
  np.testing.assert_allclose(np.asarray(attn), np.asarray(ref_attn), atol=2e-3, rtol=2e-3)

  print("KERNEL_OK")
</pallas_src>

<mosaic_0001>
module attributes {stable_mosaic.version = 11 : i64} {
  func.func @_decoder_kernel(%arg0: memref<2x8x32xf32, #tpu.memory_space<vmem>>, %arg1: memref<2x32xf32, #tpu.memory_space<vmem>>, %arg2: memref<32x32xf32, #tpu.memory_space<vmem>>, %arg3: memref<1x32xf32, #tpu.memory_space<vmem>>, %arg4: memref<1x32xf32, #tpu.memory_space<vmem>>, %arg5: memref<32x128xf32, #tpu.memory_space<vmem>>, %arg6: memref<1x128xf32, #tpu.memory_space<vmem>>, %arg7: memref<20x96xf32, #tpu.memory_space<vmem>>, %arg8: memref<32x96xf32, #tpu.memory_space<vmem>>, %arg9: memref<1x96xf32, #tpu.memory_space<vmem>>, %arg10: memref<32x20xf32, #tpu.memory_space<vmem>>, %arg11: memref<1x20xf32, #tpu.memory_space<vmem>>, %arg12: memref<10x2x20xf32, #tpu.memory_space<vmem>>, %arg13: memref<10x2x8xf32, #tpu.memory_space<vmem>>, %arg14: memref<2x32xf32, #tpu.memory_space<vmem>>) attributes {dimension_semantics = [], scalar_prefetch = 0 : i64, scratch_operands = 0 : i64, tpu.core_type = #tpu.core_type<tc>} {
    %0 = tpu.iota {dimensions = array<i32: 1>} : vector<2x20xi32>
    %c0 = arith.constant 0 : index
    %c0_0 = arith.constant 0 : index
    %1 = vector.load %arg2[%c0, %c0_0] : memref<32x32xf32, #tpu.memory_space<vmem>>, vector<32x32xf32>
    %c0_1 = arith.constant 0 : index
    %c0_2 = arith.constant 0 : index
    %2 = vector.load %arg3[%c0_1, %c0_2] : memref<1x32xf32, #tpu.memory_space<vmem>>, vector<1x32xf32>
    %c0_3 = arith.constant 0 : index
    %c0_4 = arith.constant 0 : index
    %3 = vector.load %arg4[%c0_3, %c0_4] : memref<1x32xf32, #tpu.memory_space<vmem>>, vector<1x32xf32>
    %c0_5 = arith.constant 0 : index
    %c0_6 = arith.constant 0 : index
    %4 = vector.load %arg5[%c0_5, %c0_6] : memref<32x128xf32, #tpu.memory_space<vmem>>, vector<32x128xf32>
    %c0_7 = arith.constant 0 : index
    %c0_8 = arith.constant 0 : index
    %5 = vector.load %arg6[%c0_7, %c0_8] : memref<1x128xf32, #tpu.memory_space<vmem>>, vector<1x128xf32>
    %c0_9 = arith.constant 0 : index
    %c0_10 = arith.constant 0 : index
    %6 = vector.load %arg7[%c0_9, %c0_10] : memref<20x96xf32, #tpu.memory_space<vmem>>, vector<20x96xf32>
    %c0_11 = arith.constant 0 : index
    %c0_12 = arith.constant 0 : index
    %7 = vector.load %arg8[%c0_11, %c0_12] : memref<32x96xf32, #tpu.memory_space<vmem>>, vector<32x96xf32>
    %c0_13 = arith.constant 0 : index
    %c0_14 = arith.constant 0 : index
    %8 = vector.load %arg9[%c0_13, %c0_14] : memref<1x96xf32, #tpu.memory_space<vmem>>, vector<1x96xf32>
    %c0_15 = arith.constant 0 : index
    %c0_16 = arith.constant 0 : index
    %9 = vector.load %arg10[%c0_15, %c0_16] : memref<32x20xf32, #tpu.memory_space<vmem>>, vector<32x20xf32>
    %c0_17 = arith.constant 0 : index
    %c0_18 = arith.constant 0 : index
    %10 = vector.load %arg11[%c0_17, %c0_18] : memref<1x20xf32, #tpu.memory_space<vmem>>, vector<1x20xf32>
    %c0_19 = arith.constant 0 : index
    %c0_20 = arith.constant 0 : index
    %c0_21 = arith.constant 0 : index
    %11 = vector.load %arg0[%c0_19, %c0_20, %c0_21] : memref<2x8x32xf32, #tpu.memory_space<vmem>>, vector<1x8x32xf32>
    %12 = vector.shape_cast %11 : vector<1x8x32xf32> to vector<8x32xf32>
    %c1 = arith.constant 1 : index
    %c0_22 = arith.constant 0 : index
    %c0_23 = arith.constant 0 : index
    %13 = vector.load %arg0[%c1, %c0_22, %c0_23] : memref<2x8x32xf32, #tpu.memory_space<vmem>>, vector<1x8x32xf32>
    %14 = vector.shape_cast %13 : vector<1x8x32xf32> to vector<8x32xf32>
    %cst = arith.constant dense<0.000000e+00> : vector<8x32xf32>
    %15 = tpu.matmul %12, %1, %cst {dimension_numbers = #tpu.dot_dimension_numbers<[1], [0], [0], [1], [0, 0, 1, 1], [], []>} : vector<8x32xf32>, vector<32x32xf32>, vector<8x32xf32> -> vector<8x32xf32>
    %16 = vector.broadcast %2 : vector<1x32xf32> to vector<8x32xf32>
    %17 = arith.addf %15, %16 : vector<8x32xf32>
    %cst_24 = arith.constant dense<0.000000e+00> : vector<8x32xf32>
    %18 = tpu.matmul %14, %1, %cst_24 {dimension_numbers = #tpu.dot_dimension_numbers<[1], [0], [0], [1], [0, 0, 1, 1], [], []>} : vector<8x32xf32>, vector<32x32xf32>, vector<8x32xf32> -> vector<8x32xf32>
    %19 = vector.broadcast %2 : vector<1x32xf32> to vector<8x32xf32>
    %20 = arith.addf %18, %19 : vector<8x32xf32>
    %c0_25 = arith.constant 0 : index
    %c0_26 = arith.constant 0 : index
    %21 = vector.load %arg1[%c0_25, %c0_26] : memref<2x32xf32, #tpu.memory_space<vmem>>, vector<2x32xf32>
    %c0_i32 = arith.constant 0 : i32
    %22 = vector.broadcast %c0_i32 : i32 to vector<2x20xi32>
    %23 = arith.cmpi eq, %0, %22 : vector<2x20xi32>
    %24 = arith.extui %23 : vector<2x20xi1> to vector<2x20xi32>
    %25 = arith.sitofp %24 : vector<2x20xi32> to vector<2x20xf32>
    %cst_27 = arith.constant dense<0.000000e+00> : vector<2x128xf32>
    %26 = tpu.matmul %21, %4, %cst_27 {dimension_numbers = #tpu.dot_dimension_numbers<[1], [0], [0], [1], [0, 0, 1, 1], [], []>} : vector<2x32xf32>, vector<32x128xf32>, vector<2x128xf32> -> vector<2x128xf32>
    %27 = vector.broadcast %5 : vector<1x128xf32> to vector<2x128xf32>
    %28 = arith.addf %26, %27 : vector<2x128xf32>
    %29 = vector.extract_strided_slice %28 {offsets = [0, 0], sizes = [2, 32], strides = [1, 1]} : vector<2x128xf32> to vector<2x32xf32>
    %30 = vector.extract_strided_slice %28 {offsets = [0, 32], sizes = [2, 32], strides = [1, 1]} : vector<2x128xf32> to vector<2x32xf32>
    %31 = vector.extract_strided_slice %28 {offsets = [0, 64], sizes = [2, 32], strides = [1, 1]} : vector<2x128xf32> to vector<2x32xf32>
    %32 = vector.extract_strided_slice %28 {offsets = [0, 96], sizes = [2, 32], strides = [1, 1]} : vector<2x128xf32> to vector<2x32xf32>
    %33 = vector.extract_strided_slice %29 {offsets = [0, 0], sizes = [1, 32], strides = [1, 1]} : vector<2x32xf32> to vector<1x32xf32>
    %34 = vector.broadcast %33 : vector<1x32xf32> to vector<8x32xf32>
    %35 = arith.addf %34, %17 : vector<8x32xf32>
    %36 = math.tanh %35 : vector<8x32xf32>
    %cst_28 = arith.constant dense<0.000000e+00> : vector<1x8xf32>
    %37 = tpu.matmul %3, %36, %cst_28 {dimension_numbers = #tpu.dot_dimension_numbers<[1], [1], [0], [0], [0, 0, 1, 0], [], []>} : vector<1x32xf32>, vector<8x32xf32>, vector<1x8xf32> -> vector<1x8xf32>
    %38 = vector.extract_strided_slice %29 {offsets = [1, 0], sizes = [1, 32], strides = [1, 1]} : vector<2x32xf32> to vector<1x32xf32>
    %39 = vector.broadcast %38 : vector<1x32xf32> to vector<8x32xf32>
    %40 = arith.addf %39, %20 : vector<8x32xf32>
    %41 = math.tanh %40 : vector<8x32xf32>
    %cst_29 = arith.constant dense<0.000000e+00> : vector<1x8xf32>
    %42 = tpu.matmul %3, %41, %cst_29 {dimension_numbers = #tpu.dot_dimension_numbers<[1], [1], [0], [0], [0, 0, 1, 0], [], []>} : vector<1x32xf32>, vector<8x32xf32>, vector<1x8xf32> -> vector<1x8xf32>
    %43 = tpu.concatenate %37, %42 in 0 : vector<1x8xf32>, vector<1x8xf32> -> vector<2x8xf32>
    %cst_30 = arith.constant dense<0xFF800000> : vector<2xf32>
    %44 = vector.multi_reduction <maximumf>, %43, %cst_30 [1] : vector<2x8xf32> to vector<2xf32>
    %45 = vector.shape_cast %44 : vector<2xf32> to vector<2x1xf32>
    %46 = vector.broadcast %45 : vector<2x1xf32> to vector<2x8xf32>
    %47 = arith.subf %43, %46 : vector<2x8xf32>
    %48 = math.exp %47 : vector<2x8xf32>
    %cst_31 = arith.constant dense<0.000000e+00> : vector<2xf32>
    %49 = vector.multi_reduction <add>, %48, %cst_31 [1] : vector<2x8xf32> to vector<2xf32>
    %50 = vector.shape_cast %49 : vector<2xf32> to vector<2x1xf32>
    %51 = tpu.reciprocal %50 {approx = true} : vector<2x1xf32> -> vector<2x1xf32>
    %52 = vector.broadcast %51 : vector<2x1xf32> to vector<2x8xf32>
    %53 = arith.mulf %48, %52 : vector<2x8xf32>
    %c0_32 = arith.constant 0 : index
    %c0_33 = arith.constant 0 : index
    %c0_34 = arith.constant 0 : index
    %54 = vector.load %arg13[%c0_32, %c0_33, %c0_34] : memref<10x2x8xf32, #tpu.memory_space<vmem>>, vector<1x2x8xf32>
    %55 = vector.shape_cast %54 : vector<1x2x8xf32> to vector<2x8xf32>
    %56 = vector.shape_cast %53 : vector<2x8xf32> to vector<1x2x8xf32>
    tpu.vector_store %arg13[%c0_32, %c0_33, %c0_34], %56 {strides = array<i32>} : memref<10x2x8xf32, #tpu.memory_space<vmem>>, vector<1x2x8xf32>,
    %57 = vector.extract_strided_slice %53 {offsets = [0, 0], sizes = [1, 8], strides = [1, 1]} : vector<2x8xf32> to vector<1x8xf32>
    %cst_35 = arith.constant dense<0.000000e+00> : vector<1x32xf32>
    %58 = tpu.matmul %57, %12, %cst_35 {dimension_numbers = #tpu.dot_dimension_numbers<[1], [0], [0], [1], [0, 0, 1, 1], [], []>} : vector<1x8xf32>, vector<8x32xf32>, vector<1x32xf32> -> vector<1x32xf32>
    %59 = vector.extract_strided_slice %53 {offsets = [1, 0], sizes = [1, 8], strides = [1, 1]} : vector<2x8xf32> to vector<1x8xf32>
    %cst_36 = arith.constant dense<0.000000e+00> : vector<1x32xf32>
    %60 = tpu.matmul %59, %14, %cst_36 {dimension_numbers = #tpu.dot_dimension_numbers<[1], [0], [0], [1], [0, 0, 1, 1], [], []>} : vector<1x8xf32>, vector<8x32xf32>, vector<1x32xf32> -> vector<1x32xf32>
    %61 = tpu.concatenate %58, %60 in 0 : vector<1x32xf32>, vector<1x32xf32> -> vector<2x32xf32>
    %cst_37 = arith.constant dense<0.000000e+00> : vector<2x96xf32>
    %62 = tpu.matmul %25, %6, %cst_37 {dimension_numbers = #tpu.dot_dimension_numbers<[1], [0], [0], [1], [0, 0, 1, 1], [], []>} : vector<2x20xf32>, vector<20x96xf32>, vector<2x96xf32> -> vector<2x96xf32>
    %cst_38 = arith.constant dense<0.000000e+00> : vector<2x96xf32>
    %63 = tpu.matmul %61, %7, %cst_38 {dimension_numbers = #tpu.dot_dimension_numbers<[1], [0], [0], [1], [0, 0, 1, 1], [], []>} : vector<2x32xf32>, vector<32x96xf32>, vector<2x96xf32> -> vector<2x96xf32>
    %64 = arith.addf %62, %63 : vector<2x96xf32>
    %65 = vector.broadcast %8 : vector<1x96xf32> to vector<2x96xf32>
    %66 = arith.addf %64, %65 : vector<2x96xf32>
    %67 = vector.extract_strided_slice %66 {offsets = [0, 0], sizes = [2, 32], strides = [1, 1]} : vector<2x96xf32> to vector<2x32xf32>
    %68 = vector.extract_strided_slice %66 {offsets = [0, 32], sizes = [2, 32], strides = [1, 1]} : vector<2x96xf32> to vector<2x32xf32>
    %69 = vector.extract_strided_slice %66 {offsets = [0, 64], sizes = [2, 32], strides = [1, 1]} : vector<2x96xf32> to vector<2x32xf32>
    %70 = arith.addf %67, %30 : vector<2x32xf32>
    %71 = arith.negf %70 : vector<2x32xf32>
    %72 = math.exp %71 : vector<2x32xf32>
    %cst_39 = arith.constant 1.000000e+00 : f32
    %73 = vector.broadcast %cst_39 : f32 to vector<2x32xf32>
    %74 = arith.addf %73, %72 : vector<2x32xf32>
    %75 = arith.divf %73, %74 : vector<2x32xf32>
    %76 = arith.addf %68, %31 : vector<2x32xf32>
    %77 = arith.negf %76 : vector<2x32xf32>
    %78 = math.exp %77 : vector<2x32xf32>
    %cst_40 = arith.constant 1.000000e+00 : f32
    %79 = vector.broadcast %cst_40 : f32 to vector<2x32xf32>
    %80 = arith.addf %79, %78 : vector<2x32xf32>
    %81 = arith.divf %79, %80 : vector<2x32xf32>
    %82 = arith.mulf %75, %32 : vector<2x32xf32>
    %83 = arith.addf %69, %82 : vector<2x32xf32>
    %84 = math.tanh %83 : vector<2x32xf32>
    %cst_41 = arith.constant 1.000000e+00 : f32
    %85 = vector.broadcast %cst_41 : f32 to vector<2x32xf32>
    %86 = arith.subf %85, %81 : vector<2x32xf32>
    %87 = arith.mulf %86, %84 : vector<2x32xf32>
    %88 = arith.mulf %81, %21 : vector<2x32xf32>
    %89 = arith.addf %87, %88 : vector<2x32xf32>
    %cst_42 = arith.constant dense<0.000000e+00> : vector<2x20xf32>
    %90 = tpu.matmul %89, %9, %cst_42 {dimension_numbers = #tpu.dot_dimension_numbers<[1], [0], [0], [1], [0, 0, 1, 1], [], []>} : vector<2x32xf32>, vector<32x20xf32>, vector<2x20xf32> -> vector<2x20xf32>
    %91 = vector.broadcast %10 : vector<1x20xf32> to vector<2x20xf32>
    %92 = arith.addf %90, %91 : vector<2x20xf32>
    %cst_43 = arith.constant dense<0xFF800000> : vector<2xf32>
    %93 = vector.multi_reduction <maximumf>, %92, %cst_43 [1] : vector<2x20xf32> to vector<2xf32>
    %94 = vector.shape_cast %93 : vector<2xf32> to vector<2x1xf32>
    %95 = vector.broadcast %94 : vector<2x1xf32> to vector<2x20xf32>
    %96 = arith.subf %92, %95 : vector<2x20xf32>
    %97 = math.exp %96 : vector<2x20xf32>
    %cst_44 = arith.constant dense<0.000000e+00> : vector<2xf32>
    %98 = vector.multi_reduction <add>, %97, %cst_44 [1] : vector<2x20xf32> to vector<2xf32>
    %99 = vector.shape_cast %98 : vector<2xf32> to vector<2x1xf32>
    %100 = math.log %99 : vector<2x1xf32>
    %101 = arith.addf %100, %94 : vector<2x1xf32>
    %102 = vector.broadcast %101 : vector<2x1xf32> to vector<2x20xf32>
    %103 = arith.subf %92, %102 : vector<2x20xf32>
    %c0_45 = arith.constant 0 : index
    %c0_46 = arith.constant 0 : index
    %c0_47 = arith.constant 0 : index
    %104 = vector.load %arg12[%c0_45, %c0_46, %c0_47] : memref<10x2x20xf32, #tpu.memory_space<vmem>>, vector<1x2x20xf32>
    %105 = vector.shape_cast %104 : vector<1x2x20xf32> to vector<2x20xf32>
    %106 = vector.shape_cast %103 : vector<2x20xf32> to vector<1x2x20xf32>
    tpu.vector_store %arg12[%c0_45, %c0_46, %c0_47], %106 {strides = array<i32>} : memref<10x2x20xf32, #tpu.memory_space<vmem>>, vector<1x2x20xf32>,
    %107 = vector.broadcast %94 : vector<2x1xf32> to vector<2x20xf32>
    %108 = arith.cmpf oeq, %92, %107 : vector<2x20xf32>
    %c20_i32 = arith.constant 20 : i32
    %109 = vector.broadcast %c20_i32 : i32 to vector<2x20xi32>
    %110 = arith.select %108, %0, %109 : vector<2x20xi1>, vector<2x20xi32>
    %cst_48 = arith.constant dense<2147483647> : vector<2xi32>
    %111 = vector.multi_reduction <minsi>, %110, %cst_48 [1] : vector<2x20xi32> to vector<2xi32>
    %112 = vector.shape_cast %111 : vector<2xi32> to vector<2x1xi32>
    %113 = vector.broadcast %112 : vector<2x1xi32> to vector<2x20xi32>
    %114 = arith.cmpi eq, %0, %113 : vector<2x20xi32>
    %115 = arith.extui %114 : vector<2x20xi1> to vector<2x20xi32>
    %116 = arith.sitofp %115 : vector<2x20xi32> to vector<2x20xf32>
    %cst_49 = arith.constant dense<0.000000e+00> : vector<2x128xf32>
    %117 = tpu.matmul %89, %4, %cst_49 {dimension_numbers = #tpu.dot_dimension_numbers<[1], [0], [0], [1], [0, 0, 1, 1], [], []>} : vector<2x32xf32>, vector<32x128xf32>, vector<2x128xf32> -> vector<2x128xf32>
    %118 = vector.broadcast %5 : vector<1x128xf32> to vector<2x128xf32>
    %119 = arith.addf %117, %118 : vector<2x128xf32>
    %120 = vector.extract_strided_slice %119 {offsets = [0, 0], sizes = [2, 32], strides = [1, 1]} : vector<2x128xf32> to vector<2x32xf32>
    %121 = vector.extract_strided_slice %119 {offsets = [0, 32], sizes = [2, 32], strides = [1, 1]} : vector<2x128xf32> to vector<2x32xf32>
    %122 = vector.extract_strided_slice %119 {offsets = [0, 64], sizes = [2, 32], strides = [1, 1]} : vector<2x128xf32> to vector<2x32xf32>
    %123 = vector.extract_strided_slice %119 {offsets = [0, 96], sizes = [2, 32], strides = [1, 1]} : vector<2x128xf32> to vector<2x32xf32>
    %124 = vector.extract_strided_slice %120 {offsets = [0, 0], sizes = [1, 32], strides = [1, 1]} : vector<2x32xf32> to vector<1x32xf32>
    %125 = vector.broadcast %124 : vector<1x32xf32> to vector<8x32xf32>
    %126 = arith.addf %125, %17 : vector<8x32xf32>
    %127 = math.tanh %126 : vector<8x32xf32>
    %cst_50 = arith.constant dense<0.000000e+00> : vector<1x8xf32>
    %128 = tpu.matmul %3, %127, %cst_50 {dimension_numbers = #tpu.dot_dimension_numbers<[1], [1], [0], [0], [0, 0, 1, 0], [], []>} : vector<1x32xf32>, vector<8x32xf32>, vector<1x8xf32> -> vector<1x8xf32>
    %129 = vector.extract_strided_slice %120 {offsets = [1, 0], sizes = [1, 32], strides = [1, 1]} : vector<2x32xf32> to vector<1x32xf32>
    %130 = vector.broadcast %129 : vector<1x32xf32> to vector<8x32xf32>
    %131 = arith.addf %130, %20 : vector<8x32xf32>
    %132 = math.tanh %131 : vector<8x32xf32>
    %cst_51 = arith.constant dense<0.000000e+00> : vector<1x8xf32>
    %133 = tpu.matmul %3, %132, %cst_51 {dimension_numbers = #tpu.dot_dimension_numbers<[1], [1], [0], [0], [0, 0, 1, 0], [], []>} : vector<1x32xf32>, vector<8x32xf32>, vector<1x8xf32> -> vector<1x8xf32>
    %134 = tpu.concatenate %128, %133 in 0 : vector<1x8xf32>, vector<1x8xf32> -> vector<2x8xf32>
    %cst_52 = arith.constant dense<0xFF800000> : vector<2xf32>
    %135 = vector.multi_reduction <maximumf>, %134, %cst_52 [1] : vector<2x8xf32> to vector<2xf32>
    %136 = vector.shape_cast %135 : vector<2xf32> to vector<2x1xf32>
    %137 = vector.broadcast %136 : vector<2x1xf32> to vector<2x8xf32>
    %138 = arith.subf %134, %137 : vector<2x8xf32>
    %139 = math.exp %138 : vector<2x8xf32>
    %cst_53 = arith.constant dense<0.000000e+00> : vector<2xf32>
    %140 = vector.multi_reduction <add>, %139, %cst_53 [1] : vector<2x8xf32> to vector<2xf32>
    %141 = vector.shape_cast %140 : vector<2xf32> to vector<2x1xf32>
    %142 = tpu.reciprocal %141 {approx = true} : vector<2x1xf32> -> vector<2x1xf32>
    %143 = vector.broadcast %142 : vector<2x1xf32> to vector<2x8xf32>
    %144 = arith.mulf %139, %143 : vector<2x8xf32>
    %c1_54 = arith.constant 1 : index
    %c0_55 = arith.constant 0 : index
    %c0_56 = arith.constant 0 : index
    %145 = vector.load %arg13[%c1_54, %c0_55, %c0_56] : memref<10x2x8xf32, #tpu.memory_space<vmem>>, vector<1x2x8xf32>
    %146 = vector.shape_cast %145 : vector<1x2x8xf32> to vector<2x8xf32>
    %147 = vector.shape_cast %144 : vector<2x8xf32> to vector<1x2x8xf32>
    tpu.vector_store %arg13[%c1_54, %c0_55, %c0_56], %147 {strides = array<i32>} : memref<10x2x8xf32, #tpu.memory_space<vmem>>, vector<1x2x8xf32>,
    %148 = vector.extract_strided_slice %144 {offsets = [0, 0], sizes = [1, 8], strides = [1, 1]} : vector<2x8xf32> to vector<1x8xf32>
    %cst_57 = arith.constant dense<0.000000e+00> : vector<1x32xf32>
    %149 = tpu.matmul %148, %12, %cst_57 {dimension_numbers = #tpu.dot_dimension_numbers<[1], [0], [0], [1], [0, 0, 1, 1], [], []>} : vector<1x8xf32>, vector<8x32xf32>, vector<1x32xf32> -> vector<1x32xf32>
    %150 = vector.extract_strided_slice %144 {offsets = [1, 0], sizes = [1, 8], strides = [1, 1]} : vector<2x8xf32> to vector<1x8xf32>
    %cst_58 = arith.constant dense<0.000000e+00> : vector<1x32xf32>
    %151 = tpu.matmul %150, %14, %cst_58 {dimension_numbers = #tpu.dot_dimension_numbers<[1], [0], [0], [1], [0, 0, 1, 1], [], []>} : vector<1x8xf32>, vector<8x32xf32>, vector<1x32xf32> -> vector<1x32xf32>
    %152 = tpu.concatenate %149, %151 in 0 : vector<1x32xf32>, vector<1x32xf32> -> vector<2x32xf32>
    %cst_59 = arith.constant dense<0.000000e+00> : vector<2x96xf32>
    %153 = tpu.matmul %116, %6, %cst_59 {dimension_numbers = #tpu.dot_dimension_numbers<[1], [0], [0], [1], [0, 0, 1, 1], [], []>} : vector<2x20xf32>, vector<20x96xf32>, vector<2x96xf32> -> vector<2x96xf32>
    %cst_60 = arith.constant dense<0.000000e+00> : vector<2x96xf32>
    %154 = tpu.matmul %152, %7, %cst_60 {dimension_numbers = #tpu.dot_dimension_numbers<[1], [0], [0], [1], [0, 0, 1, 1], [], []>} : vector<2x32xf32>, vector<32x96xf32>, vector<2x96xf32> -> vector<2x96xf32>
    %155 = arith.addf %153, %154 : vector<2x96xf32>
    %156 = vector.broadcast %8 : vector<1x96xf32> to vector<2x96xf32>
    %157 = arith.addf %155, %156 : vector<2x96xf32>
    %158 = vector.extract_strided_slice %157 {offsets = [0, 0], sizes = [2, 32], strides = [1, 1]} : vector<2x96xf32> to vector<2x32xf32>
    %159 = vector.extract_strided_slice %157 {offsets = [0, 32], sizes = [2, 32], strides = [1, 1]} : vector<2x96xf32> to vector<2x32xf32>
    %160 = vector.extract_strided_slice %157 {offsets = [0, 64], sizes = [2, 32], strides = [1, 1]} : vector<2x96xf32> to vector<2x32xf32>
    %161 = arith.addf %158, %121 : vector<2x32xf32>
    %162 = arith.negf %161 : vector<2x32xf32>
    %163 = math.exp %162 : vector<2x32xf32>
    %cst_61 = arith.constant 1.000000e+00 : f32
    %164 = vector.broadcast %cst_61 : f32 to vector<2x32xf32>
    %165 = arith.addf %164, %163 : vector<2x32xf32>
    %166 = arith.divf %164, %165 : vector<2x32xf32>
    %167 = arith.addf %159, %122 : vector<2x32xf32>
    %168 = arith.negf %167 : vector<2x32xf32>
    %169 = math.exp %168 : vector<2x32xf32>
    %cst_62 = arith.constant 1.000000e+00 : f32
    %170 = vector.broadcast %cst_62 : f32 to vector<2x32xf32>
    %171 = arith.addf %170, %169 : vector<2x32xf32>
    %172 = arith.divf %170, %171 : vector<2x32xf32>
    %173 = arith.mulf %166, %123 : vector<2x32xf32>
    %174 = arith.addf %160, %173 : vector<2x32xf32>
    %175 = math.tanh %174 : vector<2x32xf32>
    %cst_63 = arith.constant 1.000000e+00 : f32
    %176 = vector.broadcast %cst_63 : f32 to vector<2x32xf32>
    %177 = arith.subf %176, %172 : vector<2x32xf32>
    %178 = arith.mulf %177, %175 : vector<2x32xf32>
    %179 = arith.mulf %172, %89 : vector<2x32xf32>
    %180 = arith.addf %178, %179 : vector<2x32xf32>
    %cst_64 = arith.constant dense<0.000000e+00> : vector<2x20xf32>
    %181 = tpu.matmul %180, %9, %cst_64 {dimension_numbers = #tpu.dot_dimension_numbers<[1], [0], [0], [1], [0, 0, 1, 1], [], []>} : vector<2x32xf32>, vector<32x20xf32>, vector<2x20xf32> -> vector<2x20xf32>
    %182 = vector.broadcast %10 : vector<1x20xf32> to vector<2x20xf32>
    %183 = arith.addf %181, %182 : vector<2x20xf32>
    %cst_65 = arith.constant dense<0xFF800000> : vector<2xf32>
    %184 = vector.multi_reduction <maximumf>, %183, %cst_65 [1] : vector<2x20xf32> to vector<2xf32>
    %185 = vector.shape_cast %184 : vector<2xf32> to vector<2x1xf32>
    %186 = vector.broadcast %185 : vector<2x1xf32> to vector<2x20xf32>
    %187 = arith.subf %183, %186 : vector<2x20xf32>
    %188 = math.exp %187 : vector<2x20xf32>
    %cst_66 = arith.constant dense<0.000000e+00> : vector<2xf32>
    %189 = vector.multi_reduction <add>, %188, %cst_66 [1] : vector<2x20xf32> to vector<2xf32>
    %190 = vector.shape_cast %189 : vector<2xf32> to vector<2x1xf32>
    %191 = math.log %190 : vector<2x1xf32>
    %192 = arith.addf %191, %185 : vector<2x1xf32>
    %193 = vector.broadcast %192 : vector<2x1xf32> to vector<2x20xf32>
    %194 = arith.subf %183, %193 : vector<2x20xf32>
    %c1_67 = arith.constant 1 : index
    %c0_68 = arith.constant 0 : index
    %c0_69 = arith.constant 0 : index
    %195 = vector.load %arg12[%c1_67, %c0_68, %c0_69] : memref<10x2x20xf32, #tpu.memory_space<vmem>>, vector<1x2x20xf32>
    %196 = vector.shape_cast %195 : vector<1x2x20xf32> to vector<2x20xf32>
    %197 = vector.shape_cast %194 : vector<2x20xf32> to vector<1x2x20xf32>
    tpu.vector_store %arg12[%c1_67, %c0_68, %c0_69], %197 {strides = array<i32>} : memref<10x2x20xf32, #tpu.memory_space<vmem>>, vector<1x2x20xf32>,
    %198 = vector.broadcast %185 : vector<2x1xf32> to vector<2x20xf32>
    %199 = arith.cmpf oeq, %183, %198 : vector<2x20xf32>
    %c20_i32_70 = arith.constant 20 : i32
    %200 = vector.broadcast %c20_i32_70 : i32 to vector<2x20xi32>
    %201 = arith.select %199, %0, %200 : vector<2x20xi1>, vector<2x20xi32>
    %cst_71 = arith.constant dense<2147483647> : vector<2xi32>
    %202 = vector.multi_reduction <minsi>, %201, %cst_71 [1] : vector<2x20xi32> to vector<2xi32>
    %203 = vector.shape_cast %202 : vector<2xi32> to vector<2x1xi32>
    %204 = vector.broadcast %203 : vector<2x1xi32> to vector<2x20xi32>
    %205 = arith.cmpi eq, %0, %204 : vector<2x20xi32>
    %206 = arith.extui %205 : vector<2x20xi1> to vector<2x20xi32>
    %207 = arith.sitofp %206 : vector<2x20xi32> to vector<2x20xf32>
    %cst_72 = arith.constant dense<0.000000e+00> : vector<2x128xf32>
    %208 = tpu.matmul %180, %4, %cst_72 {dimension_numbers = #tpu.dot_dimension_numbers<[1], [0], [0], [1], [0, 0, 1, 1], [], []>} : vector<2x32xf32>, vector<32x128xf32>, vector<2x128xf32> -> vector<2x128xf32>
    %209 = vector.broadcast %5 : vector<1x128xf32> to vector<2x128xf32>
    %210 = arith.addf %208, %209 : vector<2x128xf32>
    %211 = vector.extract_strided_slice %210 {offsets = [0, 0], sizes = [2, 32], strides = [1, 1]} : vector<2x128xf32> to vector<2x32xf32>
    %212 = vector.extract_strided_slice %210 {offsets = [0, 32], sizes = [2, 32], strides = [1, 1]} : vector<2x128xf32> to vector<2x32xf32>
    %213 = vector.extract_strided_slice %210 {offsets = [0, 64], sizes = [2, 32], strides = [1, 1]} : vector<2x128xf32> to vector<2x32xf32>
    %214 = vector.extract_strided_slice %210 {offsets = [0, 96], sizes = [2, 32], strides = [1, 1]} : vector<2x128xf32> to vector<2x32xf32>
    %215 = vector.extract_strided_slice %211 {offsets = [0, 0], sizes = [1, 32], strides = [1, 1]} : vector<2x32xf32> to vector<1x32xf32>
    %216 = vector.broadcast %215 : vector<1x32xf32> to vector<8x32xf32>
    %217 = arith.addf %216, %17 : vector<8x32xf32>
    %218 = math.tanh %217 : vector<8x32xf32>
    %cst_73 = arith.constant dense<0.000000e+00> : vector<1x8xf32>
    %219 = tpu.matmul %3, %218, %cst_73 {dimension_numbers = #tpu.dot_dimension_numbers<[1], [1], [0], [0], [0, 0, 1, 0], [], []>} : vector<1x32xf32>, vector<8x32xf32>, vector<1x8xf32> -> vector<1x8xf32>
    %220 = vector.extract_strided_slice %211 {offsets = [1, 0], sizes = [1, 32], strides = [1, 1]} : vector<2x32xf32> to vector<1x32xf32>
    %221 = vector.broadcast %220 : vector<1x32xf32> to vector<8x32xf32>
    %222 = arith.addf %221, %20 : vector<8x32xf32>
    %223 = math.tanh %222 : vector<8x32xf32>
    %cst_74 = arith.constant dense<0.000000e+00> : vector<1x8xf32>
    %224 = tpu.matmul %3, %223, %cst_74 {dimension_numbers = #tpu.dot_dimension_numbers<[1], [1], [0], [0], [0, 0, 1, 0], [], []>} : vector<1x32xf32>, vector<8x32xf32>, vector<1x8xf32> -> vector<1x8xf32>
    %225 = tpu.concatenate %219, %224 in 0 : vector<1x8xf32>, vector<1x8xf32> -> vector<2x8xf32>
    %cst_75 = arith.constant dense<0xFF800000> : vector<2xf32>
    %226 = vector.multi_reduction <maximumf>, %225, %cst_75 [1] : vector<2x8xf32> to vector<2xf32>
    %227 = vector.shape_cast %226 : vector<2xf32> to vector<2x1xf32>
    %228 = vector.broadcast %227 : vector<2x1xf32> to vector<2x8xf32>
    %229 = arith.subf %225, %228 : vector<2x8xf32>
    %230 = math.exp %229 : vector<2x8xf32>
    %cst_76 = arith.constant dense<0.000000e+00> : vector<2xf32>
    %231 = vector.multi_reduction <add>, %230, %cst_76 [1] : vector<2x8xf32> to vector<2xf32>
    %232 = vector.shape_cast %231 : vector<2xf32> to vector<2x1xf32>
    %233 = tpu.reciprocal %232 {approx = true} : vector<2x1xf32> -> vector<2x1xf32>
    %234 = vector.broadcast %233 : vector<2x1xf32> to vector<2x8xf32>
    %235 = arith.mulf %230, %234 : vector<2x8xf32>
    %c2 = arith.constant 2 : index
    %c0_77 = arith.constant 0 : index
    %c0_78 = arith.constant 0 : index
    %236 = vector.load %arg13[%c2, %c0_77, %c0_78] : memref<10x2x8xf32, #tpu.memory_space<vmem>>, vector<1x2x8xf32>
    %237 = vector.shape_cast %236 : vector<1x2x8xf32> to vector<2x8xf32>
    %238 = vector.shape_cast %235 : vector<2x8xf32> to vector<1x2x8xf32>
    tpu.vector_store %arg13[%c2, %c0_77, %c0_78], %238 {strides = array<i32>} : memref<10x2x8xf32, #tpu.memory_space<vmem>>, vector<1x2x8xf32>,
    %239 = vector.extract_strided_slice %235 {offsets = [0, 0], sizes = [1, 8], strides = [1, 1]} : vector<2x8xf32> to vector<1x8xf32>
    %cst_79 = arith.constant dense<0.000000e+00> : vector<1x32xf32>
    %240 = tpu.matmul %239, %12, %cst_79 {dimension_numbers = #tpu.dot_dimension_numbers<[1], [0], [0], [1], [0, 0, 1, 1], [], []>} : vector<1x8xf32>, vector<8x32xf32>, vector<1x32xf32> -> vector<1x32xf32>
    %241 = vector.extract_strided_slice %235 {offsets = [1, 0], sizes = [1, 8], strides = [1, 1]} : vector<2x8xf32> to vector<1x8xf32>
    %cst_80 = arith.constant dense<0.000000e+00> : vector<1x32xf32>
    %242 = tpu.matmul %241, %14, %cst_80 {dimension_numbers = #tpu.dot_dimension_numbers<[1], [0], [0], [1], [0, 0, 1, 1], [], []>} : vector<1x8xf32>, vector<8x32xf32>, vector<1x32xf32> -> vector<1x32xf32>
    %243 = tpu.concatenate %240, %242 in 0 : vector<1x32xf32>, vector<1x32xf32> -> vector<2x32xf32>
    %cst_81 = arith.constant dense<0.000000e+00> : vector<2x96xf32>
    %244 = tpu.matmul %207, %6, %cst_81 {dimension_numbers = #tpu.dot_dimension_numbers<[1], [0], [0], [1], [0, 0, 1, 1], [], []>} : vector<2x20xf32>, vector<20x96xf32>, vector<2x96xf32> -> vector<2x96xf32>
    %cst_82 = arith.constant dense<0.000000e+00> : vector<2x96xf32>
    %245 = tpu.matmul %243, %7, %cst_82 {dimension_numbers = #tpu.dot_dimension_numbers<[1], [0], [0], [1], [0, 0, 1, 1], [], []>} : vector<2x32xf32>, vector<32x96xf32>, vector<2x96xf32> -> vector<2x96xf32>
    %246 = arith.addf %244, %245 : vector<2x96xf32>
    %247 = vector.broadcast %8 : vector<1x96xf32> to vector<2x96xf32>
    %248 = arith.addf %246, %247 : vector<2x96xf32>
    %249 = vector.extract_strided_slice %248 {offsets = [0, 0], sizes = [2, 32], strides = [1, 1]} : vector<2x96xf32> to vector<2x32xf32>
    %250 = vector.extract_strided_slice %248 {offsets = [0, 32], sizes = [2, 32], strides = [1, 1]} : vector<2x96xf32> to vector<2x32xf32>
    %251 = vector.extract_strided_slice %248 {offsets = [0, 64], sizes = [2, 32], strides = [1, 1]} : vector<2x96xf32> to vector<2x32xf32>
    %252 = arith.addf %249, %212 : vector<2x32xf32>
    %253 = arith.negf %252 : vector<2x32xf32>
    %254 = math.exp %253 : vector<2x32xf32>
    %cst_83 = arith.constant 1.000000e+00 : f32
    %255 = vector.broadcast %cst_83 : f32 to vector<2x32xf32>
    %256 = arith.addf %255, %254 : vector<2x32xf32>
    %257 = arith.divf %255, %256 : vector<2x32xf32>
    %258 = arith.addf %250, %213 : vector<2x32xf32>
    %259 = arith.negf %258 : vector<2x32xf32>
    %260 = math.exp %259 : vector<2x32xf32>
    %cst_84 = arith.constant 1.000000e+00 : f32
    %261 = vector.broadcast %cst_84 : f32 to vector<2x32xf32>
    %262 = arith.addf %261, %260 : vector<2x32xf32>
    %263 = arith.divf %261, %262 : vector<2x32xf32>
    %264 = arith.mulf %257, %214 : vector<2x32xf32>
    %265 = arith.addf %251, %264 : vector<2x32xf32>
    %266 = math.tanh %265 : vector<2x32xf32>
    %cst_85 = arith.constant 1.000000e+00 : f32
    %267 = vector.broadcast %cst_85 : f32 to vector<2x32xf32>
    %268 = arith.subf %267, %263 : vector<2x32xf32>
    %269 = arith.mulf %268, %266 : vector<2x32xf32>
    %270 = arith.mulf %263, %180 : vector<2x32xf32>
    %271 = arith.addf %269, %270 : vector<2x32xf32>
    %cst_86 = arith.constant dense<0.000000e+00> : vector<2x20xf32>
    %272 = tpu.matmul %271, %9, %cst_86 {dimension_numbers = #tpu.dot_dimension_numbers<[1], [0], [0], [1], [0, 0, 1, 1], [], []>} : vector<2x32xf32>, vector<32x20xf32>, vector<2x20xf32> -> vector<2x20xf32>
    %273 = vector.broadcast %10 : vector<1x20xf32> to vector<2x20xf32>
    %274 = arith.addf %272, %273 : vector<2x20xf32>
    %cst_87 = arith.constant dense<0xFF800000> : vector<2xf32>
    %275 = vector.multi_reduction <maximumf>, %274, %cst_87 [1] : vector<2x20xf32> to vector<2xf32>
    %276 = vector.shape_cast %275 : vector<2xf32> to vector<2x1xf32>
    %277 = vector.broadcast %276 : vector<2x1xf32> to vector<2x20xf32>
    %278 = arith.subf %274, %277 : vector<2x20xf32>
    %279 = math.exp %278 : vector<2x20xf32>
    %cst_88 = arith.constant dense<0.000000e+00> : vector<2xf32>
    %280 = vector.multi_reduction <add>, %279, %cst_88 [1] : vector<2x20xf32> to vector<2xf32>
    %281 = vector.shape_cast %280 : vector<2xf32> to vector<2x1xf32>
    %282 = math.log %281 : vector<2x1xf32>
    %283 = arith.addf %282, %276 : vector<2x1xf32>
    %284 = vector.broadcast %283 : vector<2x1xf32> to vector<2x20xf32>
    %285 = arith.subf %274, %284 : vector<2x20xf32>
    %c2_89 = arith.constant 2 : index
    %c0_90 = arith.constant 0 : index
    %c0_91 = arith.constant 0 : index
    %286 = vector.load %arg12[%c2_89, %c0_90, %c0_91] : memref<10x2x20xf32, #tpu.memory_space<vmem>>, vector<1x2x20xf32>
    %287 = vector.shape_cast %286 : vector<1x2x20xf32> to vector<2x20xf32>
    %288 = vector.shape_cast %285 : vector<2x20xf32> to vector<1x2x20xf32>
    tpu.vector_store %arg12[%c2_89, %c0_90, %c0_91], %288 {strides = array<i32>} : memref<10x2x20xf32, #tpu.memory_space<vmem>>, vector<1x2x20xf32>,
    %289 = vector.broadcast %276 : vector<2x1xf32> to vector<2x20xf32>
    %290 = arith.cmpf oeq, %274, %289 : vector<2x20xf32>
    %c20_i32_92 = arith.constant 20 : i32
    %291 = vector.broadcast %c20_i32_92 : i32 to vector<2x20xi32>
    %292 = arith.select %290, %0, %291 : vector<2x20xi1>, vector<2x20xi32>
    %cst_93 = arith.constant dense<2147483647> : vector<2xi32>
    %293 = vector.multi_reduction <minsi>, %292, %cst_93 [1] : vector<2x20xi32> to vector<2xi32>
    %294 = vector.shape_cast %293 : vector<2xi32> to vector<2x1xi32>
    %295 = vector.broadcast %294 : vector<2x1xi32> to vector<2x20xi32>
    %296 = arith.cmpi eq, %0, %295 : vector<2x20xi32>
    %297 = arith.extui %296 : vector<2x20xi1> to vector<2x20xi32>
    %298 = arith.sitofp %297 : vector<2x20xi32> to vector<2x20xf32>
    %cst_94 = arith.constant dense<0.000000e+00> : vector<2x128xf32>
    %299 = tpu.matmul %271, %4, %cst_94 {dimension_numbers = #tpu.dot_dimension_numbers<[1], [0], [0], [1], [0, 0, 1, 1], [], []>} : vector<2x32xf32>, vector<32x128xf32>, vector<2x128xf32> -> vector<2x128xf32>
    %300 = vector.broadcast %5 : vector<1x128xf32> to vector<2x128xf32>
    %301 = arith.addf %299, %300 : vector<2x128xf32>
    %302 = vector.extract_strided_slice %301 {offsets = [0, 0], sizes = [2, 32], strides = [1, 1]} : vector<2x128xf32> to vector<2x32xf32>
    %303 = vector.extract_strided_slice %301 {offsets = [0, 32], sizes = [2, 32], strides = [1, 1]} : vector<2x128xf32> to vector<2x32xf32>
    %304 = vector.extract_strided_slice %301 {offsets = [0, 64], sizes = [2, 32], strides = [1, 1]} : vector<2x128xf32> to vector<2x32xf32>
    %305 = vector.extract_strided_slice %301 {offsets = [0, 96], sizes = [2, 32], strides = [1, 1]} : vector<2x128xf32> to vector<2x32xf32>
    %306 = vector.extract_strided_slice %302 {offsets = [0, 0], sizes = [1, 32], strides = [1, 1]} : vector<2x32xf32> to vector<1x32xf32>
    %307 = vector.broadcast %306 : vector<1x32xf32> to vector<8x32xf32>
    %308 = arith.addf %307, %17 : vector<8x32xf32>
    %309 = math.tanh %308 : vector<8x32xf32>
    %cst_95 = arith.constant dense<0.000000e+00> : vector<1x8xf32>
    %310 = tpu.matmul %3, %309, %cst_95 {dimension_numbers = #tpu.dot_dimension_numbers<[1], [1], [0], [0], [0, 0, 1, 0], [], []>} : vector<1x32xf32>, vector<8x32xf32>, vector<1x8xf32> -> vector<1x8xf32>
    %311 = vector.extract_strided_slice %302 {offsets = [1, 0], sizes = [1, 32], strides = [1, 1]} : vector<2x32xf32> to vector<1x32xf32>
    %312 = vector.broadcast %311 : vector<1x32xf32> to vector<8x32xf32>
    %313 = arith.addf %312, %20 : vector<8x32xf32>
    %314 = math.tanh %313 : vector<8x32xf32>
    %cst_96 = arith.constant dense<0.000000e+00> : vector<1x8xf32>
    %315 = tpu.matmul %3, %314, %cst_96 {dimension_numbers = #tpu.dot_dimension_numbers<[1], [1], [0], [0], [0, 0, 1, 0], [], []>} : vector<1x32xf32>, vector<8x32xf32>, vector<1x8xf32> -> vector<1x8xf32>
    %316 = tpu.concatenate %310, %315 in 0 : vector<1x8xf32>, vector<1x8xf32> -> vector<2x8xf32>
    %cst_97 = arith.constant dense<0xFF800000> : vector<2xf32>
    %317 = vector.multi_reduction <maximumf>, %316, %cst_97 [1] : vector<2x8xf32> to vector<2xf32>
    %318 = vector.shape_cast %317 : vector<2xf32> to vector<2x1xf32>
    %319 = vector.broadcast %318 : vector<2x1xf32> to vector<2x8xf32>
    %320 = arith.subf %316, %319 : vector<2x8xf32>
    %321 = math.exp %320 : vector<2x8xf32>
    %cst_98 = arith.constant dense<0.000000e+00> : vector<2xf32>
    %322 = vector.multi_reduction <add>, %321, %cst_98 [1] : vector<2x8xf32> to vector<2xf32>
    %323 = vector.shape_cast %322 : vector<2xf32> to vector<2x1xf32>
    %324 = tpu.reciprocal %323 {approx = true} : vector<2x1xf32> -> vector<2x1xf32>
    %325 = vector.broadcast %324 : vector<2x1xf32> to vector<2x8xf32>
    %326 = arith.mulf %321, %325 : vector<2x8xf32>
    %c3 = arith.constant 3 : index
    %c0_99 = arith.constant 0 : index
    %c0_100 = arith.constant 0 : index
    %327 = vector.load %arg13[%c3, %c0_99, %c0_100] : memref<10x2x8xf32, #tpu.memory_space<vmem>>, vector<1x2x8xf32>
    %328 = vector.shape_cast %327 : vector<1x2x8xf32> to vector<2x8xf32>
    %329 = vector.shape_cast %326 : vector<2x8xf32> to vector<1x2x8xf32>
    tpu.vector_store %arg13[%c3, %c0_99, %c0_100], %329 {strides = array<i32>} : memref<10x2x8xf32, #tpu.memory_space<vmem>>, vector<1x2x8xf32>,
    %330 = vector.extract_strided_slice %326 {offsets = [0, 0], sizes = [1, 8], strides = [1, 1]} : vector<2x8xf32> to vector<1x8xf32>
    %cst_101 = arith.constant dense<0.000000e+00> : vector<1x32xf32>
    %331 = tpu.matmul %330, %12, %cst_101 {dimension_numbers = #tpu.dot_dimension_numbers<[1], [0], [0], [1], [0, 0, 1, 1], [], []>} : vector<1x8xf32>, vector<8x32xf32>, vector<1x32xf32> -> vector<1x32xf32>
    %332 = vector.extract_strided_slice %326 {offsets = [1, 0], sizes = [1, 8], strides = [1, 1]} : vector<2x8xf32> to vector<1x8xf32>
    %cst_102 = arith.constant dense<0.000000e+00> : vector<1x32xf32>
    %333 = tpu.matmul %332, %14, %cst_102 {dimension_numbers = #tpu.dot_dimension_numbers<[1], [0], [0], [1], [0, 0, 1, 1], [], []>} : vector<1x8xf32>, vector<8x32xf32>, vector<1x32xf32> -> vector<1x32xf32>
    %334 = tpu.concatenate %331, %333 in 0 : vector<1x32xf32>, vector<1x32xf32> -> vector<2x32xf32>
    %cst_103 = arith.constant dense<0.000000e+00> : vector<2x96xf32>
    %335 = tpu.matmul %298, %6, %cst_103 {dimension_numbers = #tpu.dot_dimension_numbers<[1], [0], [0], [1], [0, 0, 1, 1], [], []>} : vector<2x20xf32>, vector<20x96xf32>, vector<2x96xf32> -> vector<2x96xf32>
    %cst_104 = arith.constant dense<0.000000e+00> : vector<2x96xf32>
    %336 = tpu.matmul %334, %7, %cst_104 {dimension_numbers = #tpu.dot_dimension_numbers<[1], [0], [0], [1], [0, 0, 1, 1], [], []>} : vector<2x32xf32>, vector<32x96xf32>, vector<2x96xf32> -> vector<2x96xf32>
    %337 = arith.addf %335, %336 : vector<2x96xf32>
    %338 = vector.broadcast %8 : vector<1x96xf32> to vector<2x96xf32>
    %339 = arith.addf %337, %338 : vector<2x96xf32>
    %340 = vector.extract_strided_slice %339 {offsets = [0, 0], sizes = [2, 32], strides = [1, 1]} : vector<2x96xf32> to vector<2x32xf32>
    %341 = vector.extract_strided_slice %339 {offsets = [0, 32], sizes = [2, 32], strides = [1, 1]} : vector<2x96xf32> to vector<2x32xf32>
    %342 = vector.extract_strided_slice %339 {offsets = [0, 64], sizes = [2, 32], strides = [1, 1]} : vector<2x96xf32> to vector<2x32xf32>
    %343 = arith.addf %340, %303 : vector<2x32xf32>
    %344 = arith.negf %343 : vector<2x32xf32>
    %345 = math.exp %344 : vector<2x32xf32>
    %cst_105 = arith.constant 1.000000e+00 : f32
    %346 = vector.broadcast %cst_105 : f32 to vector<2x32xf32>
    %347 = arith.addf %346, %345 : vector<2x32xf32>
    %348 = arith.divf %346, %347 : vector<2x32xf32>
    %349 = arith.addf %341, %304 : vector<2x32xf32>
    %350 = arith.negf %349 : vector<2x32xf32>
    %351 = math.exp %350 : vector<2x32xf32>
    %cst_106 = arith.constant 1.000000e+00 : f32
    %352 = vector.broadcast %cst_106 : f32 to vector<2x32xf32>
    %353 = arith.addf %352, %351 : vector<2x32xf32>
    %354 = arith.divf %352, %353 : vector<2x32xf32>
    %355 = arith.mulf %348, %305 : vector<2x32xf32>
    %356 = arith.addf %342, %355 : vector<2x32xf32>
    %357 = math.tanh %356 : vector<2x32xf32>
    %cst_107 = arith.constant 1.000000e+00 : f32
    %358 = vector.broadcast %cst_107 : f32 to vector<2x32xf32>
    %359 = arith.subf %358, %354 : vector<2x32xf32>
    %360 = arith.mulf %359, %357 : vector<2x32xf32>
    %361 = arith.mulf %354, %271 : vector<2x32xf32>
    %362 = arith.addf %360, %361 : vector<2x32xf32>
    %cst_108 = arith.constant dense<0.000000e+00> : vector<2x20xf32>
    %363 = tpu.matmul %362, %9, %cst_108 {dimension_numbers = #tpu.dot_dimension_numbers<[1], [0], [0], [1], [0, 0, 1, 1], [], []>} : vector<2x32xf32>, vector<32x20xf32>, vector<2x20xf32> -> vector<2x20xf32>
    %364 = vector.broadcast %10 : vector<1x20xf32> to vector<2x20xf32>
    %365 = arith.addf %363, %364 : vector<2x20xf32>
    %cst_109 = arith.constant dense<0xFF800000> : vector<2xf32>
    %366 = vector.multi_reduction <maximumf>, %365, %cst_109 [1] : vector<2x20xf32> to vector<2xf32>
    %367 = vector.shape_cast %366 : vector<2xf32> to vector<2x1xf32>
    %368 = vector.broadcast %367 : vector<2x1xf32> to vector<2x20xf32>
    %369 = arith.subf %365, %368 : vector<2x20xf32>
    %370 = math.exp %369 : vector<2x20xf32>
    %cst_110 = arith.constant dense<0.000000e+00> : vector<2xf32>
    %371 = vector.multi_reduction <add>, %370, %cst_110 [1] : vector<2x20xf32> to vector<2xf32>
    %372 = vector.shape_cast %371 : vector<2xf32> to vector<2x1xf32>
    %373 = math.log %372 : vector<2x1xf32>
    %374 = arith.addf %373, %367 : vector<2x1xf32>
    %375 = vector.broadcast %374 : vector<2x1xf32> to vector<2x20xf32>
    %376 = arith.subf %365, %375 : vector<2x20xf32>
    %c3_111 = arith.constant 3 : index
    %c0_112 = arith.constant 0 : index
    %c0_113 = arith.constant 0 : index
    %377 = vector.load %arg12[%c3_111, %c0_112, %c0_113] : memref<10x2x20xf32, #tpu.memory_space<vmem>>, vector<1x2x20xf32>
    %378 = vector.shape_cast %377 : vector<1x2x20xf32> to vector<2x20xf32>
    %379 = vector.shape_cast %376 : vector<2x20xf32> to vector<1x2x20xf32>
    tpu.vector_store %arg12[%c3_111, %c0_112, %c0_113], %379 {strides = array<i32>} : memref<10x2x20xf32, #tpu.memory_space<vmem>>, vector<1x2x20xf32>,
    %380 = vector.broadcast %367 : vector<2x1xf32> to vector<2x20xf32>
    %381 = arith.cmpf oeq, %365, %380 : vector<2x20xf32>
    %c20_i32_114 = arith.constant 20 : i32
    %382 = vector.broadcast %c20_i32_114 : i32 to vector<2x20xi32>
    %383 = arith.select %381, %0, %382 : vector<2x20xi1>, vector<2x20xi32>
    %cst_115 = arith.constant dense<2147483647> : vector<2xi32>
    %384 = vector.multi_reduction <minsi>, %383, %cst_115 [1] : vector<2x20xi32> to vector<2xi32>
    %385 = vector.shape_cast %384 : vector<2xi32> to vector<2x1xi32>
    %386 = vector.broadcast %385 : vector<2x1xi32> to vector<2x20xi32>
    %387 = arith.cmpi eq, %0, %386 : vector<2x20xi32>
    %388 = arith.extui %387 : vector<2x20xi1> to vector<2x20xi32>
    %389 = arith.sitofp %388 : vector<2x20xi32> to vector<2x20xf32>
    %cst_116 = arith.constant dense<0.000000e+00> : vector<2x128xf32>
    %390 = tpu.matmul %362, %4, %cst_116 {dimension_numbers = #tpu.dot_dimension_numbers<[1], [0], [0], [1], [0, 0, 1, 1], [], []>} : vector<2x32xf32>, vector<32x128xf32>, vector<2x128xf32> -> vector<2x128xf32>
    %391 = vector.broadcast %5 : vector<1x128xf32> to vector<2x128xf32>
    %392 = arith.addf %390, %391 : vector<2x128xf32>
    %393 = vector.extract_strided_slice %392 {offsets = [0, 0], sizes = [2, 32], strides = [1, 1]} : vector<2x128xf32> to vector<2x32xf32>
    %394 = vector.extract_strided_slice %392 {offsets = [0, 32], sizes = [2, 32], strides = [1, 1]} : vector<2x128xf32> to vector<2x32xf32>
    %395 = vector.extract_strided_slice %392 {offsets = [0, 64], sizes = [2, 32], strides = [1, 1]} : vector<2x128xf32> to vector<2x32xf32>
    %396 = vector.extract_strided_slice %392 {offsets = [0, 96], sizes = [2, 32], strides = [1, 1]} : vector<2x128xf32> to vector<2x32xf32>
    %397 = vector.extract_strided_slice %393 {offsets = [0, 0], sizes = [1, 32], strides = [1, 1]} : vector<2x32xf32> to vector<1x32xf32>
    %398 = vector.broadcast %397 : vector<1x32xf32> to vector<8x32xf32>
    %399 = arith.addf %398, %17 : vector<8x32xf32>
    %400 = math.tanh %399 : vector<8x32xf32>
    %cst_117 = arith.constant dense<0.000000e+00> : vector<1x8xf32>
    %401 = tpu.matmul %3, %400, %cst_117 {dimension_numbers = #tpu.dot_dimension_numbers<[1], [1], [0], [0], [0, 0, 1, 0], [], []>} : vector<1x32xf32>, vector<8x32xf32>, vector<1x8xf32> -> vector<1x8xf32>
    %402 = vector.extract_strided_slice %393 {offsets = [1, 0], sizes = [1, 32], strides = [1, 1]} : vector<2x32xf32> to vector<1x32xf32>
    %403 = vector.broadcast %402 : vector<1x32xf32> to vector<8x32xf32>
    %404 = arith.addf %403, %20 : vector<8x32xf32>
    %405 = math.tanh %404 : vector<8x32xf32>
    %cst_118 = arith.constant dense<0.000000e+00> : vector<1x8xf32>
    %406 = tpu.matmul %3, %405, %cst_118 {dimension_numbers = #tpu.dot_dimension_numbers<[1], [1], [0], [0], [0, 0, 1, 0], [], []>} : vector<1x32xf32>, vector<8x32xf32>, vector<1x8xf32> -> vector<1x8xf32>
    %407 = tpu.concatenate %401, %406 in 0 : vector<1x8xf32>, vector<1x8xf32> -> vector<2x8xf32>
    %cst_119 = arith.constant dense<0xFF800000> : vector<2xf32>
    %408 = vector.multi_reduction <maximumf>, %407, %cst_119 [1] : vector<2x8xf32> to vector<2xf32>
    %409 = vector.shape_cast %408 : vector<2xf32> to vector<2x1xf32>
    %410 = vector.broadcast %409 : vector<2x1xf32> to vector<2x8xf32>
    %411 = arith.subf %407, %410 : vector<2x8xf32>
    %412 = math.exp %411 : vector<2x8xf32>
    %cst_120 = arith.constant dense<0.000000e+00> : vector<2xf32>
    %413 = vector.multi_reduction <add>, %412, %cst_120 [1] : vector<2x8xf32> to vector<2xf32>
    %414 = vector.shape_cast %413 : vector<2xf32> to vector<2x1xf32>
    %415 = tpu.reciprocal %414 {approx = true} : vector<2x1xf32> -> vector<2x1xf32>
    %416 = vector.broadcast %415 : vector<2x1xf32> to vector<2x8xf32>
    %417 = arith.mulf %412, %416 : vector<2x8xf32>
    %c4 = arith.constant 4 : index
    %c0_121 = arith.constant 0 : index
    %c0_122 = arith.constant 0 : index
    %418 = vector.load %arg13[%c4, %c0_121, %c0_122] : memref<10x2x8xf32, #tpu.memory_space<vmem>>, vector<1x2x8xf32>
    %419 = vector.shape_cast %418 : vector<1x2x8xf32> to vector<2x8xf32>
    %420 = vector.shape_cast %417 : vector<2x8xf32> to vector<1x2x8xf32>
    tpu.vector_store %arg13[%c4, %c0_121, %c0_122], %420 {strides = array<i32>} : memref<10x2x8xf32, #tpu.memory_space<vmem>>, vector<1x2x8xf32>,
    %421 = vector.extract_strided_slice %417 {offsets = [0, 0], sizes = [1, 8], strides = [1, 1]} : vector<2x8xf32> to vector<1x8xf32>
    %cst_123 = arith.constant dense<0.000000e+00> : vector<1x32xf32>
    %422 = tpu.matmul %421, %12, %cst_123 {dimension_numbers = #tpu.dot_dimension_numbers<[1], [0], [0], [1], [0, 0, 1, 1], [], []>} : vector<1x8xf32>, vector<8x32xf32>, vector<1x32xf32> -> vector<1x32xf32>
    %423 = vector.extract_strided_slice %417 {offsets = [1, 0], sizes = [1, 8], strides = [1, 1]} : vector<2x8xf32> to vector<1x8xf32>
    %cst_124 = arith.constant dense<0.000000e+00> : vector<1x32xf32>
    %424 = tpu.matmul %423, %14, %cst_124 {dimension_numbers = #tpu.dot_dimension_numbers<[1], [0], [0], [1], [0, 0, 1, 1], [], []>} : vector<1x8xf32>, vector<8x32xf32>, vector<1x32xf32> -> vector<1x32xf32>
    %425 = tpu.concatenate %422, %424 in 0 : vector<1x32xf32>, vector<1x32xf32> -> vector<2x32xf32>
    %cst_125 = arith.constant dense<0.000000e+00> : vector<2x96xf32>
    %426 = tpu.matmul %389, %6, %cst_125 {dimension_numbers = #tpu.dot_dimension_numbers<[1], [0], [0], [1], [0, 0, 1, 1], [], []>} : vector<2x20xf32>, vector<20x96xf32>, vector<2x96xf32> -> vector<2x96xf32>
    %cst_126 = arith.constant dense<0.000000e+00> : vector<2x96xf32>
    %427 = tpu.matmul %425, %7, %cst_126 {dimension_numbers = #tpu.dot_dimension_numbers<[1], [0], [0], [1], [0, 0, 1, 1], [], []>} : vector<2x32xf32>, vector<32x96xf32>, vector<2x96xf32> -> vector<2x96xf32>
    %428 = arith.addf %426, %427 : vector<2x96xf32>
    %429 = vector.broadcast %8 : vector<1x96xf32> to vector<2x96xf32>
    %430 = arith.addf %428, %429 : vector<2x96xf32>
    %431 = vector.extract_strided_slice %430 {offsets = [0, 0], sizes = [2, 32], strides = [1, 1]} : vector<2x96xf32> to vector<2x32xf32>
    %432 = vector.extract_strided_slice %430 {offsets = [0, 32], sizes = [2, 32], strides = [1, 1]} : vector<2x96xf32> to vector<2x32xf32>
    %433 = vector.extract_strided_slice %430 {offsets = [0, 64], sizes = [2, 32], strides = [1, 1]} : vector<2x96xf32> to vector<2x32xf32>
    %434 = arith.addf %431, %394 : vector<2x32xf32>
    %435 = arith.negf %434 : vector<2x32xf32>
    %436 = math.exp %435 : vector<2x32xf32>
    %cst_127 = arith.constant 1.000000e+00 : f32
    %437 = vector.broadcast %cst_127 : f32 to vector<2x32xf32>
    %438 = arith.addf %437, %436 : vector<2x32xf32>
    %439 = arith.divf %437, %438 : vector<2x32xf32>
    %440 = arith.addf %432, %395 : vector<2x32xf32>
    %441 = arith.negf %440 : vector<2x32xf32>
    %442 = math.exp %441 : vector<2x32xf32>
    %cst_128 = arith.constant 1.000000e+00 : f32
    %443 = vector.broadcast %cst_128 : f32 to vector<2x32xf32>
    %444 = arith.addf %443, %442 : vector<2x32xf32>
    %445 = arith.divf %443, %444 : vector<2x32xf32>
    %446 = arith.mulf %439, %396 : vector<2x32xf32>
    %447 = arith.addf %433, %446 : vector<2x32xf32>
    %448 = math.tanh %447 : vector<2x32xf32>
    %cst_129 = arith.constant 1.000000e+00 : f32
    %449 = vector.broadcast %cst_129 : f32 to vector<2x32xf32>
    %450 = arith.subf %449, %445 : vector<2x32xf32>
    %451 = arith.mulf %450, %448 : vector<2x32xf32>
    %452 = arith.mulf %445, %362 : vector<2x32xf32>
    %453 = arith.addf %451, %452 : vector<2x32xf32>
    %cst_130 = arith.constant dense<0.000000e+00> : vector<2x20xf32>
    %454 = tpu.matmul %453, %9, %cst_130 {dimension_numbers = #tpu.dot_dimension_numbers<[1], [0], [0], [1], [0, 0, 1, 1], [], []>} : vector<2x32xf32>, vector<32x20xf32>, vector<2x20xf32> -> vector<2x20xf32>
    %455 = vector.broadcast %10 : vector<1x20xf32> to vector<2x20xf32>
    %456 = arith.addf %454, %455 : vector<2x20xf32>
    %cst_131 = arith.constant dense<0xFF800000> : vector<2xf32>
    %457 = vector.multi_reduction <maximumf>, %456, %cst_131 [1] : vector<2x20xf32> to vector<2xf32>
    %458 = vector.shape_cast %457 : vector<2xf32> to vector<2x1xf32>
    %459 = vector.broadcast %458 : vector<2x1xf32> to vector<2x20xf32>
    %460 = arith.subf %456, %459 : vector<2x20xf32>
    %461 = math.exp %460 : vector<2x20xf32>
    %cst_132 = arith.constant dense<0.000000e+00> : vector<2xf32>
    %462 = vector.multi_reduction <add>, %461, %cst_132 [1] : vector<2x20xf32> to vector<2xf32>
    %463 = vector.shape_cast %462 : vector<2xf32> to vector<2x1xf32>
    %464 = math.log %463 : vector<2x1xf32>
    %465 = arith.addf %464, %458 : vector<2x1xf32>
    %466 = vector.broadcast %465 : vector<2x1xf32> to vector<2x20xf32>
    %467 = arith.subf %456, %466 : vector<2x20xf32>
    %c4_133 = arith.constant 4 : index
    %c0_134 = arith.constant 0 : index
    %c0_135 = arith.constant 0 : index
    %468 = vector.load %arg12[%c4_133, %c0_134, %c0_135] : memref<10x2x20xf32, #tpu.memory_space<vmem>>, vector<1x2x20xf32>
    %469 = vector.shape_cast %468 : vector<1x2x20xf32> to vector<2x20xf32>
    %470 = vector.shape_cast %467 : vector<2x20xf32> to vector<1x2x20xf32>
    tpu.vector_store %arg12[%c4_133, %c0_134, %c0_135], %470 {strides = array<i32>} : memref<10x2x20xf32, #tpu.memory_space<vmem>>, vector<1x2x20xf32>,
    %471 = vector.broadcast %458 : vector<2x1xf32> to vector<2x20xf32>
    %472 = arith.cmpf oeq, %456, %471 : vector<2x20xf32>
    %c20_i32_136 = arith.constant 20 : i32
    %473 = vector.broadcast %c20_i32_136 : i32 to vector<2x20xi32>
    %474 = arith.select %472, %0, %473 : vector<2x20xi1>, vector<2x20xi32>
    %cst_137 = arith.constant dense<2147483647> : vector<2xi32>
    %475 = vector.multi_reduction <minsi>, %474, %cst_137 [1] : vector<2x20xi32> to vector<2xi32>
    %476 = vector.shape_cast %475 : vector<2xi32> to vector<2x1xi32>
    %477 = vector.broadcast %476 : vector<2x1xi32> to vector<2x20xi32>
    %478 = arith.cmpi eq, %0, %477 : vector<2x20xi32>
    %479 = arith.extui %478 : vector<2x20xi1> to vector<2x20xi32>
    %480 = arith.sitofp %479 : vector<2x20xi32> to vector<2x20xf32>
    %cst_138 = arith.constant dense<0.000000e+00> : vector<2x128xf32>
    %481 = tpu.matmul %453, %4, %cst_138 {dimension_numbers = #tpu.dot_dimension_numbers<[1], [0], [0], [1], [0, 0, 1, 1], [], []>} : vector<2x32xf32>, vector<32x128xf32>, vector<2x128xf32> -> vector<2x128xf32>
    %482 = vector.broadcast %5 : vector<1x128xf32> to vector<2x128xf32>
    %483 = arith.addf %481, %482 : vector<2x128xf32>
    %484 = vector.extract_strided_slice %483 {offsets = [0, 0], sizes = [2, 32], strides = [1, 1]} : vector<2x128xf32> to vector<2x32xf32>
    %485 = vector.extract_strided_slice %483 {offsets = [0, 32], sizes = [2, 32], strides = [1, 1]} : vector<2x128xf32> to vector<2x32xf32>
    %486 = vector.extract_strided_slice %483 {offsets = [0, 64], sizes = [2, 32], strides = [1, 1]} : vector<2x128xf32> to vector<2x32xf32>
    %487 = vector.extract_strided_slice %483 {offsets = [0, 96], sizes = [2, 32], strides = [1, 1]} : vector<2x128xf32> to vector<2x32xf32>
    %488 = vector.extract_strided_slice %484 {offsets = [0, 0], sizes = [1, 32], strides = [1, 1]} : vector<2x32xf32> to vector<1x32xf32>
    %489 = vector.broadcast %488 : vector<1x32xf32> to vector<8x32xf32>
    %490 = arith.addf %489, %17 : vector<8x32xf32>
    %491 = math.tanh %490 : vector<8x32xf32>
    %cst_139 = arith.constant dense<0.000000e+00> : vector<1x8xf32>
    %492 = tpu.matmul %3, %491, %cst_139 {dimension_numbers = #tpu.dot_dimension_numbers<[1], [1], [0], [0], [0, 0, 1, 0], [], []>} : vector<1x32xf32>, vector<8x32xf32>, vector<1x8xf32> -> vector<1x8xf32>
    %493 = vector.extract_strided_slice %484 {offsets = [1, 0], sizes = [1, 32], strides = [1, 1]} : vector<2x32xf32> to vector<1x32xf32>
    %494 = vector.broadcast %493 : vector<1x32xf32> to vector<8x32xf32>
    %495 = arith.addf %494, %20 : vector<8x32xf32>
    %496 = math.tanh %495 : vector<8x32xf32>
    %cst_140 = arith.constant dense<0.000000e+00> : vector<1x8xf32>
    %497 = tpu.matmul %3, %496, %cst_140 {dimension_numbers = #tpu.dot_dimension_numbers<[1], [1], [0], [0], [0, 0, 1, 0], [], []>} : vector<1x32xf32>, vector<8x32xf32>, vector<1x8xf32> -> vector<1x8xf32>
    %498 = tpu.concatenate %492, %497 in 0 : vector<1x8xf32>, vector<1x8xf32> -> vector<2x8xf32>
    %cst_141 = arith.constant dense<0xFF800000> : vector<2xf32>
    %499 = vector.multi_reduction <maximumf>, %498, %cst_141 [1] : vector<2x8xf32> to vector<2xf32>
    %500 = vector.shape_cast %499 : vector<2xf32> to vector<2x1xf32>
    %501 = vector.broadcast %500 : vector<2x1xf32> to vector<2x8xf32>
    %502 = arith.subf %498, %501 : vector<2x8xf32>
    %503 = math.exp %502 : vector<2x8xf32>
    %cst_142 = arith.constant dense<0.000000e+00> : vector<2xf32>
    %504 = vector.multi_reduction <add>, %503, %cst_142 [1] : vector<2x8xf32> to vector<2xf32>
    %505 = vector.shape_cast %504 : vector<2xf32> to vector<2x1xf32>
    %506 = tpu.reciprocal %505 {approx = true} : vector<2x1xf32> -> vector<2x1xf32>
    %507 = vector.broadcast %506 : vector<2x1xf32> to vector<2x8xf32>
    %508 = arith.mulf %503, %507 : vector<2x8xf32>
    %c5 = arith.constant 5 : index
    %c0_143 = arith.constant 0 : index
    %c0_144 = arith.constant 0 : index
    %509 = vector.load %arg13[%c5, %c0_143, %c0_144] : memref<10x2x8xf32, #tpu.memory_space<vmem>>, vector<1x2x8xf32>
    %510 = vector.shape_cast %509 : vector<1x2x8xf32> to vector<2x8xf32>
    %511 = vector.shape_cast %508 : vector<2x8xf32> to vector<1x2x8xf32>
    tpu.vector_store %arg13[%c5, %c0_143, %c0_144], %511 {strides = array<i32>} : memref<10x2x8xf32, #tpu.memory_space<vmem>>, vector<1x2x8xf32>,
    %512 = vector.extract_strided_slice %508 {offsets = [0, 0], sizes = [1, 8], strides = [1, 1]} : vector<2x8xf32> to vector<1x8xf32>
    %cst_145 = arith.constant dense<0.000000e+00> : vector<1x32xf32>
    %513 = tpu.matmul %512, %12, %cst_145 {dimension_numbers = #tpu.dot_dimension_numbers<[1], [0], [0], [1], [0, 0, 1, 1], [], []>} : vector<1x8xf32>, vector<8x32xf32>, vector<1x32xf32> -> vector<1x32xf32>
    %514 = vector.extract_strided_slice %508 {offsets = [1, 0], sizes = [1, 8], strides = [1, 1]} : vector<2x8xf32> to vector<1x8xf32>
    %cst_146 = arith.constant dense<0.000000e+00> : vector<1x32xf32>
    %515 = tpu.matmul %514, %14, %cst_146 {dimension_numbers = #tpu.dot_dimension_numbers<[1], [0], [0], [1], [0, 0, 1, 1], [], []>} : vector<1x8xf32>, vector<8x32xf32>, vector<1x32xf32> -> vector<1x32xf32>
    %516 = tpu.concatenate %513, %515 in 0 : vector<1x32xf32>, vector<1x32xf32> -> vector<2x32xf32>
    %cst_147 = arith.constant dense<0.000000e+00> : vector<2x96xf32>
    %517 = tpu.matmul %480, %6, %cst_147 {dimension_numbers = #tpu.dot_dimension_numbers<[1], [0], [0], [1], [0, 0, 1, 1], [], []>} : vector<2x20xf32>, vector<20x96xf32>, vector<2x96xf32> -> vector<2x96xf32>
    %cst_148 = arith.constant dense<0.000000e+00> : vector<2x96xf32>
    %518 = tpu.matmul %516, %7, %cst_148 {dimension_numbers = #tpu.dot_dimension_numbers<[1], [0], [0], [1], [0, 0, 1, 1], [], []>} : vector<2x32xf32>, vector<32x96xf32>, vector<2x96xf32> -> vector<2x96xf32>
    %519 = arith.addf %517, %518 : vector<2x96xf32>
    %520 = vector.broadcast %8 : vector<1x96xf32> to vector<2x96xf32>
    %521 = arith.addf %519, %520 : vector<2x96xf32>
    %522 = vector.extract_strided_slice %521 {offsets = [0, 0], sizes = [2, 32], strides = [1, 1]} : vector<2x96xf32> to vector<2x32xf32>
    %523 = vector.extract_strided_slice %521 {offsets = [0, 32], sizes = [2, 32], strides = [1, 1]} : vector<2x96xf32> to vector<2x32xf32>
    %524 = vector.extract_strided_slice %521 {offsets = [0, 64], sizes = [2, 32], strides = [1, 1]} : vector<2x96xf32> to vector<2x32xf32>
    %525 = arith.addf %522, %485 : vector<2x32xf32>
    %526 = arith.negf %525 : vector<2x32xf32>
    %527 = math.exp %526 : vector<2x32xf32>
    %cst_149 = arith.constant 1.000000e+00 : f32
    %528 = vector.broadcast %cst_149 : f32 to vector<2x32xf32>
    %529 = arith.addf %528, %527 : vector<2x32xf32>
    %530 = arith.divf %528, %529 : vector<2x32xf32>
    %531 = arith.addf %523, %486 : vector<2x32xf32>
    %532 = arith.negf %531 : vector<2x32xf32>
    %533 = math.exp %532 : vector<2x32xf32>
    %cst_150 = arith.constant 1.000000e+00 : f32
    %534 = vector.broadcast %cst_150 : f32 to vector<2x32xf32>
    %535 = arith.addf %534, %533 : vector<2x32xf32>
    %536 = arith.divf %534, %535 : vector<2x32xf32>
    %537 = arith.mulf %530, %487 : vector<2x32xf32>
    %538 = arith.addf %524, %537 : vector<2x32xf32>
    %539 = math.tanh %538 : vector<2x32xf32>
    %cst_151 = arith.constant 1.000000e+00 : f32
    %540 = vector.broadcast %cst_151 : f32 to vector<2x32xf32>
    %541 = arith.subf %540, %536 : vector<2x32xf32>
    %542 = arith.mulf %541, %539 : vector<2x32xf32>
    %543 = arith.mulf %536, %453 : vector<2x32xf32>
    %544 = arith.addf %542, %543 : vector<2x32xf32>
    %cst_152 = arith.constant dense<0.000000e+00> : vector<2x20xf32>
    %545 = tpu.matmul %544, %9, %cst_152 {dimension_numbers = #tpu.dot_dimension_numbers<[1], [0], [0], [1], [0, 0, 1, 1], [], []>} : vector<2x32xf32>, vector<32x20xf32>, vector<2x20xf32> -> vector<2x20xf32>
    %546 = vector.broadcast %10 : vector<1x20xf32> to vector<2x20xf32>
    %547 = arith.addf %545, %546 : vector<2x20xf32>
    %cst_153 = arith.constant dense<0xFF800000> : vector<2xf32>
    %548 = vector.multi_reduction <maximumf>, %547, %cst_153 [1] : vector<2x20xf32> to vector<2xf32>
    %549 = vector.shape_cast %548 : vector<2xf32> to vector<2x1xf32>
    %550 = vector.broadcast %549 : vector<2x1xf32> to vector<2x20xf32>
    %551 = arith.subf %547, %550 : vector<2x20xf32>
    %552 = math.exp %551 : vector<2x20xf32>
    %cst_154 = arith.constant dense<0.000000e+00> : vector<2xf32>
    %553 = vector.multi_reduction <add>, %552, %cst_154 [1] : vector<2x20xf32> to vector<2xf32>
    %554 = vector.shape_cast %553 : vector<2xf32> to vector<2x1xf32>
    %555 = math.log %554 : vector<2x1xf32>
    %556 = arith.addf %555, %549 : vector<2x1xf32>
    %557 = vector.broadcast %556 : vector<2x1xf32> to vector<2x20xf32>
    %558 = arith.subf %547, %557 : vector<2x20xf32>
    %c5_155 = arith.constant 5 : index
    %c0_156 = arith.constant 0 : index
    %c0_157 = arith.constant 0 : index
    %559 = vector.load %arg12[%c5_155, %c0_156, %c0_157] : memref<10x2x20xf32, #tpu.memory_space<vmem>>, vector<1x2x20xf32>
    %560 = vector.shape_cast %559 : vector<1x2x20xf32> to vector<2x20xf32>
    %561 = vector.shape_cast %558 : vector<2x20xf32> to vector<1x2x20xf32>
    tpu.vector_store %arg12[%c5_155, %c0_156, %c0_157], %561 {strides = array<i32>} : memref<10x2x20xf32, #tpu.memory_space<vmem>>, vector<1x2x20xf32>,
    %562 = vector.broadcast %549 : vector<2x1xf32> to vector<2x20xf32>
    %563 = arith.cmpf oeq, %547, %562 : vector<2x20xf32>
    %c20_i32_158 = arith.constant 20 : i32
    %564 = vector.broadcast %c20_i32_158 : i32 to vector<2x20xi32>
    %565 = arith.select %563, %0, %564 : vector<2x20xi1>, vector<2x20xi32>
    %cst_159 = arith.constant dense<2147483647> : vector<2xi32>
    %566 = vector.multi_reduction <minsi>, %565, %cst_159 [1] : vector<2x20xi32> to vector<2xi32>
    %567 = vector.shape_cast %566 : vector<2xi32> to vector<2x1xi32>
    %568 = vector.broadcast %567 : vector<2x1xi32> to vector<2x20xi32>
    %569 = arith.cmpi eq, %0, %568 : vector<2x20xi32>
    %570 = arith.extui %569 : vector<2x20xi1> to vector<2x20xi32>
    %571 = arith.sitofp %570 : vector<2x20xi32> to vector<2x20xf32>
    %cst_160 = arith.constant dense<0.000000e+00> : vector<2x128xf32>
    %572 = tpu.matmul %544, %4, %cst_160 {dimension_numbers = #tpu.dot_dimension_numbers<[1], [0], [0], [1], [0, 0, 1, 1], [], []>} : vector<2x32xf32>, vector<32x128xf32>, vector<2x128xf32> -> vector<2x128xf32>
    %573 = vector.broadcast %5 : vector<1x128xf32> to vector<2x128xf32>
    %574 = arith.addf %572, %573 : vector<2x128xf32>
    %575 = vector.extract_strided_slice %574 {offsets = [0, 0], sizes = [2, 32], strides = [1, 1]} : vector<2x128xf32> to vector<2x32xf32>
    %576 = vector.extract_strided_slice %574 {offsets = [0, 32], sizes = [2, 32], strides = [1, 1]} : vector<2x128xf32> to vector<2x32xf32>
    %577 = vector.extract_strided_slice %574 {offsets = [0, 64], sizes = [2, 32], strides = [1, 1]} : vector<2x128xf32> to vector<2x32xf32>
    %578 = vector.extract_strided_slice %574 {offsets = [0, 96], sizes = [2, 32], strides = [1, 1]} : vector<2x128xf32> to vector<2x32xf32>
    %579 = vector.extract_strided_slice %575 {offsets = [0, 0], sizes = [1, 32], strides = [1, 1]} : vector<2x32xf32> to vector<1x32xf32>
    %580 = vector.broadcast %579 : vector<1x32xf32> to vector<8x32xf32>
    %581 = arith.addf %580, %17 : vector<8x32xf32>
    %582 = math.tanh %581 : vector<8x32xf32>
    %cst_161 = arith.constant dense<0.000000e+00> : vector<1x8xf32>
    %583 = tpu.matmul %3, %582, %cst_161 {dimension_numbers = #tpu.dot_dimension_numbers<[1], [1], [0], [0], [0, 0, 1, 0], [], []>} : vector<1x32xf32>, vector<8x32xf32>, vector<1x8xf32> -> vector<1x8xf32>
    %584 = vector.extract_strided_slice %575 {offsets = [1, 0], sizes = [1, 32], strides = [1, 1]} : vector<2x32xf32> to vector<1x32xf32>
    %585 = vector.broadcast %584 : vector<1x32xf32> to vector<8x32xf32>
    %586 = arith.addf %585, %20 : vector<8x32xf32>
    %587 = math.tanh %586 : vector<8x32xf32>
    %cst_162 = arith.constant dense<0.000000e+00> : vector<1x8xf32>
    %588 = tpu.matmul %3, %587, %cst_162 {dimension_numbers = #tpu.dot_dimension_numbers<[1], [1], [0], [0], [0, 0, 1, 0], [], []>} : vector<1x32xf32>, vector<8x32xf32>, vector<1x8xf32> -> vector<1x8xf32>
    %589 = tpu.concatenate %583, %588 in 0 : vector<1x8xf32>, vector<1x8xf32> -> vector<2x8xf32>
    %cst_163 = arith.constant dense<0xFF800000> : vector<2xf32>
    %590 = vector.multi_reduction <maximumf>, %589, %cst_163 [1] : vector<2x8xf32> to vector<2xf32>
    %591 = vector.shape_cast %590 : vector<2xf32> to vector<2x1xf32>
    %592 = vector.broadcast %591 : vector<2x1xf32> to vector<2x8xf32>
    %593 = arith.subf %589, %592 : vector<2x8xf32>
    %594 = math.exp %593 : vector<2x8xf32>
    %cst_164 = arith.constant dense<0.000000e+00> : vector<2xf32>
    %595 = vector.multi_reduction <add>, %594, %cst_164 [1] : vector<2x8xf32> to vector<2xf32>
    %596 = vector.shape_cast %595 : vector<2xf32> to vector<2x1xf32>
    %597 = tpu.reciprocal %596 {approx = true} : vector<2x1xf32> -> vector<2x1xf32>
    %598 = vector.broadcast %597 : vector<2x1xf32> to vector<2x8xf32>
    %599 = arith.mulf %594, %598 : vector<2x8xf32>
    %c6 = arith.constant 6 : index
    %c0_165 = arith.constant 0 : index
    %c0_166 = arith.constant 0 : index
    %600 = vector.load %arg13[%c6, %c0_165, %c0_166] : memref<10x2x8xf32, #tpu.memory_space<vmem>>, vector<1x2x8xf32>
    %601 = vector.shape_cast %600 : vector<1x2x8xf32> to vector<2x8xf32>
    %602 = vector.shape_cast %599 : vector<2x8xf32> to vector<1x2x8xf32>
    tpu.vector_store %arg13[%c6, %c0_165, %c0_166], %602 {strides = array<i32>} : memref<10x2x8xf32, #tpu.memory_space<vmem>>, vector<1x2x8xf32>,
    %603 = vector.extract_strided_slice %599 {offsets = [0, 0], sizes = [1, 8], strides = [1, 1]} : vector<2x8xf32> to vector<1x8xf32>
    %cst_167 = arith.constant dense<0.000000e+00> : vector<1x32xf32>
    %604 = tpu.matmul %603, %12, %cst_167 {dimension_numbers = #tpu.dot_dimension_numbers<[1], [0], [0], [1], [0, 0, 1, 1], [], []>} : vector<1x8xf32>, vector<8x32xf32>, vector<1x32xf32> -> vector<1x32xf32>
    %605 = vector.extract_strided_slice %599 {offsets = [1, 0], sizes = [1, 8], strides = [1, 1]} : vector<2x8xf32> to vector<1x8xf32>
    %cst_168 = arith.constant dense<0.000000e+00> : vector<1x32xf32>
    %606 = tpu.matmul %605, %14, %cst_168 {dimension_numbers = #tpu.dot_dimension_numbers<[1], [0], [0], [1], [0, 0, 1, 1], [], []>} : vector<1x8xf32>, vector<8x32xf32>, vector<1x32xf32> -> vector<1x32xf32>
    %607 = tpu.concatenate %604, %606 in 0 : vector<1x32xf32>, vector<1x32xf32> -> vector<2x32xf32>
    %cst_169 = arith.constant dense<0.000000e+00> : vector<2x96xf32>
    %608 = tpu.matmul %571, %6, %cst_169 {dimension_numbers = #tpu.dot_dimension_numbers<[1], [0], [0], [1], [0, 0, 1, 1], [], []>} : vector<2x20xf32>, vector<20x96xf32>, vector<2x96xf32> -> vector<2x96xf32>
    %cst_170 = arith.constant dense<0.000000e+00> : vector<2x96xf32>
    %609 = tpu.matmul %607, %7, %cst_170 {dimension_numbers = #tpu.dot_dimension_numbers<[1], [0], [0], [1], [0, 0, 1, 1], [], []>} : vector<2x32xf32>, vector<32x96xf32>, vector<2x96xf32> -> vector<2x96xf32>
    %610 = arith.addf %608, %609 : vector<2x96xf32>
    %611 = vector.broadcast %8 : vector<1x96xf32> to vector<2x96xf32>
    %612 = arith.addf %610, %611 : vector<2x96xf32>
    %613 = vector.extract_strided_slice %612 {offsets = [0, 0], sizes = [2, 32], strides = [1, 1]} : vector<2x96xf32> to vector<2x32xf32>
    %614 = vector.extract_strided_slice %612 {offsets = [0, 32], sizes = [2, 32], strides = [1, 1]} : vector<2x96xf32> to vector<2x32xf32>
    %615 = vector.extract_strided_slice %612 {offsets = [0, 64], sizes = [2, 32], strides = [1, 1]} : vector<2x96xf32> to vector<2x32xf32>
    %616 = arith.addf %613, %576 : vector<2x32xf32>
    %617 = arith.negf %616 : vector<2x32xf32>
    %618 = math.exp %617 : vector<2x32xf32>
    %cst_171 = arith.constant 1.000000e+00 : f32
    %619 = vector.broadcast %cst_171 : f32 to vector<2x32xf32>
    %620 = arith.addf %619, %618 : vector<2x32xf32>
    %621 = arith.divf %619, %620 : vector<2x32xf32>
    %622 = arith.addf %614, %577 : vector<2x32xf32>
    %623 = arith.negf %622 : vector<2x32xf32>
    %624 = math.exp %623 : vector<2x32xf32>
    %cst_172 = arith.constant 1.000000e+00 : f32
    %625 = vector.broadcast %cst_172 : f32 to vector<2x32xf32>
    %626 = arith.addf %625, %624 : vector<2x32xf32>
    %627 = arith.divf %625, %626 : vector<2x32xf32>
    %628 = arith.mulf %621, %578 : vector<2x32xf32>
    %629 = arith.addf %615, %628 : vector<2x32xf32>
    %630 = math.tanh %629 : vector<2x32xf32>
    %cst_173 = arith.constant 1.000000e+00 : f32
    %631 = vector.broadcast %cst_173 : f32 to vector<2x32xf32>
    %632 = arith.subf %631, %627 : vector<2x32xf32>
    %633 = arith.mulf %632, %630 : vector<2x32xf32>
    %634 = arith.mulf %627, %544 : vector<2x32xf32>
    %635 = arith.addf %633, %634 : vector<2x32xf32>
    %cst_174 = arith.constant dense<0.000000e+00> : vector<2x20xf32>
    %636 = tpu.matmul %635, %9, %cst_174 {dimension_numbers = #tpu.dot_dimension_numbers<[1], [0], [0], [1], [0, 0, 1, 1], [], []>} : vector<2x32xf32>, vector<32x20xf32>, vector<2x20xf32> -> vector<2x20xf32>
    %637 = vector.broadcast %10 : vector<1x20xf32> to vector<2x20xf32>
    %638 = arith.addf %636, %637 : vector<2x20xf32>
    %cst_175 = arith.constant dense<0xFF800000> : vector<2xf32>
    %639 = vector.multi_reduction <maximumf>, %638, %cst_175 [1] : vector<2x20xf32> to vector<2xf32>
    %640 = vector.shape_cast %639 : vector<2xf32> to vector<2x1xf32>
    %641 = vector.broadcast %640 : vector<2x1xf32> to vector<2x20xf32>
    %642 = arith.subf %638, %641 : vector<2x20xf32>
    %643 = math.exp %642 : vector<2x20xf32>
    %cst_176 = arith.constant dense<0.000000e+00> : vector<2xf32>
    %644 = vector.multi_reduction <add>, %643, %cst_176 [1] : vector<2x20xf32> to vector<2xf32>
    %645 = vector.shape_cast %644 : vector<2xf32> to vector<2x1xf32>
    %646 = math.log %645 : vector<2x1xf32>
    %647 = arith.addf %646, %640 : vector<2x1xf32>
    %648 = vector.broadcast %647 : vector<2x1xf32> to vector<2x20xf32>
    %649 = arith.subf %638, %648 : vector<2x20xf32>
    %c6_177 = arith.constant 6 : index
    %c0_178 = arith.constant 0 : index
    %c0_179 = arith.constant 0 : index
    %650 = vector.load %arg12[%c6_177, %c0_178, %c0_179] : memref<10x2x20xf32, #tpu.memory_space<vmem>>, vector<1x2x20xf32>
    %651 = vector.shape_cast %650 : vector<1x2x20xf32> to vector<2x20xf32>
    %652 = vector.shape_cast %649 : vector<2x20xf32> to vector<1x2x20xf32>
    tpu.vector_store %arg12[%c6_177, %c0_178, %c0_179], %652 {strides = array<i32>} : memref<10x2x20xf32, #tpu.memory_space<vmem>>, vector<1x2x20xf32>,
    %653 = vector.broadcast %640 : vector<2x1xf32> to vector<2x20xf32>
    %654 = arith.cmpf oeq, %638, %653 : vector<2x20xf32>
    %c20_i32_180 = arith.constant 20 : i32
    %655 = vector.broadcast %c20_i32_180 : i32 to vector<2x20xi32>
    %656 = arith.select %654, %0, %655 : vector<2x20xi1>, vector<2x20xi32>
    %cst_181 = arith.constant dense<2147483647> : vector<2xi32>
    %657 = vector.multi_reduction <minsi>, %656, %cst_181 [1] : vector<2x20xi32> to vector<2xi32>
    %658 = vector.shape_cast %657 : vector<2xi32> to vector<2x1xi32>
    %659 = vector.broadcast %658 : vector<2x1xi32> to vector<2x20xi32>
    %660 = arith.cmpi eq, %0, %659 : vector<2x20xi32>
    %661 = arith.extui %660 : vector<2x20xi1> to vector<2x20xi32>
    %662 = arith.sitofp %661 : vector<2x20xi32> to vector<2x20xf32>
    %cst_182 = arith.constant dense<0.000000e+00> : vector<2x128xf32>
    %663 = tpu.matmul %635, %4, %cst_182 {dimension_numbers = #tpu.dot_dimension_numbers<[1], [0], [0], [1], [0, 0, 1, 1], [], []>} : vector<2x32xf32>, vector<32x128xf32>, vector<2x128xf32> -> vector<2x128xf32>
    %664 = vector.broadcast %5 : vector<1x128xf32> to vector<2x128xf32>
    %665 = arith.addf %663, %664 : vector<2x128xf32>
    %666 = vector.extract_strided_slice %665 {offsets = [0, 0], sizes = [2, 32], strides = [1, 1]} : vector<2x128xf32> to vector<2x32xf32>
    %667 = vector.extract_strided_slice %665 {offsets = [0, 32], sizes = [2, 32], strides = [1, 1]} : vector<2x128xf32> to vector<2x32xf32>
    %668 = vector.extract_strided_slice %665 {offsets = [0, 64], sizes = [2, 32], strides = [1, 1]} : vector<2x128xf32> to vector<2x32xf32>
    %669 = vector.extract_strided_slice %665 {offsets = [0, 96], sizes = [2, 32], strides = [1, 1]} : vector<2x128xf32> to vector<2x32xf32>
    %670 = vector.extract_strided_slice %666 {offsets = [0, 0], sizes = [1, 32], strides = [1, 1]} : vector<2x32xf32> to vector<1x32xf32>
    %671 = vector.broadcast %670 : vector<1x32xf32> to vector<8x32xf32>
    %672 = arith.addf %671, %17 : vector<8x32xf32>
    %673 = math.tanh %672 : vector<8x32xf32>
    %cst_183 = arith.constant dense<0.000000e+00> : vector<1x8xf32>
    %674 = tpu.matmul %3, %673, %cst_183 {dimension_numbers = #tpu.dot_dimension_numbers<[1], [1], [0], [0], [0, 0, 1, 0], [], []>} : vector<1x32xf32>, vector<8x32xf32>, vector<1x8xf32> -> vector<1x8xf32>
    %675 = vector.extract_strided_slice %666 {offsets = [1, 0], sizes = [1, 32], strides = [1, 1]} : vector<2x32xf32> to vector<1x32xf32>
    %676 = vector.broadcast %675 : vector<1x32xf32> to vector<8x32xf32>
    %677 = arith.addf %676, %20 : vector<8x32xf32>
    %678 = math.tanh %677 : vector<8x32xf32>
    %cst_184 = arith.constant dense<0.000000e+00> : vector<1x8xf32>
    %679 = tpu.matmul %3, %678, %cst_184 {dimension_numbers = #tpu.dot_dimension_numbers<[1], [1], [0], [0], [0, 0, 1, 0], [], []>} : vector<1x32xf32>, vector<8x32xf32>, vector<1x8xf32> -> vector<1x8xf32>
    %680 = tpu.concatenate %674, %679 in 0 : vector<1x8xf32>, vector<1x8xf32> -> vector<2x8xf32>
    %cst_185 = arith.constant dense<0xFF800000> : vector<2xf32>
    %681 = vector.multi_reduction <maximumf>, %680, %cst_185 [1] : vector<2x8xf32> to vector<2xf32>
    %682 = vector.shape_cast %681 : vector<2xf32> to vector<2x1xf32>
    %683 = vector.broadcast %682 : vector<2x1xf32> to vector<2x8xf32>
    %684 = arith.subf %680, %683 : vector<2x8xf32>
    %685 = math.exp %684 : vector<2x8xf32>
    %cst_186 = arith.constant dense<0.000000e+00> : vector<2xf32>
    %686 = vector.multi_reduction <add>, %685, %cst_186 [1] : vector<2x8xf32> to vector<2xf32>
    %687 = vector.shape_cast %686 : vector<2xf32> to vector<2x1xf32>
    %688 = tpu.reciprocal %687 {approx = true} : vector<2x1xf32> -> vector<2x1xf32>
    %689 = vector.broadcast %688 : vector<2x1xf32> to vector<2x8xf32>
    %690 = arith.mulf %685, %689 : vector<2x8xf32>
    %c7 = arith.constant 7 : index
    %c0_187 = arith.constant 0 : index
    %c0_188 = arith.constant 0 : index
    %691 = vector.load %arg13[%c7, %c0_187, %c0_188] : memref<10x2x8xf32, #tpu.memory_space<vmem>>, vector<1x2x8xf32>
    %692 = vector.shape_cast %691 : vector<1x2x8xf32> to vector<2x8xf32>
    %693 = vector.shape_cast %690 : vector<2x8xf32> to vector<1x2x8xf32>
    tpu.vector_store %arg13[%c7, %c0_187, %c0_188], %693 {strides = array<i32>} : memref<10x2x8xf32, #tpu.memory_space<vmem>>, vector<1x2x8xf32>,
    %694 = vector.extract_strided_slice %690 {offsets = [0, 0], sizes = [1, 8], strides = [1, 1]} : vector<2x8xf32> to vector<1x8xf32>
    %cst_189 = arith.constant dense<0.000000e+00> : vector<1x32xf32>
    %695 = tpu.matmul %694, %12, %cst_189 {dimension_numbers = #tpu.dot_dimension_numbers<[1], [0], [0], [1], [0, 0, 1, 1], [], []>} : vector<1x8xf32>, vector<8x32xf32>, vector<1x32xf32> -> vector<1x32xf32>
    %696 = vector.extract_strided_slice %690 {offsets = [1, 0], sizes = [1, 8], strides = [1, 1]} : vector<2x8xf32> to vector<1x8xf32>
    %cst_190 = arith.constant dense<0.000000e+00> : vector<1x32xf32>
    %697 = tpu.matmul %696, %14, %cst_190 {dimension_numbers = #tpu.dot_dimension_numbers<[1], [0], [0], [1], [0, 0, 1, 1], [], []>} : vector<1x8xf32>, vector<8x32xf32>, vector<1x32xf32> -> vector<1x32xf32>
    %698 = tpu.concatenate %695, %697 in 0 : vector<1x32xf32>, vector<1x32xf32> -> vector<2x32xf32>
    %cst_191 = arith.constant dense<0.000000e+00> : vector<2x96xf32>
    %699 = tpu.matmul %662, %6, %cst_191 {dimension_numbers = #tpu.dot_dimension_numbers<[1], [0], [0], [1], [0, 0, 1, 1], [], []>} : vector<2x20xf32>, vector<20x96xf32>, vector<2x96xf32> -> vector<2x96xf32>
    %cst_192 = arith.constant dense<0.000000e+00> : vector<2x96xf32>
    %700 = tpu.matmul %698, %7, %cst_192 {dimension_numbers = #tpu.dot_dimension_numbers<[1], [0], [0], [1], [0, 0, 1, 1], [], []>} : vector<2x32xf32>, vector<32x96xf32>, vector<2x96xf32> -> vector<2x96xf32>
    %701 = arith.addf %699, %700 : vector<2x96xf32>
    %702 = vector.broadcast %8 : vector<1x96xf32> to vector<2x96xf32>
    %703 = arith.addf %701, %702 : vector<2x96xf32>
    %704 = vector.extract_strided_slice %703 {offsets = [0, 0], sizes = [2, 32], strides = [1, 1]} : vector<2x96xf32> to vector<2x32xf32>
    %705 = vector.extract_strided_slice %703 {offsets = [0, 32], sizes = [2, 32], strides = [1, 1]} : vector<2x96xf32> to vector<2x32xf32>
    %706 = vector.extract_strided_slice %703 {offsets = [0, 64], sizes = [2, 32], strides = [1, 1]} : vector<2x96xf32> to vector<2x32xf32>
    %707 = arith.addf %704, %667 : vector<2x32xf32>
    %708 = arith.negf %707 : vector<2x32xf32>
    %709 = math.exp %708 : vector<2x32xf32>
    %cst_193 = arith.constant 1.000000e+00 : f32
    %710 = vector.broadcast %cst_193 : f32 to vector<2x32xf32>
    %711 = arith.addf %710, %709 : vector<2x32xf32>
    %712 = arith.divf %710, %711 : vector<2x32xf32>
    %713 = arith.addf %705, %668 : vector<2x32xf32>
    %714 = arith.negf %713 : vector<2x32xf32>
    %715 = math.exp %714 : vector<2x32xf32>
    %cst_194 = arith.constant 1.000000e+00 : f32
    %716 = vector.broadcast %cst_194 : f32 to vector<2x32xf32>
    %717 = arith.addf %716, %715 : vector<2x32xf32>
    %718 = arith.divf %716, %717 : vector<2x32xf32>
    %719 = arith.mulf %712, %669 : vector<2x32xf32>
    %720 = arith.addf %706, %719 : vector<2x32xf32>
    %721 = math.tanh %720 : vector<2x32xf32>
    %cst_195 = arith.constant 1.000000e+00 : f32
    %722 = vector.broadcast %cst_195 : f32 to vector<2x32xf32>
    %723 = arith.subf %722, %718 : vector<2x32xf32>
    %724 = arith.mulf %723, %721 : vector<2x32xf32>
    %725 = arith.mulf %718, %635 : vector<2x32xf32>
    %726 = arith.addf %724, %725 : vector<2x32xf32>
    %cst_196 = arith.constant dense<0.000000e+00> : vector<2x20xf32>
    %727 = tpu.matmul %726, %9, %cst_196 {dimension_numbers = #tpu.dot_dimension_numbers<[1], [0], [0], [1], [0, 0, 1, 1], [], []>} : vector<2x32xf32>, vector<32x20xf32>, vector<2x20xf32> -> vector<2x20xf32>
    %728 = vector.broadcast %10 : vector<1x20xf32> to vector<2x20xf32>
    %729 = arith.addf %727, %728 : vector<2x20xf32>
    %cst_197 = arith.constant dense<0xFF800000> : vector<2xf32>
    %730 = vector.multi_reduction <maximumf>, %729, %cst_197 [1] : vector<2x20xf32> to vector<2xf32>
    %731 = vector.shape_cast %730 : vector<2xf32> to vector<2x1xf32>
    %732 = vector.broadcast %731 : vector<2x1xf32> to vector<2x20xf32>
    %733 = arith.subf %729, %732 : vector<2x20xf32>
    %734 = math.exp %733 : vector<2x20xf32>
    %cst_198 = arith.constant dense<0.000000e+00> : vector<2xf32>
    %735 = vector.multi_reduction <add>, %734, %cst_198 [1] : vector<2x20xf32> to vector<2xf32>
    %736 = vector.shape_cast %735 : vector<2xf32> to vector<2x1xf32>
    %737 = math.log %736 : vector<2x1xf32>
    %738 = arith.addf %737, %731 : vector<2x1xf32>
    %739 = vector.broadcast %738 : vector<2x1xf32> to vector<2x20xf32>
    %740 = arith.subf %729, %739 : vector<2x20xf32>
    %c7_199 = arith.constant 7 : index
    %c0_200 = arith.constant 0 : index
    %c0_201 = arith.constant 0 : index
    %741 = vector.load %arg12[%c7_199, %c0_200, %c0_201] : memref<10x2x20xf32, #tpu.memory_space<vmem>>, vector<1x2x20xf32>
    %742 = vector.shape_cast %741 : vector<1x2x20xf32> to vector<2x20xf32>
    %743 = vector.shape_cast %740 : vector<2x20xf32> to vector<1x2x20xf32>
    tpu.vector_store %arg12[%c7_199, %c0_200, %c0_201], %743 {strides = array<i32>} : memref<10x2x20xf32, #tpu.memory_space<vmem>>, vector<1x2x20xf32>,
    %744 = vector.broadcast %731 : vector<2x1xf32> to vector<2x20xf32>
    %745 = arith.cmpf oeq, %729, %744 : vector<2x20xf32>
    %c20_i32_202 = arith.constant 20 : i32
    %746 = vector.broadcast %c20_i32_202 : i32 to vector<2x20xi32>
    %747 = arith.select %745, %0, %746 : vector<2x20xi1>, vector<2x20xi32>
    %cst_203 = arith.constant dense<2147483647> : vector<2xi32>
    %748 = vector.multi_reduction <minsi>, %747, %cst_203 [1] : vector<2x20xi32> to vector<2xi32>
    %749 = vector.shape_cast %748 : vector<2xi32> to vector<2x1xi32>
    %750 = vector.broadcast %749 : vector<2x1xi32> to vector<2x20xi32>
    %751 = arith.cmpi eq, %0, %750 : vector<2x20xi32>
    %752 = arith.extui %751 : vector<2x20xi1> to vector<2x20xi32>
    %753 = arith.sitofp %752 : vector<2x20xi32> to vector<2x20xf32>
    %cst_204 = arith.constant dense<0.000000e+00> : vector<2x128xf32>
    %754 = tpu.matmul %726, %4, %cst_204 {dimension_numbers = #tpu.dot_dimension_numbers<[1], [0], [0], [1], [0, 0, 1, 1], [], []>} : vector<2x32xf32>, vector<32x128xf32>, vector<2x128xf32> -> vector<2x128xf32>
    %755 = vector.broadcast %5 : vector<1x128xf32> to vector<2x128xf32>
    %756 = arith.addf %754, %755 : vector<2x128xf32>
    %757 = vector.extract_strided_slice %756 {offsets = [0, 0], sizes = [2, 32], strides = [1, 1]} : vector<2x128xf32> to vector<2x32xf32>
    %758 = vector.extract_strided_slice %756 {offsets = [0, 32], sizes = [2, 32], strides = [1, 1]} : vector<2x128xf32> to vector<2x32xf32>
    %759 = vector.extract_strided_slice %756 {offsets = [0, 64], sizes = [2, 32], strides = [1, 1]} : vector<2x128xf32> to vector<2x32xf32>
    %760 = vector.extract_strided_slice %756 {offsets = [0, 96], sizes = [2, 32], strides = [1, 1]} : vector<2x128xf32> to vector<2x32xf32>
    %761 = vector.extract_strided_slice %757 {offsets = [0, 0], sizes = [1, 32], strides = [1, 1]} : vector<2x32xf32> to vector<1x32xf32>
    %762 = vector.broadcast %761 : vector<1x32xf32> to vector<8x32xf32>
    %763 = arith.addf %762, %17 : vector<8x32xf32>
    %764 = math.tanh %763 : vector<8x32xf32>
    %cst_205 = arith.constant dense<0.000000e+00> : vector<1x8xf32>
    %765 = tpu.matmul %3, %764, %cst_205 {dimension_numbers = #tpu.dot_dimension_numbers<[1], [1], [0], [0], [0, 0, 1, 0], [], []>} : vector<1x32xf32>, vector<8x32xf32>, vector<1x8xf32> -> vector<1x8xf32>
    %766 = vector.extract_strided_slice %757 {offsets = [1, 0], sizes = [1, 32], strides = [1, 1]} : vector<2x32xf32> to vector<1x32xf32>
    %767 = vector.broadcast %766 : vector<1x32xf32> to vector<8x32xf32>
    %768 = arith.addf %767, %20 : vector<8x32xf32>
    %769 = math.tanh %768 : vector<8x32xf32>
    %cst_206 = arith.constant dense<0.000000e+00> : vector<1x8xf32>
    %770 = tpu.matmul %3, %769, %cst_206 {dimension_numbers = #tpu.dot_dimension_numbers<[1], [1], [0], [0], [0, 0, 1, 0], [], []>} : vector<1x32xf32>, vector<8x32xf32>, vector<1x8xf32> -> vector<1x8xf32>
    %771 = tpu.concatenate %765, %770 in 0 : vector<1x8xf32>, vector<1x8xf32> -> vector<2x8xf32>
    %cst_207 = arith.constant dense<0xFF800000> : vector<2xf32>
    %772 = vector.multi_reduction <maximumf>, %771, %cst_207 [1] : vector<2x8xf32> to vector<2xf32>
    %773 = vector.shape_cast %772 : vector<2xf32> to vector<2x1xf32>
    %774 = vector.broadcast %773 : vector<2x1xf32> to vector<2x8xf32>
    %775 = arith.subf %771, %774 : vector<2x8xf32>
    %776 = math.exp %775 : vector<2x8xf32>
    %cst_208 = arith.constant dense<0.000000e+00> : vector<2xf32>
    %777 = vector.multi_reduction <add>, %776, %cst_208 [1] : vector<2x8xf32> to vector<2xf32>
    %778 = vector.shape_cast %777 : vector<2xf32> to vector<2x1xf32>
    %779 = tpu.reciprocal %778 {approx = true} : vector<2x1xf32> -> vector<2x1xf32>
    %780 = vector.broadcast %779 : vector<2x1xf32> to vector<2x8xf32>
    %781 = arith.mulf %776, %780 : vector<2x8xf32>
    %c8 = arith.constant 8 : index
    %c0_209 = arith.constant 0 : index
    %c0_210 = arith.constant 0 : index
    %782 = vector.load %arg13[%c8, %c0_209, %c0_210] : memref<10x2x8xf32, #tpu.memory_space<vmem>>, vector<1x2x8xf32>
    %783 = vector.shape_cast %782 : vector<1x2x8xf32> to vector<2x8xf32>
    %784 = vector.shape_cast %781 : vector<2x8xf32> to vector<1x2x8xf32>
    tpu.vector_store %arg13[%c8, %c0_209, %c0_210], %784 {strides = array<i32>} : memref<10x2x8xf32, #tpu.memory_space<vmem>>, vector<1x2x8xf32>,
    %785 = vector.extract_strided_slice %781 {offsets = [0, 0], sizes = [1, 8], strides = [1, 1]} : vector<2x8xf32> to vector<1x8xf32>
    %cst_211 = arith.constant dense<0.000000e+00> : vector<1x32xf32>
    %786 = tpu.matmul %785, %12, %cst_211 {dimension_numbers = #tpu.dot_dimension_numbers<[1], [0], [0], [1], [0, 0, 1, 1], [], []>} : vector<1x8xf32>, vector<8x32xf32>, vector<1x32xf32> -> vector<1x32xf32>
    %787 = vector.extract_strided_slice %781 {offsets = [1, 0], sizes = [1, 8], strides = [1, 1]} : vector<2x8xf32> to vector<1x8xf32>
    %cst_212 = arith.constant dense<0.000000e+00> : vector<1x32xf32>
    %788 = tpu.matmul %787, %14, %cst_212 {dimension_numbers = #tpu.dot_dimension_numbers<[1], [0], [0], [1], [0, 0, 1, 1], [], []>} : vector<1x8xf32>, vector<8x32xf32>, vector<1x32xf32> -> vector<1x32xf32>
    %789 = tpu.concatenate %786, %788 in 0 : vector<1x32xf32>, vector<1x32xf32> -> vector<2x32xf32>
    %cst_213 = arith.constant dense<0.000000e+00> : vector<2x96xf32>
    %790 = tpu.matmul %753, %6, %cst_213 {dimension_numbers = #tpu.dot_dimension_numbers<[1], [0], [0], [1], [0, 0, 1, 1], [], []>} : vector<2x20xf32>, vector<20x96xf32>, vector<2x96xf32> -> vector<2x96xf32>
    %cst_214 = arith.constant dense<0.000000e+00> : vector<2x96xf32>
    %791 = tpu.matmul %789, %7, %cst_214 {dimension_numbers = #tpu.dot_dimension_numbers<[1], [0], [0], [1], [0, 0, 1, 1], [], []>} : vector<2x32xf32>, vector<32x96xf32>, vector<2x96xf32> -> vector<2x96xf32>
    %792 = arith.addf %790, %791 : vector<2x96xf32>
    %793 = vector.broadcast %8 : vector<1x96xf32> to vector<2x96xf32>
    %794 = arith.addf %792, %793 : vector<2x96xf32>
    %795 = vector.extract_strided_slice %794 {offsets = [0, 0], sizes = [2, 32], strides = [1, 1]} : vector<2x96xf32> to vector<2x32xf32>
    %796 = vector.extract_strided_slice %794 {offsets = [0, 32], sizes = [2, 32], strides = [1, 1]} : vector<2x96xf32> to vector<2x32xf32>
    %797 = vector.extract_strided_slice %794 {offsets = [0, 64], sizes = [2, 32], strides = [1, 1]} : vector<2x96xf32> to vector<2x32xf32>
    %798 = arith.addf %795, %758 : vector<2x32xf32>
    %799 = arith.negf %798 : vector<2x32xf32>
    %800 = math.exp %799 : vector<2x32xf32>
    %cst_215 = arith.constant 1.000000e+00 : f32
    %801 = vector.broadcast %cst_215 : f32 to vector<2x32xf32>
    %802 = arith.addf %801, %800 : vector<2x32xf32>
    %803 = arith.divf %801, %802 : vector<2x32xf32>
    %804 = arith.addf %796, %759 : vector<2x32xf32>
    %805 = arith.negf %804 : vector<2x32xf32>
    %806 = math.exp %805 : vector<2x32xf32>
    %cst_216 = arith.constant 1.000000e+00 : f32
    %807 = vector.broadcast %cst_216 : f32 to vector<2x32xf32>
    %808 = arith.addf %807, %806 : vector<2x32xf32>
    %809 = arith.divf %807, %808 : vector<2x32xf32>
    %810 = arith.mulf %803, %760 : vector<2x32xf32>
    %811 = arith.addf %797, %810 : vector<2x32xf32>
    %812 = math.tanh %811 : vector<2x32xf32>
    %cst_217 = arith.constant 1.000000e+00 : f32
    %813 = vector.broadcast %cst_217 : f32 to vector<2x32xf32>
    %814 = arith.subf %813, %809 : vector<2x32xf32>
    %815 = arith.mulf %814, %812 : vector<2x32xf32>
    %816 = arith.mulf %809, %726 : vector<2x32xf32>
    %817 = arith.addf %815, %816 : vector<2x32xf32>
    %cst_218 = arith.constant dense<0.000000e+00> : vector<2x20xf32>
    %818 = tpu.matmul %817, %9, %cst_218 {dimension_numbers = #tpu.dot_dimension_numbers<[1], [0], [0], [1], [0, 0, 1, 1], [], []>} : vector<2x32xf32>, vector<32x20xf32>, vector<2x20xf32> -> vector<2x20xf32>
    %819 = vector.broadcast %10 : vector<1x20xf32> to vector<2x20xf32>
    %820 = arith.addf %818, %819 : vector<2x20xf32>
    %cst_219 = arith.constant dense<0xFF800000> : vector<2xf32>
    %821 = vector.multi_reduction <maximumf>, %820, %cst_219 [1] : vector<2x20xf32> to vector<2xf32>
    %822 = vector.shape_cast %821 : vector<2xf32> to vector<2x1xf32>
    %823 = vector.broadcast %822 : vector<2x1xf32> to vector<2x20xf32>
    %824 = arith.subf %820, %823 : vector<2x20xf32>
    %825 = math.exp %824 : vector<2x20xf32>
    %cst_220 = arith.constant dense<0.000000e+00> : vector<2xf32>
    %826 = vector.multi_reduction <add>, %825, %cst_220 [1] : vector<2x20xf32> to vector<2xf32>
    %827 = vector.shape_cast %826 : vector<2xf32> to vector<2x1xf32>
    %828 = math.log %827 : vector<2x1xf32>
    %829 = arith.addf %828, %822 : vector<2x1xf32>
    %830 = vector.broadcast %829 : vector<2x1xf32> to vector<2x20xf32>
    %831 = arith.subf %820, %830 : vector<2x20xf32>
    %c8_221 = arith.constant 8 : index
    %c0_222 = arith.constant 0 : index
    %c0_223 = arith.constant 0 : index
    %832 = vector.load %arg12[%c8_221, %c0_222, %c0_223] : memref<10x2x20xf32, #tpu.memory_space<vmem>>, vector<1x2x20xf32>
    %833 = vector.shape_cast %832 : vector<1x2x20xf32> to vector<2x20xf32>
    %834 = vector.shape_cast %831 : vector<2x20xf32> to vector<1x2x20xf32>
    tpu.vector_store %arg12[%c8_221, %c0_222, %c0_223], %834 {strides = array<i32>} : memref<10x2x20xf32, #tpu.memory_space<vmem>>, vector<1x2x20xf32>,
    %835 = vector.broadcast %822 : vector<2x1xf32> to vector<2x20xf32>
    %836 = arith.cmpf oeq, %820, %835 : vector<2x20xf32>
    %c20_i32_224 = arith.constant 20 : i32
    %837 = vector.broadcast %c20_i32_224 : i32 to vector<2x20xi32>
    %838 = arith.select %836, %0, %837 : vector<2x20xi1>, vector<2x20xi32>
    %cst_225 = arith.constant dense<2147483647> : vector<2xi32>
    %839 = vector.multi_reduction <minsi>, %838, %cst_225 [1] : vector<2x20xi32> to vector<2xi32>
    %840 = vector.shape_cast %839 : vector<2xi32> to vector<2x1xi32>
    %841 = vector.broadcast %840 : vector<2x1xi32> to vector<2x20xi32>
    %842 = arith.cmpi eq, %0, %841 : vector<2x20xi32>
    %843 = arith.extui %842 : vector<2x20xi1> to vector<2x20xi32>
    %844 = arith.sitofp %843 : vector<2x20xi32> to vector<2x20xf32>
    %cst_226 = arith.constant dense<0.000000e+00> : vector<2x128xf32>
    %845 = tpu.matmul %817, %4, %cst_226 {dimension_numbers = #tpu.dot_dimension_numbers<[1], [0], [0], [1], [0, 0, 1, 1], [], []>} : vector<2x32xf32>, vector<32x128xf32>, vector<2x128xf32> -> vector<2x128xf32>
    %846 = vector.broadcast %5 : vector<1x128xf32> to vector<2x128xf32>
    %847 = arith.addf %845, %846 : vector<2x128xf32>
    %848 = vector.extract_strided_slice %847 {offsets = [0, 0], sizes = [2, 32], strides = [1, 1]} : vector<2x128xf32> to vector<2x32xf32>
    %849 = vector.extract_strided_slice %847 {offsets = [0, 32], sizes = [2, 32], strides = [1, 1]} : vector<2x128xf32> to vector<2x32xf32>
    %850 = vector.extract_strided_slice %847 {offsets = [0, 64], sizes = [2, 32], strides = [1, 1]} : vector<2x128xf32> to vector<2x32xf32>
    %851 = vector.extract_strided_slice %847 {offsets = [0, 96], sizes = [2, 32], strides = [1, 1]} : vector<2x128xf32> to vector<2x32xf32>
    %852 = vector.extract_strided_slice %848 {offsets = [0, 0], sizes = [1, 32], strides = [1, 1]} : vector<2x32xf32> to vector<1x32xf32>
    %853 = vector.broadcast %852 : vector<1x32xf32> to vector<8x32xf32>
    %854 = arith.addf %853, %17 : vector<8x32xf32>
    %855 = math.tanh %854 : vector<8x32xf32>
    %cst_227 = arith.constant dense<0.000000e+00> : vector<1x8xf32>
    %856 = tpu.matmul %3, %855, %cst_227 {dimension_numbers = #tpu.dot_dimension_numbers<[1], [1], [0], [0], [0, 0, 1, 0], [], []>} : vector<1x32xf32>, vector<8x32xf32>, vector<1x8xf32> -> vector<1x8xf32>
    %857 = vector.extract_strided_slice %848 {offsets = [1, 0], sizes = [1, 32], strides = [1, 1]} : vector<2x32xf32> to vector<1x32xf32>
    %858 = vector.broadcast %857 : vector<1x32xf32> to vector<8x32xf32>
    %859 = arith.addf %858, %20 : vector<8x32xf32>
    %860 = math.tanh %859 : vector<8x32xf32>
    %cst_228 = arith.constant dense<0.000000e+00> : vector<1x8xf32>
    %861 = tpu.matmul %3, %860, %cst_228 {dimension_numbers = #tpu.dot_dimension_numbers<[1], [1], [0], [0], [0, 0, 1, 0], [], []>} : vector<1x32xf32>, vector<8x32xf32>, vector<1x8xf32> -> vector<1x8xf32>
    %862 = tpu.concatenate %856, %861 in 0 : vector<1x8xf32>, vector<1x8xf32> -> vector<2x8xf32>
    %cst_229 = arith.constant dense<0xFF800000> : vector<2xf32>
    %863 = vector.multi_reduction <maximumf>, %862, %cst_229 [1] : vector<2x8xf32> to vector<2xf32>
    %864 = vector.shape_cast %863 : vector<2xf32> to vector<2x1xf32>
    %865 = vector.broadcast %864 : vector<2x1xf32> to vector<2x8xf32>
    %866 = arith.subf %862, %865 : vector<2x8xf32>
    %867 = math.exp %866 : vector<2x8xf32>
    %cst_230 = arith.constant dense<0.000000e+00> : vector<2xf32>
    %868 = vector.multi_reduction <add>, %867, %cst_230 [1] : vector<2x8xf32> to vector<2xf32>
    %869 = vector.shape_cast %868 : vector<2xf32> to vector<2x1xf32>
    %870 = tpu.reciprocal %869 {approx = true} : vector<2x1xf32> -> vector<2x1xf32>
    %871 = vector.broadcast %870 : vector<2x1xf32> to vector<2x8xf32>
    %872 = arith.mulf %867, %871 : vector<2x8xf32>
    %c9 = arith.constant 9 : index
    %c0_231 = arith.constant 0 : index
    %c0_232 = arith.constant 0 : index
    %873 = vector.load %arg13[%c9, %c0_231, %c0_232] : memref<10x2x8xf32, #tpu.memory_space<vmem>>, vector<1x2x8xf32>
    %874 = vector.shape_cast %873 : vector<1x2x8xf32> to vector<2x8xf32>
    %875 = vector.shape_cast %872 : vector<2x8xf32> to vector<1x2x8xf32>
    tpu.vector_store %arg13[%c9, %c0_231, %c0_232], %875 {strides = array<i32>} : memref<10x2x8xf32, #tpu.memory_space<vmem>>, vector<1x2x8xf32>,
    %876 = vector.extract_strided_slice %872 {offsets = [0, 0], sizes = [1, 8], strides = [1, 1]} : vector<2x8xf32> to vector<1x8xf32>
    %cst_233 = arith.constant dense<0.000000e+00> : vector<1x32xf32>
    %877 = tpu.matmul %876, %12, %cst_233 {dimension_numbers = #tpu.dot_dimension_numbers<[1], [0], [0], [1], [0, 0, 1, 1], [], []>} : vector<1x8xf32>, vector<8x32xf32>, vector<1x32xf32> -> vector<1x32xf32>
    %878 = vector.extract_strided_slice %872 {offsets = [1, 0], sizes = [1, 8], strides = [1, 1]} : vector<2x8xf32> to vector<1x8xf32>
    %cst_234 = arith.constant dense<0.000000e+00> : vector<1x32xf32>
    %879 = tpu.matmul %878, %14, %cst_234 {dimension_numbers = #tpu.dot_dimension_numbers<[1], [0], [0], [1], [0, 0, 1, 1], [], []>} : vector<1x8xf32>, vector<8x32xf32>, vector<1x32xf32> -> vector<1x32xf32>
    %880 = tpu.concatenate %877, %879 in 0 : vector<1x32xf32>, vector<1x32xf32> -> vector<2x32xf32>
    %cst_235 = arith.constant dense<0.000000e+00> : vector<2x96xf32>
    %881 = tpu.matmul %844, %6, %cst_235 {dimension_numbers = #tpu.dot_dimension_numbers<[1], [0], [0], [1], [0, 0, 1, 1], [], []>} : vector<2x20xf32>, vector<20x96xf32>, vector<2x96xf32> -> vector<2x96xf32>
    %cst_236 = arith.constant dense<0.000000e+00> : vector<2x96xf32>
    %882 = tpu.matmul %880, %7, %cst_236 {dimension_numbers = #tpu.dot_dimension_numbers<[1], [0], [0], [1], [0, 0, 1, 1], [], []>} : vector<2x32xf32>, vector<32x96xf32>, vector<2x96xf32> -> vector<2x96xf32>
    %883 = arith.addf %881, %882 : vector<2x96xf32>
    %884 = vector.broadcast %8 : vector<1x96xf32> to vector<2x96xf32>
    %885 = arith.addf %883, %884 : vector<2x96xf32>
    %886 = vector.extract_strided_slice %885 {offsets = [0, 0], sizes = [2, 32], strides = [1, 1]} : vector<2x96xf32> to vector<2x32xf32>
    %887 = vector.extract_strided_slice %885 {offsets = [0, 32], sizes = [2, 32], strides = [1, 1]} : vector<2x96xf32> to vector<2x32xf32>
    %888 = vector.extract_strided_slice %885 {offsets = [0, 64], sizes = [2, 32], strides = [1, 1]} : vector<2x96xf32> to vector<2x32xf32>
    %889 = arith.addf %886, %849 : vector<2x32xf32>
    %890 = arith.negf %889 : vector<2x32xf32>
    %891 = math.exp %890 : vector<2x32xf32>
    %cst_237 = arith.constant 1.000000e+00 : f32
    %892 = vector.broadcast %cst_237 : f32 to vector<2x32xf32>
    %893 = arith.addf %892, %891 : vector<2x32xf32>
    %894 = arith.divf %892, %893 : vector<2x32xf32>
    %895 = arith.addf %887, %850 : vector<2x32xf32>
    %896 = arith.negf %895 : vector<2x32xf32>
    %897 = math.exp %896 : vector<2x32xf32>
    %cst_238 = arith.constant 1.000000e+00 : f32
    %898 = vector.broadcast %cst_238 : f32 to vector<2x32xf32>
    %899 = arith.addf %898, %897 : vector<2x32xf32>
    %900 = arith.divf %898, %899 : vector<2x32xf32>
    %901 = arith.mulf %894, %851 : vector<2x32xf32>
    %902 = arith.addf %888, %901 : vector<2x32xf32>
    %903 = math.tanh %902 : vector<2x32xf32>
    %cst_239 = arith.constant 1.000000e+00 : f32
    %904 = vector.broadcast %cst_239 : f32 to vector<2x32xf32>
    %905 = arith.subf %904, %900 : vector<2x32xf32>
    %906 = arith.mulf %905, %903 : vector<2x32xf32>
    %907 = arith.mulf %900, %817 : vector<2x32xf32>
    %908 = arith.addf %906, %907 : vector<2x32xf32>
    %cst_240 = arith.constant dense<0.000000e+00> : vector<2x20xf32>
    %909 = tpu.matmul %908, %9, %cst_240 {dimension_numbers = #tpu.dot_dimension_numbers<[1], [0], [0], [1], [0, 0, 1, 1], [], []>} : vector<2x32xf32>, vector<32x20xf32>, vector<2x20xf32> -> vector<2x20xf32>
    %910 = vector.broadcast %10 : vector<1x20xf32> to vector<2x20xf32>
    %911 = arith.addf %909, %910 : vector<2x20xf32>
    %cst_241 = arith.constant dense<0xFF800000> : vector<2xf32>
    %912 = vector.multi_reduction <maximumf>, %911, %cst_241 [1] : vector<2x20xf32> to vector<2xf32>
    %913 = vector.shape_cast %912 : vector<2xf32> to vector<2x1xf32>
    %914 = vector.broadcast %913 : vector<2x1xf32> to vector<2x20xf32>
    %915 = arith.subf %911, %914 : vector<2x20xf32>
    %916 = math.exp %915 : vector<2x20xf32>
    %cst_242 = arith.constant dense<0.000000e+00> : vector<2xf32>
    %917 = vector.multi_reduction <add>, %916, %cst_242 [1] : vector<2x20xf32> to vector<2xf32>
    %918 = vector.shape_cast %917 : vector<2xf32> to vector<2x1xf32>
    %919 = math.log %918 : vector<2x1xf32>
    %920 = arith.addf %919, %913 : vector<2x1xf32>
    %921 = vector.broadcast %920 : vector<2x1xf32> to vector<2x20xf32>
    %922 = arith.subf %911, %921 : vector<2x20xf32>
    %c9_243 = arith.constant 9 : index
    %c0_244 = arith.constant 0 : index
    %c0_245 = arith.constant 0 : index
    %923 = vector.load %arg12[%c9_243, %c0_244, %c0_245] : memref<10x2x20xf32, #tpu.memory_space<vmem>>, vector<1x2x20xf32>
    %924 = vector.shape_cast %923 : vector<1x2x20xf32> to vector<2x20xf32>
    %925 = vector.shape_cast %922 : vector<2x20xf32> to vector<1x2x20xf32>
    tpu.vector_store %arg12[%c9_243, %c0_244, %c0_245], %925 {strides = array<i32>} : memref<10x2x20xf32, #tpu.memory_space<vmem>>, vector<1x2x20xf32>,
    %c0_246 = arith.constant 0 : index
    %c0_247 = arith.constant 0 : index
    %926 = vector.load %arg14[%c0_246, %c0_247] : memref<2x32xf32, #tpu.memory_space<vmem>>, vector<2x32xf32>
    tpu.vector_store %arg14[%c0_246, %c0_247], %908 {strides = array<i32>} : memref<2x32xf32, #tpu.memory_space<vmem>>, vector<2x32xf32>,
    return
  }
}

</mosaic_0001>

<bundles_post_ra>
// kernel: tpu_custom_call.1
= control target key start
LH: loop header
LB: loop body
LE: loop exit
PB: predicated region body
PF: predicated region fallthrough
CT: control target
= control target key end

     0   :  { %20 = vsyncpa [#allocation3], 0  ;;  %s10095_s0 = inlined_call_operand.hbm [shape: f32[2,8,32], index: 0, kind: input, shape index: {}]   ;;  %s10096_s1 = inlined_call_operand.vmem [shape: f32[2,32], index: 1, kind: input, shape index: {}]   ;;  %s10097_s2 = inlined_call_operand.vmem [shape: f32[32,32], index: 2, kind: input, shape index: {}]   ;;  %s10098_s3 = inlined_call_operand.vmem [shape: f32[1,32], index: 3, kind: input, shape index: {}]   ;;  %s10099_s4 = inlined_call_operand.vmem [shape: f32[1,32], index: 4, kind: input, shape index: {}]   ;;  %s10100_s5 = inlined_call_operand.vmem [shape: f32[32,128], index: 5, kind: input, shape index: {}]   ;;  %s10101_s6 = inlined_call_operand.vmem [shape: f32[1,128], index: 6, kind: input, shape index: {}]   ;;  %s10102_s7 = inlined_call_operand.hbm [shape: f32[20,96], index: 7, kind: input, shape index: {}]   ;;  %s10103_s8 = inlined_call_operand.hbm [shape: f32[32,96], index: 8, kind: input, shape index: {}]   ;;  %s10104_s9 = inlined_call_operand.hbm [shape: f32[1,96], index: 9, kind: input, shape index: {}]   ;;  %s10105_s10 = inlined_call_operand.vmem [shape: f32[32,20], index: 10, kind: input, shape index: {}]   ;;  %s10106_s11 = inlined_call_operand.vmem [shape: f32[1,20], index: 11, kind: input, shape index: {}]   ;;  %s10107_s12 = inlined_call_operand.hbm [shape: f32[10,2,20], index: 12, kind: output, shape index: {0}]   ;;  %s10108_s13 = inlined_call_operand.vmem [shape: f32[10,2,8], index: 13, kind: output, shape index: {1}]   ;;  %s10109_s14 = inlined_call_operand.hbm [shape: f32[2,32], index: 14, kind: output, shape index: {2}]  }
   0x1   :  { %21 = vsyncpa [#allocation6], 0 }
   0x2   :  { %22 = vsyncpa [#allocation9], 0 }
   0x3   :  { %23 = vsyncpa [#allocation4], 0 }
   0x4   :  { %24 = vsyncpa [#allocation12], 0  ;;  %s8789_s29 = smov [#allocation5]   ;;  %s8790_s15 = smov [#allocation2]  }
   0x5   :  { %s54_s30 = sshll.u32 %s8789_s29, 4  ;;  %s30_s16 = sshll.u32 %s8790_s15, 4  ;;  %s55_s30 = int_to_ptr.vmem [resolvable:$true] %s54_s30  ;;  %s8879_s16 = int_to_ptr.vmem [resolvable:$true] %s30_s16 }
   0x6   :  { %s8647_s19 = scalar_lea.hbm %s10102_s7, 384 }
   0x7   :  { %p8648_p0 = scmp.ne.s32.totalorder %s10102_s7, %s8647_s19  ;;  %p8651_p1 = scmp.lt.u32.totalorder %s8647_s19, %s10102_s7 }
   0x9   :  { %p8653_p2 = pnand %p8651_p1, %p8648_p0 }
   0xb   :  { %8656 = shalt.err (!%p8653_p2)
}
   0xc   :  { %s8657_s24 = scalar_lea.vmem %s55_s30, 384  ;;  %p8662_p4 = scmp.lt.s32.totalorder %s55_s30, %s55_s30 }
   0xd   :  { %p8658_p3 = scmp.ne.s32.totalorder %s55_s30, %s8657_s24  ;;  %p8663_p5 = scmp.lt.s32.totalorder %s8657_s24, %s8657_s24 }
   0xf   :  { %p8664_p6 = por %p8663_p5, %p8662_p4 }
  0x11   :  { %p8665_p7 = pnand %p8664_p6, %p8658_p3 }
  0x13   :  { %8668 = shalt.err (!%p8665_p7)
}
  0x14   :  { %s8791_s25 = smov 128   ;;  %s8792_s26 = smov 8  }
  0x15   :  { %60 = dma.hbm_to_vmem [thread:$0]  %s10102_s7, 384, %s55_s30, [#allocation6], %s8791_s25, %s8791_s25, %s8792_s26  }
  0x16   :  { %s8669_s17 = scalar_lea.hbm %s10095_s0, 256 }
  0x17   :  { %p8670_p8 = scmp.ne.s32.totalorder %s10095_s0, %s8669_s17  ;;  %p8673_p9 = scmp.lt.u32.totalorder %s8669_s17, %s10095_s0 }
  0x19   :  { %p8675_p10 = pnand %p8673_p9, %p8670_p8 }
  0x1b   :  { %8678 = shalt.err (!%p8675_p10)
}
  0x1c   :  { %s8679_s22 = scalar_lea.vmem %s8879_s16, 256  ;;  %p8684_p12 = scmp.lt.s32.totalorder %s8879_s16, %s8879_s16 }
  0x1d   :  { %p8680_p11 = scmp.ne.s32.totalorder %s8879_s16, %s8679_s22  ;;  %p8685_p13 = scmp.lt.s32.totalorder %s8679_s22, %s8679_s22 }
  0x1f   :  { %p8686_p0 = por %p8685_p13, %p8684_p12 }
  0x21   :  { %p8687_p1 = pnand %p8686_p0, %p8680_p11 }
  0x23   :  { %8690 = shalt.err (!%p8687_p1)
}
  0x24   :  { %36 = dma.hbm_to_vmem [thread:$0]  %s10095_s0, 256, %s8879_s16, [#allocation3], %s8791_s25, %s8791_s25, %s8792_s26  }
  0x25   :  { %s8793_s23 = smov [#allocation7]   ;;  %s8794_s27 = smov [#allocation8]  }
  0x26   :  { %s66_s24 = sshll.u32 %s8793_s23, 4  ;;  %s79_s28 = sshll.u32 %s8794_s27, 4  ;;  %s67_s24 = int_to_ptr.vmem [resolvable:$true] %s66_s24  ;;  %s80_s28 = int_to_ptr.vmem [resolvable:$true] %s79_s28 }
  0x27   :  { %s8691_s17 = scalar_lea.hbm %s10103_s8, 512 }
  0x28   :  { %p8692_p2 = scmp.ne.s32.totalorder %s10103_s8, %s8691_s17  ;;  %p8695_p3 = scmp.lt.u32.totalorder %s8691_s17, %s10103_s8 }
  0x2a   :  { %p8697_p4 = pnand %p8695_p3, %p8692_p2 }
  0x2c   :  { %8700 = shalt.err (!%p8697_p4)
}
  0x2d   :  { %s8701_s0 = scalar_lea.vmem %s67_s24, 512  ;;  %p8706_p6 = scmp.lt.s32.totalorder %s67_s24, %s67_s24 }
  0x2e   :  { %p8702_p5 = scmp.ne.s32.totalorder %s67_s24, %s8701_s0  ;;  %p8707_p7 = scmp.lt.s32.totalorder %s8701_s0, %s8701_s0 }
  0x30   :  { %p8708_p8 = por %p8707_p7, %p8706_p6 }
  0x32   :  { %p8709_p9 = pnand %p8708_p8, %p8702_p5 }
  0x34   :  { %8712 = shalt.err (!%p8709_p9)
}
  0x35   :  { %72 = dma.hbm_to_vmem [thread:$0]  %s10103_s8, 512, %s67_s24, [#allocation6], %s8791_s25, %s8791_s25, %s8792_s26  }
  0x36   :  { %s8713_s23 = scalar_lea.hbm %s10104_s9, 16 }
  0x37   :  { %p8714_p10 = scmp.ne.s32.totalorder %s10104_s9, %s8713_s23  ;;  %p8717_p11 = scmp.lt.u32.totalorder %s8713_s23, %s10104_s9 }
  0x39   :  { %p8719_p12 = pnand %p8717_p11, %p8714_p10 }
  0x3b   :  { %8722 = shalt.err (!%p8719_p12)
}
  0x3c   :  { %s8723_s18 = scalar_lea.vmem %s80_s28, 16  ;;  %s8727_s19 = scalar_lea.vmem %s80_s28, 32 }
  0x3d   :  { %p8724_p13 = scmp.ne.s32.totalorder %s80_s28, %s8723_s18  ;;  %p8728_p0 = scmp.lt.s32.totalorder %s80_s28, %s80_s28 }
  0x3e   :  { %p8729_p1 = scmp.lt.s32.totalorder %s8727_s19, %s8723_s18 }
  0x40   :  { %p8730_p2 = por %p8729_p1, %p8728_p0 }
  0x42   :  { %p8731_p3 = pnand %p8730_p2, %p8724_p13 }
  0x44   :  { %8734 = shalt.err (!%p8731_p3)
}
  0x45   :  { %82 = dma.hbm_to_vmem [thread:$0]  %s10104_s9, 16, %s80_s28, [#allocation9]  }
  0x46   :  { %8779 = dma.done.wait [#allocation3], 256  }
  0x47   :  { %8780 = vsyncadd [#allocation3], 4294967040 }
  0x48   :  { %8781 = dma.done.wait [#allocation6], 896  }
  0x49   :  { %8782 = vsyncadd [#allocation6], 4294966400 }
  0x4a   :  { %8783 = dma.done.wait [#allocation9], 16  }
  0x4b   :  { %8784 = vsyncadd [#allocation9], 4294967280  ;;  %v8795_v0 = vmov 0.0|0.0   ;;  %vm8796_vm0 = vmmov 0   ;;  %v8797_v1 = vmov 0.0   ;;  %v101_v2 = vld [vmem:[%s10097_s2] sm:$0xff]  ;;  %v99_v17 = vlaneseq }
  0x4c   :  { %8216 = vmatprep.subr.bf16.mxu0 %v8795_v0  ;;  %7582 = vmatprep.mubr.msk.f32.mxu0 %vm8796_vm0, %v8797_v1  ;;  %v102_v3 = vld [vmem:[%s10097_s2 + $0x8] sm:$0xff]  ;;  %v103_v4 = vld [vmem:[%s10097_s2 + $0x10] sm:$0xff]  ;;  %v104_v6 = vld [vmem:[%s10097_s2 + $0x18] sm:$0xff]  ;;  %vm134_vm1 = vcmask 261120   ;;  %s8798_s25 = smov 96   ;;  %vm528_vm2 = vcmask 1040384  }
  0x4d   :  { %8222 = vmatprep.subr.bf16.mxu1 %v8795_v0  ;;  %7593 = vmatprep.mubr.msk.f32.mxu1 %vm8796_vm0, %v8797_v1  ;;  %v8217_v5 = vpack.c.bf16 %v102_v3, %v101_v2  ;;  %v8220_v7 = vpack.c.bf16 %v104_v6, %v103_v4  ;;  %v107_v8 = vld [vmem:[%s10100_s5] sm:$0xff]  ;;  %v108_v9 = vld [vmem:[%s10100_s5 + $0x8] sm:$0xff]  ;;  %v109_v13 = vld [vmem:[%s10100_s5 + $0x10] sm:$0xff]  ;;  %v365_v22 = vshrl.u32 %v99_v17, 7  ;;  %vm530_vm3 = vcmask 58368   ;;  %s8800_s20 = smov 64  }
  0x4e   :  { %v8969_v10 = vld [vmem:[#allocation2] sm:$0xff]  ;;  %v8971_v11 = vpack.c.bf16 %v108_v9, %v107_v8  ;;  %v8973_v12 = vld [vmem:[#allocation2 + $0x8] sm:$0xff]  ;;  %v110_v14 = vld [vmem:[%s10100_s5 + $0x18] sm:$0xff]  ;;  %vm543_vm4 = vcmask 64512   ;;  %v9069_v61 = vand.u32 127, %v99_v17  ;;  %vm771_vm5 = vcmask 1043456  }
  0x4f   :  { %8218 = vmatpush3.bf16.msra.mxu0 %v8217_v5  ;;  %8224 = vmatpush3.bf16.msra.mxu1 %v8217_v5  ;;  %v8988_v15 = vpack.c.bf16 %v110_v14, %v109_v13  ;;  %v8999_v16 = vld [vmem:[%s10096_s1] sm:$0x3]  ;;  %v9012_v24 = vsub.s32 0, %v365_v22  ;;  %v9014_v25 = vsub.s32 1, %v365_v22  ;;  %v115_v55 = vld [vmem:[#allocation7] sm:$0xff]  ;;  %v116_v56 = vld [vmem:[#allocation7 + $0x8] sm:$0xff] }
  0x50   :  { %8219 = vmatprep.subr.bf16.mxu0 %v8795_v0  ;;  %8225 = vmatprep.subr.bf16.mxu1 %v8795_v0  ;;  %v9010_v23 = vld [vmem:[%s10101_s6] ss:$0 sm:$0xff]  ;;  %v9064_v57 = vpack.c.bf16 %v116_v56, %v115_v55  ;;  %v112_v58 = vld [vmem:[#allocation5] sm:$0xff]  ;;  %v113_v59 = vld [vmem:[#allocation5 + $0x8] sm:$0xff]  ;;  %vm282_vm6 = vcmp.eq.s32.totalorder %v9069_v61, 0  ;;  %vm767_vm7 = vcmask 162816  }
  0x51   :  { %v7149_v26 = vld [vmem:[%s10098_s3] ss:$0 sm:$0xff]  ;;  %s8799_s3 = smov 32   ;;  %v9066_v60 = vpack.c.bf16 %v113_v59, %v112_v58  ;;  %v117_v62 = vld [vmem:[#allocation7 + $0x10] sm:$0xff]  ;;  %v7152_v4 = vsel %vm282_vm6, 1.0, %v8797_v1  ;;  %vm965_vm8 = vcmask 156672  }
  0x52   :  { %v9034_v37 = vld [vmem:[%s10099_s4] sm:$0x1] }
  0x53   :  { %8221 = vmatpush3.bf16.msra.mxu0 %v8220_v7  ;;  %8227 = vmatpush3.bf16.msra.mxu1 %v8220_v7  ;;  %v118_v63 = vld [vmem:[#allocation7 + $0x18] sm:$0xff] }
  0x54   :  { %8228 = vmatprep.subr.bf16.mxu0 %v8795_v0  ;;  %7607 = vmatprep.subr.mxu1 %v8797_v1  ;;  %v9074_v2 = vpack.c.bf16 %v118_v63, %v117_v62  ;;  %v9078_v3 = vld [vmem:[#allocation5 + $0x10] sm:$0xf] }
  0x56   :  { %7583 = vmatmul.mubr.msk.f32.vlgmr.msra.gmra.mrb[0].mxu0 %vm134_vm1, %v8969_v10  ;;  %7594 = vmatmul.mubr.msk.f32.vlgmr.msra.gmra.mrb[0].mxu1 %vm134_vm1, %v8973_v12 }
  0x57   :  { %8230 = vmatpush3.bf16.msra.mxu0 %v8971_v11  ;;  %7604 = vmatprep.mubr.msk.f32.mxu0 %vm8796_vm0, %v8797_v1 }
  0x58   :  { %8231 = vmatprep.subr.bf16.mxu0 %v8795_v0  ;;  %7609 = vmatprep.mubr.msk.f32.mxu1 %vm8796_vm0, %v8797_v1 }
  0x5b   :  { %8233 = vmatpush3.bf16.msra.mxu0 %v8988_v15 }
  0x5c   :  { %8234 = vmatprep.subr.bf16.mxu0 %v8795_v0 }
  0x5e   :  { %7605 = vmatmul.mubr.msk.f32.vlgmr.msra.gmra.mrb[2].mxu0 %vm134_vm1, %v8999_v16 }
  0x5f   :  { %7635 = vmatprep.mubr.msk.f32.mxu0 %vm8796_vm0, %v8797_v1  ;;  %8236 = vmatpush3.bf16.msra.mxu0 %v9064_v57 }
  0x60   :  { %8237 = vmatprep.subr.bf16.mxu0 %v8795_v0 }
  0x63   :  { %8239 = vmatpush3.bf16.msra.mxu0 %v9074_v2 }
  0x64   :  { %8249 = vmatprep.subr.bf16.mxu0 %v8795_v0 }
 0x129   :  { %v204_v18 = vpop.f32.mrb[0].mxu0  ;;  %v277_v19 = vpop.f32.mrb[0].mxu1 }
 0x12a   :  { %v7584_v20 = vpop.f32.mrb[1].mxu0  ;;  %v7595_v21 = vpop.f32.mrb[1].mxu1  ;;  %v9020_v30 = vadd.f32 %v7149_v26, %v204_v18  ;;  %v9024_v33 = vadd.f32 %v7149_v26, %v277_v19  ;;  %v9097_v18 = vld [vmem:[#allocation8] ss:$0 sm:$0xff] }
 0x131   :  { %v360_v27 = vpop.f32.mrb[2].mxu0 }
 0x132   :  { %v361_v28 = vadd.f32 %v9010_v23, %v360_v27  ;;  %v7606_v29 = vpop.f32.mrb[3].mxu0 }
 0x134   :  { %v367_v31 = vrot.slane %v361_v28, %v9012_v24  ;;  %v449_v32 = vrot.slane %v361_v28, %v9014_v25  ;;  %853 = vrot.lane.b32.xlu1 %v361_v28, %s8798_s25 }
 0x136   :  { %v368_v34 = vadd.f32 %v367_v31, %v9020_v30  ;;  %v450_v35 = vadd.f32 %v449_v32, %v9024_v33 }
 0x138   :  { %8453 = vtanh.f32 %v368_v34  ;;  %863 = vrot.lane.b32.xlu1 %v361_v28, %s8799_s3 }
 0x139   :  { %8455 = vtanh.f32 %v450_v35 }
 0x142   :  { %v8454_v36 = vpop.eup %8453 }
 0x143   :  { %7608 = vmatpush3.xpose.msk.msra.mxu1 %vm134_vm1, %v8454_v36  ;;  %v8456_v38 = vpop.eup %8455 }
 0x144   :  { %7612 = vmatprep.subr.mxu1 %v8797_v1 }
 0x146   :  { %7610 = vmatmul.mubr.msk.f32.vlgmr.msra.gmra.mrb[2].mxu1 %vm134_vm1, %v9034_v37 }
 0x147   :  { %7613 = vmatpush3.xpose.msk.msra.mxu1 %vm134_vm1, %v8456_v38  ;;  %7614 = vmatprep.mubr.msk.f32.mxu1 %vm8796_vm0, %v8797_v1 }
 0x148   :  { %7617 = vmatprep.subr.mxu1 %v8797_v1 }
 0x14a   :  { %7615 = vmatmul.mubr.msk.f32.vlgmr.msra.gmra.mrb[4].mxu1 %vm134_vm1, %v9034_v37 }
 0x14b   :  { %7618 = vmatpush3.msra.mxu1 %v8969_v10  ;;  %7619 = vmatprep.mubr.msk.f32.mxu1 %vm8796_vm0, %v8797_v1 }
 0x14c   :  { %7622 = vmatprep.subr.mxu1 %v8797_v1 }
 0x1a6   :  { %v854_v26 = vpop.permute.xlu1 %853 }
 0x1aa   :  { %v864_v34 = vpop.permute.xlu1 %863 }
 0x219   :  { %v442_v39 = vpop.f32.mrb[2].mxu1 }
 0x21a   :  { %v7611_v40 = vpop.f32.mrb[3].mxu1 }
 0x21b   :  { %v121_v40 = vld [vmem:[%s10105_s10 + $0x8] sm:$0xff] }
 0x21d   :  { %v521_v41 = vpop.f32.mrb[4].mxu1 }
 0x21e   :  { %v526_v42 = vrot.slane %v521_v41, 7  ;;  %v7616_v43 = vpop.f32.mrb[5].mxu1  ;;  %v122_v41 = vld [vmem:[%s10105_s10 + $0x10] sm:$0xff] }
 0x21f   :  { %v123_v43 = vld [vmem:[%s10105_s10 + $0x18] sm:$0xff] }
 0x220   :  { %v529_v44 = vsel %vm528_vm2, %v442_v39, %v526_v42  ;;  %v120_v39 = vld [vmem:[%s10105_s10] sm:$0xff] }
 0x221   :  { %v531_v45 = vsel %vm530_vm3, %v529_v44, -inf  ;;  %v9110_v42 = vpack.c.bf16 %v121_v40, %v120_v39 }
 0x222   :  { %532 = vmax.xlane.f32.xlu0 %v531_v45 }
 0x2af   :  { %v533_v46 = vpop.xlane.xlu0 %532 }
 0x2b0   :  { %v534_v47 = vsub.f32 %v529_v44, %v533_v46  ;;  %v9116_v44 = vpack.c.bf16 %v123_v43, %v122_v41 }
 0x2b2   :  { %v535_v48 = vmul.f32 1.442695, %v534_v47 }
 0x2b4   :  { %8457 = vpow2.f32 %v535_v48 }
 0x2be   :  { %v8458_v49 = vpop.eup %8457 }
 0x2bf   :  { %v537_v50 = vsel %vm530_vm3, %v8458_v49, 0.0 }
 0x2c0   :  { %538 = vadd.xlane.f32.xlu0 %v537_v50 }
 0x34d   :  { %v539_v51 = vpop.xlane.xlu0 %538 }
 0x34e   :  { %8459 = vrcp.f32 %v539_v51 }
 0x358   :  { %v8460_v52 = vpop.eup %8459 }
 0x359   :  { %v541_v53 = vmul.f32 %v8460_v52, %v8458_v49 }
 0x35b   :  { %542 = vst.msk [vmem:[%s10108_s13] sm:$0x3] %vm530_vm3, %v541_v53  ;;  %7620 = vmatmul.mubr.msk.f32.vlgmr.msra.gmra.mrb[6].mxu1 %vm543_vm4, %v541_v53  ;;  %v617_v54 = vrot.slane %v541_v53, 1 }
 0x35c   :  { %7623 = vmatpush3.msra.mxu1 %v8973_v12  ;;  %7624 = vmatprep.mubr.msk.f32.mxu1 %vm8796_vm0, %v8797_v1 }
 0x35d   :  { %8240 = vmatprep.subr.bf16.mxu1 %v8795_v0 }
 0x35f   :  { %7625 = vmatmul.mubr.msk.f32.vlgmr.msra.gmra.mrb[8].mxu1 %vm543_vm4, %v617_v54 }
 0x360   :  { %7644 = vmatprep.mubr.msk.f32.mxu1 %vm8796_vm0, %v8797_v1  ;;  %8242 = vmatpush3.bf16.msra.mxu1 %v9066_v60 }
 0x361   :  { %7642 = vmatprep.subr.mxu1 %v8797_v1 }
 0x364   :  { %7643 = vmatpush3.msk.msra.mxu1 %vm771_vm5, %v9078_v3 }
 0x365   :  { %7645 = vmatmul.mubr.msk.f32.vlgmr.msra.gmra.mrb[10].mxu1 %vm767_vm7, %v7152_v4  ;;  %8243 = vmatprep.subr.bf16.mxu1 %v8795_v0 }
 0x366   :  { %7655 = vmatprep.mubr.msk.f32.mxu1 %vm8796_vm0, %v8797_v1  ;;  %8245 = vmatpush3.bf16.msra.mxu1 %v9110_v42 }
 0x367   :  { %8246 = vmatprep.subr.bf16.mxu1 %v8795_v0 }
 0x36a   :  { %8248 = vmatpush3.bf16.msra.mxu1 %v9116_v44 }
 0x36b   :  { %7669 = vmatprep.subr.mxu1 %v8797_v1 }
 0x42e   :  { %v613_v5 = vpop.f32.mrb[6].mxu1 }
 0x42f   :  { %v7621_v6 = vpop.f32.mrb[7].mxu1 }
 0x432   :  { %v686_v7 = vpop.f32.mrb[8].mxu1 }
 0x433   :  { %v691_v8 = vrot.slane %v686_v7, 7  ;;  %v7626_v9 = vpop.f32.mrb[9].mxu1 }
 0x434   :  { %v9162_v9 = vld [vmem:[%s10106_s11] ss:$0 sm:$0xff] }
 0x435   :  { %v693_v13 = vsel %vm528_vm2, %v613_v5, %v691_v8 }
 0x436   :  { %7636 = vmatmul.mubr.msk.f32.vlgmr.msra.gmra.mrb[4].mxu0 %vm134_vm1, %v693_v13 }
 0x437   :  { %8251 = vmatpush3.bf16.msra.mxu0 %v8971_v11  ;;  %7666 = vmatprep.mubr.msk.f32.mxu0 %vm8796_vm0, %v8797_v1 }
 0x438   :  { %8252 = vmatprep.subr.bf16.mxu0 %v8795_v0  ;;  %v841_v14 = vpop.f32.mrb[10].mxu1 }
 0x439   :  { %v7646_v17 = vpop.f32.mrb[11].mxu1 }
 0x43b   :  { %8254 = vmatpush3.bf16.msra.mxu0 %v8988_v15 }
 0x43c   :  { %7674 = vmatprep.subr.mxu0 %v8797_v1 }
 0x509   :  { %v763_v19 = vpop.f32.mrb[4].mxu0 }
 0x50a   :  { %v842_v20 = vadd.f32 %v841_v14, %v763_v19  ;;  %v7637_v21 = vpop.f32.mrb[5].mxu0 }
 0x50c   :  { %v851_v22 = vadd.f32 %v9097_v18, %v842_v20 }
 0x50e   :  { %v856_v27 = vadd.f32 %v854_v26, %v851_v22 }
 0x510   :  { %v7165_v28 = vmul.f32 -1.442695, %v856_v27 }
 0x512   :  { %8461 = vpow2.f32 %v7165_v28 }
 0x51c   :  { %v8462_v29 = vpop.eup %8461 }
 0x51d   :  { %v860_v31 = vadd.f32 1.0, %v8462_v29 }
 0x51f   :  { %8463 = vrcp.f32 %v860_v31 }
 0x529   :  { %v8464_v32 = vpop.eup %8463 }
 0x52a   :  { %v866_v35 = vmul.f32 %v8464_v32, %v864_v34  ;;  %v873_v47 = vsub.f32 1.0, %v8464_v32 }
 0x52c   :  { %868 = vrot.lane.b32.xlu0 %v866_v35, %s8800_s20 }
 0x59e   :  { %v869_v36 = vpop.permute.xlu0 %868 }
 0x59f   :  { %v871_v38 = vadd.f32 %v869_v36, %v851_v22 }
 0x5a1   :  { %8465 = vtanh.f32 %v871_v38 }
 0x5ab   :  { %v8466_v45 = vpop.eup %8465 }
 0x5ac   :  { %875 = vrot.lane.b32.xlu1 %v8466_v45, %s8798_s25 }
 0x5b0   :  { %879 = vrot.lane.b32.xlu1 %v8999_v16, %s8799_s3 }
 0x61e   :  { %v876_v46 = vpop.permute.xlu1 %875 }
 0x61f   :  { %v878_v49 = vmul.f32 %v876_v46, %v873_v47 }
 0x622   :  { %v880_v48 = vpop.permute.xlu1 %879 }
 0x623   :  { %v882_v50 = vmul.f32 %v8464_v32, %v880_v48 }
 0x625   :  { %v9124_v51 = vadd.f32 %v882_v50, %v878_v49 }
 0x627   :  { %891 = vrot.lane.b32.xlu1 %v9124_v51, %s8798_s25 }
 0x699   :  { %v892_v52 = vpop.permute.xlu1 %891 }
 0x69a   :  { %7656 = vmatmul.mubr.msk.f32.vlgmr.msra.gmra.mrb[12].mxu1 %vm134_vm1, %v892_v52  ;;  %7667 = vmatmul.mubr.msk.f32.vlgmr.msra.gmra.mrb[6].mxu0 %vm134_vm1, %v892_v52 }
 0x69b   :  { %7676 = vmatprep.mubr.msk.f32.mxu0 %vm8796_vm0, %v8797_v1  ;;  %7671 = vmatprep.mubr.msk.f32.mxu1 %vm8796_vm0, %v8797_v1 }
 0x76d   :  { %v961_v16 = vpop.f32.mrb[12].mxu1  ;;  %v1066_v53 = vpop.f32.mrb[6].mxu0 }
 0x76e   :  { %v9135_v54 = vadd.f32 %v9010_v23, %v1066_v53  ;;  %v7657_v55 = vpop.f32.mrb[13].mxu1  ;;  %v7668_v56 = vpop.f32.mrb[7].mxu0  ;;  %v9166_v19 = vadd.f32 %v9162_v9, %v961_v16 }
 0x770   :  { %v1073_v58 = vrot.slane %v9135_v54, %v9012_v24  ;;  %v1152_v59 = vrot.slane %v9135_v54, %v9014_v25  ;;  %v966_v21 = vsel %vm965_vm8, %v9166_v19, -inf }
 0x772   :  { %v1074_v62 = vadd.f32 %v1073_v58, %v9020_v30  ;;  %v1153_v63 = vadd.f32 %v1152_v59, %v9024_v33 }
 0x774   :  { %8467 = vtanh.f32 %v1074_v62 }
 0x775   :  { %8469 = vtanh.f32 %v1153_v63 }
 0x77e   :  { %v8468_v4 = vpop.eup %8467 }
 0x77f   :  { %v8470_v5 = vpop.eup %8469  ;;  %7670 = vmatpush3.xpose.msk.msra.mxu1 %vm134_vm1, %v8468_v4 }
 0x780   :  { %7675 = vmatpush3.xpose.msk.msra.mxu0 %vm134_vm1, %v8470_v5  ;;  %7679 = vmatprep.subr.mxu1 %v8797_v1 }
 0x781   :  { %7684 = vmatprep.subr.mxu0 %v8797_v1 }
 0x782   :  { %7672 = vmatmul.mubr.msk.f32.vlgmr.msra.gmra.mrb[14].mxu1 %vm134_vm1, %v9034_v37 }
 0x783   :  { %7677 = vmatmul.mubr.msk.f32.vlgmr.msra.gmra.mrb[8].mxu0 %vm134_vm1, %v9034_v37  ;;  %7680 = vmatpush3.msra.mxu1 %v8969_v10 }
 0x784   :  { %7681 = vmatprep.mubr.msk.f32.mxu1 %vm8796_vm0, %v8797_v1  ;;  %7685 = vmatpush3.msra.mxu0 %v8973_v12 }
 0x785   :  { %7686 = vmatprep.mubr.msk.f32.mxu0 %vm8796_vm0, %v8797_v1  ;;  %8261 = vmatprep.subr.bf16.mxu0 %v8795_v0 }
 0x786   :  { %8255 = vmatprep.subr.bf16.mxu1 %v8795_v0 }
 0x855   :  { %v1145_v6 = vpop.f32.mrb[14].mxu1 }
 0x856   :  { %v1224_v7 = vpop.f32.mrb[8].mxu0  ;;  %v7673_v8 = vpop.f32.mrb[15].mxu1 }
 0x857   :  { %v1229_v13 = vrot.slane %v1224_v7, 7  ;;  %v7678_v14 = vpop.f32.mrb[9].mxu0 }
 0x859   :  { %v1231_v17 = vsel %vm528_vm2, %v1145_v6, %v1229_v13 }
 0x85a   :  { %v1232_v20 = vsel %vm530_vm3, %v1231_v17, -inf }
 0x85b   :  { %1233 = vmax.xlane.f32.xlu1 %v1232_v20 }
 0x85f   :  { %967 = vmax.xlane.f32.xlu1 %v966_v21 }
 0x8e8   :  { %v1234_v22 = vpop.xlane.xlu1 %1233 }
 0x8e9   :  { %v1235_v26 = vsub.f32 %v1231_v17, %v1234_v22 }
 0x8eb   :  { %v1236_v27 = vmul.f32 1.442695, %v1235_v26 }
 0x8ec   :  { %v9171_v28 = vpop.xlane.xlu1 %967 }
 0x8ed   :  { %8471 = vpow2.f32 %v1236_v27  ;;  %vm980_vm9 = vcmp.eq.f32.partialorder %v9166_v19, %v9171_v28 }
 0x8ee   :  { %v981_v29 = vsel %vm980_vm9, %v9069_v61, 20 }
 0x8ef   :  { %v982_v31 = vsel %vm965_vm8, %v981_v29, 2147483647 }
 0x8f0   :  { %v984_v32 = vshra.s32 %v982_v31, 16  ;;  %v983_v38 = vand.u32 65535, %v982_v31 }
 0x8f2   :  { %v986_v34 = vcvt.s32.f32 %v984_v32  ;;  %v985_v40 = vcvt.s32.f32 %v983_v38 }
 0x8f4   :  { %987 = vmin.xlane.f32.xlu1 %v986_v34 }
 0x8f7   :  { %v8472_v35 = vpop.eup %8471 }
 0x8f8   :  { %v1238_v36 = vsel %vm530_vm3, %v8472_v35, 0.0 }
 0x8f9   :  { %1239 = vadd.xlane.f32.xlu0 %v1238_v36 }
 0x905   :  { %1543 = vrot.lane.b32.xlu1 %v9135_v54, %s8798_s25 }
 0x981   :  { %v988_v39 = vpop.xlane.xlu1 %987 }
 0x982   :  { %vm989_vm10 = vcmp.eq.f32.partialorder %v986_v34, %v988_v39  ;;  %v994_v48 = vcvt.f32.s32 %v988_v39 }
 0x983   :  { %v990_v41 = vsel %vm989_vm10, %v985_v40, inf }
 0x984   :  { %991 = vmin.xlane.f32.xlu0 %v990_v41  ;;  %v995_v50 = vshll.u32 %v994_v48, 16 }
 0x985   :  { %v1544_v13 = vpop.permute.xlu1 %1543 }
 0x986   :  { %v1240_v43 = vpop.xlane.xlu0 %1239 }
 0x987   :  { %8473 = vrcp.f32 %v1240_v43 }
 0x991   :  { %v8474_v45 = vpop.eup %8473 }
 0x992   :  { %v1242_v46 = vmul.f32 %v8474_v45, %v8472_v35 }
 0x994   :  { %7174 = vst.msk [vmem:[%s10108_s13 + $0x2] sm:$0x3] %vm530_vm3, %v1242_v46  ;;  %7682 = vmatmul.mubr.msk.f32.vlgmr.msra.gmra.mrb[16].mxu1 %vm543_vm4, %v1242_v46  ;;  %v1318_v47 = vrot.slane %v1242_v46, 1 }
 0x995   :  { %8257 = vmatpush3.bf16.msra.mxu1 %v9064_v57  ;;  %7697 = vmatprep.mubr.msk.f32.mxu1 %vm8796_vm0, %v8797_v1 }
 0x996   :  { %7687 = vmatmul.mubr.msk.f32.vlgmr.msra.gmra.mrb[10].mxu0 %vm543_vm4, %v1318_v47  ;;  %8258 = vmatprep.subr.bf16.mxu1 %v8795_v0 }
 0x997   :  { %8263 = vmatpush3.bf16.msra.mxu0 %v9066_v60  ;;  %7706 = vmatprep.mubr.msk.f32.mxu0 %vm8796_vm0, %v8797_v1 }
 0x998   :  { %7704 = vmatprep.subr.mxu0 %v8797_v1 }
 0x999   :  { %8260 = vmatpush3.bf16.msra.mxu1 %v9074_v2 }
 0x99a   :  { %1553 = vrot.lane.b32.xlu0 %v9135_v54, %s8799_s3  ;;  %8270 = vmatprep.subr.bf16.mxu1 %v8795_v0 }
 0x99b   :  { %7705 = vmatpush3.msk.msra.mxu0 %vm771_vm5, %v9078_v3 }
 0x99c   :  { %8264 = vmatprep.subr.bf16.mxu0 %v8795_v0 }
 0xa11   :  { %v992_v49 = vpop.xlane.xlu0 %991 }
 0xa12   :  { %v993_v52 = vcvt.f32.s32 %v992_v49 }
 0xa14   :  { %v996_v16 = vadd.s32 %v995_v50, %v993_v52 }
 0xa15   :  { %v1554_v26 = vpop.permute.xlu0 %1553 }
 0xa16   :  { %vm997_vm11 = vcmp.eq.s32.totalorder %v9069_v61, %v996_v16 }
 0xa17   :  { %v7168_v53 = vsel %vm997_vm11, 1.0, %v8797_v1 }
 0xa18   :  { %7707 = vmatmul.mubr.msk.f32.vlgmr.msra.gmra.mrb[12].mxu0 %vm767_vm7, %v7168_v53 }
 0xa19   :  { %8266 = vmatpush3.bf16.msra.mxu0 %v9110_v42  ;;  %7717 = vmatprep.mubr.msk.f32.mxu0 %vm8796_vm0, %v8797_v1 }
 0xa1a   :  { %8267 = vmatprep.subr.bf16.mxu0 %v8795_v0 }
 0xa1d   :  { %8269 = vmatpush3.bf16.msra.mxu0 %v9116_v44 }
 0xa1e   :  { %7731 = vmatprep.subr.mxu0 %v8797_v1 }
 0xa67   :  { %v1314_v54 = vpop.f32.mrb[16].mxu1 }
 0xa68   :  { %v7683_v55 = vpop.f32.mrb[17].mxu1 }
 0xa69   :  { %v1387_v56 = vpop.f32.mrb[10].mxu0 }
 0xa6a   :  { %v1392_v58 = vrot.slane %v1387_v56, 7  ;;  %v7688_v59 = vpop.f32.mrb[11].mxu0 }
 0xa6c   :  { %v1394_v62 = vsel %vm528_vm2, %v1314_v54, %v1392_v58 }
 0xa6d   :  { %7698 = vmatmul.mubr.msk.f32.vlgmr.msra.gmra.mrb[18].mxu1 %vm134_vm1, %v1394_v62 }
 0xa6e   :  { %8272 = vmatpush3.bf16.msra.mxu1 %v8971_v11  ;;  %7728 = vmatprep.mubr.msk.f32.mxu1 %vm8796_vm0, %v8797_v1 }
 0xa6f   :  { %8273 = vmatprep.subr.bf16.mxu1 %v8795_v0 }
 0xa72   :  { %8275 = vmatpush3.bf16.msra.mxu1 %v8988_v15 }
 0xa73   :  { %7736 = vmatprep.subr.mxu1 %v8797_v1 }
 0xaeb   :  { %v1537_v63 = vpop.f32.mrb[12].mxu0 }
 0xaec   :  { %v7708_v4 = vpop.f32.mrb[13].mxu0 }
 0xb40   :  { %v1464_v5 = vpop.f32.mrb[18].mxu1 }
 0xb41   :  { %v1538_v6 = vadd.f32 %v1537_v63, %v1464_v5  ;;  %v7699_v7 = vpop.f32.mrb[19].mxu1 }
 0xb43   :  { %v1541_v8 = vadd.f32 %v9097_v18, %v1538_v6 }
 0xb45   :  { %v1546_v14 = vadd.f32 %v1544_v13, %v1541_v8 }
 0xb47   :  { %v7180_v17 = vmul.f32 -1.442695, %v1546_v14 }
 0xb49   :  { %8475 = vpow2.f32 %v7180_v17 }
 0xb53   :  { %v8476_v20 = vpop.eup %8475 }
 0xb54   :  { %v1550_v21 = vadd.f32 1.0, %v8476_v20 }
 0xb56   :  { %8477 = vrcp.f32 %v1550_v21 }
 0xb60   :  { %v8478_v22 = vpop.eup %8477 }
 0xb61   :  { %v1556_v27 = vmul.f32 %v8478_v22, %v1554_v26  ;;  %v1563_v34 = vsub.f32 1.0, %v8478_v22  ;;  %v1569_v36 = vmul.f32 %v8478_v22, %v9124_v51 }
 0xb63   :  { %1558 = vrot.lane.b32.xlu1 %v1556_v27, %s8800_s20 }
 0xbd5   :  { %v1559_v29 = vpop.permute.xlu1 %1558 }
 0xbd6   :  { %v1561_v31 = vadd.f32 %v1559_v29, %v1541_v8 }
 0xbd8   :  { %8479 = vtanh.f32 %v1561_v31 }
 0xbe2   :  { %v8480_v32 = vpop.eup %8479 }
 0xbe3   :  { %1565 = vrot.lane.b32.xlu1 %v8480_v32, %s8798_s25 }
 0xc55   :  { %v1566_v35 = vpop.permute.xlu1 %1565 }
 0xc56   :  { %v1568_v38 = vmul.f32 %v1566_v35, %v1563_v34 }
 0xc58   :  { %v9222_v39 = vadd.f32 %v1569_v36, %v1568_v38 }
 0xc5a   :  { %1572 = vrot.lane.b32.xlu0 %v9222_v39, %s8798_s25 }
 0xccc   :  { %v1573_v40 = vpop.permute.xlu0 %1572 }
 0xccd   :  { %7718 = vmatmul.mubr.msk.f32.vlgmr.msra.gmra.mrb[14].mxu0 %vm134_vm1, %v1573_v40  ;;  %7729 = vmatmul.mubr.msk.f32.vlgmr.msra.gmra.mrb[20].mxu1 %vm134_vm1, %v1573_v40 }
 0xcce   :  { %7738 = vmatprep.mubr.msk.f32.mxu1 %vm8796_vm0, %v8797_v1  ;;  %7733 = vmatprep.mubr.msk.f32.mxu0 %vm8796_vm0, %v8797_v1 }
 0xda0   :  { %v1642_v41 = vpop.f32.mrb[14].mxu0  ;;  %v1747_v43 = vpop.f32.mrb[20].mxu1 }
 0xda1   :  { %v9233_v51 = vadd.f32 %v9010_v23, %v1747_v43  ;;  %v7719_v45 = vpop.f32.mrb[15].mxu0  ;;  %v7730_v46 = vpop.f32.mrb[21].mxu1  ;;  %v9260_v7 = vadd.f32 %v9162_v9, %v1642_v41 }
 0xda3   :  { %v1754_v47 = vrot.slane %v9233_v51, %v9012_v24  ;;  %v1833_v48 = vrot.slane %v9233_v51, %v9014_v25  ;;  %v1646_v13 = vsel %vm965_vm8, %v9260_v7, -inf }
 0xda5   :  { %v1755_v49 = vadd.f32 %v1754_v47, %v9020_v30  ;;  %v1834_v50 = vadd.f32 %v1833_v48, %v9024_v33 }
 0xda7   :  { %8481 = vtanh.f32 %v1755_v49 }
 0xda8   :  { %8483 = vtanh.f32 %v1834_v50 }
 0xdb1   :  { %v8482_v52 = vpop.eup %8481 }
 0xdb2   :  { %v8484_v16 = vpop.eup %8483  ;;  %7732 = vmatpush3.xpose.msk.msra.mxu0 %vm134_vm1, %v8482_v52 }
 0xdb3   :  { %7737 = vmatpush3.xpose.msk.msra.mxu1 %vm134_vm1, %v8484_v16  ;;  %7741 = vmatprep.subr.mxu0 %v8797_v1 }
 0xdb4   :  { %7746 = vmatprep.subr.mxu1 %v8797_v1 }
 0xdb5   :  { %7734 = vmatmul.mubr.msk.f32.vlgmr.msra.gmra.mrb[16].mxu0 %vm134_vm1, %v9034_v37 }
 0xdb6   :  { %7739 = vmatmul.mubr.msk.f32.vlgmr.msra.gmra.mrb[22].mxu1 %vm134_vm1, %v9034_v37  ;;  %7742 = vmatpush3.msra.mxu0 %v8969_v10 }
 0xdb7   :  { %7743 = vmatprep.mubr.msk.f32.mxu0 %vm8796_vm0, %v8797_v1  ;;  %7747 = vmatpush3.msra.mxu1 %v8973_v12 }
 0xdb8   :  { %7748 = vmatprep.mubr.msk.f32.mxu1 %vm8796_vm0, %v8797_v1  ;;  %8276 = vmatprep.subr.bf16.mxu0 %v8795_v0 }
 0xdb9   :  { %8282 = vmatprep.subr.bf16.mxu1 %v8795_v0 }
 0xe88   :  { %v1826_v53 = vpop.f32.mrb[16].mxu0 }
 0xe89   :  { %v1905_v54 = vpop.f32.mrb[22].mxu1  ;;  %v7735_v55 = vpop.f32.mrb[17].mxu0 }
 0xe8a   :  { %v1910_v56 = vrot.slane %v1905_v54, 7  ;;  %v7740_v58 = vpop.f32.mrb[23].mxu1 }
 0xe8c   :  { %v1912_v59 = vsel %vm528_vm2, %v1826_v53, %v1910_v56 }
 0xe8d   :  { %v1913_v62 = vsel %vm530_vm3, %v1912_v59, -inf }
 0xe8e   :  { %1914 = vmax.xlane.f32.xlu1 %v1913_v62 }
 0xf1b   :  { %v1915_v63 = vpop.xlane.xlu1 %1914 }
 0xf1c   :  { %v1916_v4 = vsub.f32 %v1912_v59, %v1915_v63 }
 0xf1e   :  { %v1917_v5 = vmul.f32 1.442695, %v1916_v4 }
 0xf20   :  { %8485 = vpow2.f32 %v1917_v5 }
 0xf2a   :  { %v8486_v6 = vpop.eup %8485 }
 0xf2b   :  { %v1919_v8 = vsel %vm530_vm3, %v8486_v6, 0.0 }
 0xf2c   :  { %1920 = vadd.xlane.f32.xlu0 %v1919_v8 }
 0xf30   :  { %1647 = vmax.xlane.f32.xlu0 %v1646_v13 }
 0xfb9   :  { %v1921_v14 = vpop.xlane.xlu0 %1920 }
 0xfba   :  { %8487 = vrcp.f32 %v1921_v14 }
 0xfbd   :  { %v9265_v17 = vpop.xlane.xlu0 %1647 }
 0xfbe   :  { %vm1661_vm12 = vcmp.eq.f32.partialorder %v9260_v7, %v9265_v17 }
 0xfbf   :  { %v1662_v20 = vsel %vm1661_vm12, %v9069_v61, 20 }
 0xfc0   :  { %v1663_v21 = vsel %vm965_vm8, %v1662_v20, 2147483647 }
 0xfc1   :  { %v1665_v22 = vshra.s32 %v1663_v21, 16  ;;  %v1664_v32 = vand.u32 65535, %v1663_v21 }
 0xfc3   :  { %v1667_v26 = vcvt.s32.f32 %v1665_v22  ;;  %v1666_v35 = vcvt.s32.f32 %v1664_v32 }
 0xfc4   :  { %v8488_v27 = vpop.eup %8487 }
 0xfc5   :  { %v1923_v29 = vmul.f32 %v8488_v27, %v8486_v6  ;;  %1668 = vmin.xlane.f32.xlu1 %v1667_v26 }
 0xfc7   :  { %7188 = vst.msk [vmem:[%s10108_s13 + $0x4] sm:$0x3] %vm530_vm3, %v1923_v29  ;;  %7744 = vmatmul.mubr.msk.f32.vlgmr.msra.gmra.mrb[18].mxu0 %vm543_vm4, %v1923_v29  ;;  %v1999_v31 = vrot.slane %v1923_v29, 1 }
 0xfc8   :  { %8278 = vmatpush3.bf16.msra.mxu0 %v9064_v57  ;;  %7759 = vmatprep.mubr.msk.f32.mxu0 %vm8796_vm0, %v8797_v1 }
 0xfc9   :  { %7749 = vmatmul.mubr.msk.f32.vlgmr.msra.gmra.mrb[24].mxu1 %vm543_vm4, %v1999_v31  ;;  %8279 = vmatprep.subr.bf16.mxu0 %v8795_v0 }
 0xfca   :  { %8284 = vmatpush3.bf16.msra.mxu1 %v9066_v60  ;;  %7768 = vmatprep.mubr.msk.f32.mxu1 %vm8796_vm0, %v8797_v1 }
 0xfcb   :  { %7766 = vmatprep.subr.mxu1 %v8797_v1 }
 0xfcc   :  { %8281 = vmatpush3.bf16.msra.mxu0 %v9074_v2 }
 0xfcd   :  { %8291 = vmatprep.subr.bf16.mxu0 %v8795_v0 }
 0xfce   :  { %7767 = vmatpush3.msk.msra.mxu1 %vm771_vm5, %v9078_v3 }
 0xfcf   :  { %8285 = vmatprep.subr.bf16.mxu1 %v8795_v0 }
 0xfd6   :  { %2224 = vrot.lane.b32.xlu1 %v9233_v51, %s8798_s25 }
0x1052   :  { %v1669_v34 = vpop.xlane.xlu1 %1668 }
0x1053   :  { %vm1670_vm13 = vcmp.eq.f32.partialorder %v1667_v26, %v1669_v34 }
0x1054   :  { %v1671_v36 = vsel %vm1670_vm13, %v1666_v35, inf }
0x1055   :  { %1672 = vmin.xlane.f32.xlu0 %v1671_v36 }
0x1056   :  { %v2225_v59 = vpop.permute.xlu1 %2224 }
0x106b   :  { %2234 = vrot.lane.b32.xlu0 %v9233_v51, %s8799_s3  ;;  %v1675_v51 = vcvt.f32.s32 %v1669_v34 }
0x106d   :  { %v1676_v48 = vshll.u32 %v1675_v51, 16 }
0x109a   :  { %v1995_v38 = vpop.f32.mrb[18].mxu0 }
0x109b   :  { %v7745_v40 = vpop.f32.mrb[19].mxu0 }
0x109c   :  { %v2068_v41 = vpop.f32.mrb[24].mxu1 }
0x109d   :  { %v2073_v43 = vrot.slane %v2068_v41, 7  ;;  %v7750_v45 = vpop.f32.mrb[25].mxu1 }
0x109f   :  { %v2075_v46 = vsel %vm528_vm2, %v1995_v38, %v2073_v43 }
0x10a0   :  { %7760 = vmatmul.mubr.msk.f32.vlgmr.msra.gmra.mrb[20].mxu0 %vm134_vm1, %v2075_v46 }
0x10a1   :  { %8293 = vmatpush3.bf16.msra.mxu0 %v8971_v11  ;;  %7790 = vmatprep.mubr.msk.f32.mxu0 %vm8796_vm0, %v8797_v1 }
0x10a2   :  { %8294 = vmatprep.subr.bf16.mxu0 %v8795_v0 }
0x10a5   :  { %8296 = vmatpush3.bf16.msra.mxu0 %v8988_v15 }
0x10a6   :  { %7798 = vmatprep.subr.mxu0 %v8797_v1 }
0x10e2   :  { %v1673_v47 = vpop.xlane.xlu0 %1672 }
0x10e3   :  { %v1674_v49 = vcvt.f32.s32 %v1673_v47 }
0x10e5   :  { %v1677_v50 = vadd.s32 %v1676_v48, %v1674_v49 }
0x10e6   :  { %v2235_v8 = vpop.permute.xlu0 %2234 }
0x10e7   :  { %vm1678_vm14 = vcmp.eq.s32.totalorder %v9069_v61, %v1677_v50 }
0x10e8   :  { %v7182_v52 = vsel %vm1678_vm14, 1.0, %v8797_v1 }
0x10e9   :  { %7769 = vmatmul.mubr.msk.f32.vlgmr.msra.gmra.mrb[26].mxu1 %vm767_vm7, %v7182_v52 }
0x10ea   :  { %8287 = vmatpush3.bf16.msra.mxu1 %v9110_v42  ;;  %7779 = vmatprep.mubr.msk.f32.mxu1 %vm8796_vm0, %v8797_v1 }
0x10eb   :  { %8288 = vmatprep.subr.bf16.mxu1 %v8795_v0 }
0x10ee   :  { %8290 = vmatpush3.bf16.msra.mxu1 %v9116_v44 }
0x10ef   :  { %7793 = vmatprep.subr.mxu1 %v8797_v1 }
0x1173   :  { %v2145_v16 = vpop.f32.mrb[20].mxu0 }
0x1174   :  { %v7761_v53 = vpop.f32.mrb[21].mxu0 }
0x11bc   :  { %v2218_v54 = vpop.f32.mrb[26].mxu1 }
0x11bd   :  { %v2219_v55 = vadd.f32 %v2218_v54, %v2145_v16  ;;  %v7770_v56 = vpop.f32.mrb[27].mxu1 }
0x11bf   :  { %v2222_v58 = vadd.f32 %v9097_v18, %v2219_v55 }
0x11c1   :  { %v2227_v62 = vadd.f32 %v2225_v59, %v2222_v58 }
0x11c3   :  { %v7194_v63 = vmul.f32 -1.442695, %v2227_v62 }
0x11c5   :  { %8489 = vpow2.f32 %v7194_v63 }
0x11cf   :  { %v8490_v4 = vpop.eup %8489 }
0x11d0   :  { %v2231_v5 = vadd.f32 1.0, %v8490_v4 }
0x11d2   :  { %8491 = vrcp.f32 %v2231_v5 }
0x11dc   :  { %v8492_v6 = vpop.eup %8491 }
0x11dd   :  { %v2237_v13 = vmul.f32 %v8492_v6, %v2235_v8  ;;  %v2244_v22 = vsub.f32 1.0, %v8492_v6  ;;  %v2250_v27 = vmul.f32 %v8492_v6, %v9222_v39 }
0x11df   :  { %2239 = vrot.lane.b32.xlu1 %v2237_v13, %s8800_s20 }
0x1251   :  { %v2240_v14 = vpop.permute.xlu1 %2239 }
0x1252   :  { %v2242_v20 = vadd.f32 %v2240_v14, %v2222_v58 }
0x1254   :  { %8493 = vtanh.f32 %v2242_v20 }
0x125e   :  { %v8494_v21 = vpop.eup %8493 }
0x125f   :  { %2246 = vrot.lane.b32.xlu1 %v8494_v21, %s8798_s25 }
0x12d1   :  { %v2247_v26 = vpop.permute.xlu1 %2246 }
0x12d2   :  { %v2249_v29 = vmul.f32 %v2247_v26, %v2244_v22 }
0x12d4   :  { %v9315_v31 = vadd.f32 %v2250_v27, %v2249_v29 }
0x12d6   :  { %2253 = vrot.lane.b32.xlu0 %v9315_v31, %s8798_s25 }
0x1348   :  { %v2254_v32 = vpop.permute.xlu0 %2253 }
0x1349   :  { %7780 = vmatmul.mubr.msk.f32.vlgmr.msra.gmra.mrb[28].mxu1 %vm134_vm1, %v2254_v32  ;;  %7791 = vmatmul.mubr.msk.f32.vlgmr.msra.gmra.mrb[22].mxu0 %vm134_vm1, %v2254_v32 }
0x134a   :  { %7800 = vmatprep.mubr.msk.f32.mxu0 %vm8796_vm0, %v8797_v1  ;;  %7795 = vmatprep.mubr.msk.f32.mxu1 %vm8796_vm0, %v8797_v1 }
0x141c   :  { %v2323_v34 = vpop.f32.mrb[28].mxu1  ;;  %v2428_v35 = vpop.f32.mrb[22].mxu0 }
0x141d   :  { %v9326_v39 = vadd.f32 %v9010_v23, %v2428_v35  ;;  %v7781_v36 = vpop.f32.mrb[29].mxu1  ;;  %v7792_v38 = vpop.f32.mrb[23].mxu0  ;;  %v9353_v54 = vadd.f32 %v9162_v9, %v2323_v34 }
0x141f   :  { %v2435_v40 = vrot.slane %v9326_v39, %v9012_v24  ;;  %v2514_v41 = vrot.slane %v9326_v39, %v9014_v25  ;;  %v2327_v56 = vsel %vm965_vm8, %v9353_v54, -inf }
0x1421   :  { %v2436_v43 = vadd.f32 %v2435_v40, %v9020_v30  ;;  %v2515_v45 = vadd.f32 %v2514_v41, %v9024_v33 }
0x1423   :  { %8495 = vtanh.f32 %v2436_v43 }
0x1424   :  { %8497 = vtanh.f32 %v2515_v45 }
0x142d   :  { %v8496_v46 = vpop.eup %8495 }
0x142e   :  { %v8498_v51 = vpop.eup %8497  ;;  %7794 = vmatpush3.xpose.msk.msra.mxu1 %vm134_vm1, %v8496_v46 }
0x142f   :  { %7799 = vmatpush3.xpose.msk.msra.mxu0 %vm134_vm1, %v8498_v51  ;;  %7803 = vmatprep.subr.mxu1 %v8797_v1 }
0x1430   :  { %7808 = vmatprep.subr.mxu0 %v8797_v1 }
0x1431   :  { %7796 = vmatmul.mubr.msk.f32.vlgmr.msra.gmra.mrb[30].mxu1 %vm134_vm1, %v9034_v37 }
0x1432   :  { %7801 = vmatmul.mubr.msk.f32.vlgmr.msra.gmra.mrb[24].mxu0 %vm134_vm1, %v9034_v37  ;;  %7804 = vmatpush3.msra.mxu1 %v8969_v10 }
0x1433   :  { %7805 = vmatprep.mubr.msk.f32.mxu1 %vm8796_vm0, %v8797_v1  ;;  %7809 = vmatpush3.msra.mxu0 %v8973_v12 }
0x1434   :  { %7810 = vmatprep.mubr.msk.f32.mxu0 %vm8796_vm0, %v8797_v1  ;;  %8297 = vmatprep.subr.bf16.mxu1 %v8795_v0 }
0x1435   :  { %8303 = vmatprep.subr.bf16.mxu0 %v8795_v0 }
0x1504   :  { %v2507_v23 = vpop.f32.mrb[30].mxu1 }
0x1505   :  { %v2586_v47 = vpop.f32.mrb[24].mxu0  ;;  %v7797_v48 = vpop.f32.mrb[31].mxu1 }
0x1506   :  { %v2591_v49 = vrot.slane %v2586_v47, 7  ;;  %v7802_v50 = vpop.f32.mrb[25].mxu0 }
0x1508   :  { %v2593_v37 = vsel %vm528_vm2, %v2507_v23, %v2591_v49 }
0x1509   :  { %v2594_v10 = vsel %vm530_vm3, %v2593_v37, -inf }
0x150a   :  { %2595 = vmax.xlane.f32.xlu1 %v2594_v10 }
0x1597   :  { %v2596_v52 = vpop.xlane.xlu1 %2595 }
0x1598   :  { %v2597_v16 = vsub.f32 %v2593_v37, %v2596_v52 }
0x159a   :  { %v2598_v12 = vmul.f32 1.442695, %v2597_v16 }
0x159c   :  { %8499 = vpow2.f32 %v2598_v12 }
0x15a6   :  { %v8500_v53 = vpop.eup %8499 }
0x15a7   :  { %v2600_v55 = vsel %vm530_vm3, %v8500_v53, 0.0 }
0x15a8   :  { %2601 = vadd.xlane.f32.xlu0 %v2600_v55 }
0x15ac   :  { %2328 = vmax.xlane.f32.xlu0 %v2327_v56 }
0x1635   :  { %v2602_v58 = vpop.xlane.xlu0 %2601 }
0x1636   :  { %8501 = vrcp.f32 %v2602_v58 }
0x1639   :  { %v9358_v59 = vpop.xlane.xlu0 %2328 }
0x163a   :  { %vm2342_vm15 = vcmp.eq.f32.partialorder %v9353_v54, %v9358_v59 }
0x163b   :  { %v2343_v62 = vsel %vm2342_vm15, %v9069_v61, 20 }
0x163c   :  { %v2344_v63 = vsel %vm965_vm8, %v2343_v62, 2147483647 }
0x163d   :  { %v2346_v4 = vshra.s32 %v2344_v63, 16  ;;  %v2345_v14 = vand.u32 65535, %v2344_v63 }
0x163f   :  { %v2348_v5 = vcvt.s32.f32 %v2346_v4  ;;  %v2347_v21 = vcvt.s32.f32 %v2345_v14 }
0x1640   :  { %v8502_v6 = vpop.eup %8501 }
0x1641   :  { %v2604_v8 = vmul.f32 %v8502_v6, %v8500_v53  ;;  %2349 = vmin.xlane.f32.xlu1 %v2348_v5 }
0x1643   :  { %7202 = vst.msk [vmem:[%s10108_s13 + $0x6] sm:$0x3] %vm530_vm3, %v2604_v8  ;;  %7806 = vmatmul.mubr.msk.f32.vlgmr.msra.gmra.mrb[32].mxu1 %vm543_vm4, %v2604_v8  ;;  %v2680_v13 = vrot.slane %v2604_v8, 1 }
0x1644   :  { %8299 = vmatpush3.bf16.msra.mxu1 %v9064_v57  ;;  %7821 = vmatprep.mubr.msk.f32.mxu1 %vm8796_vm0, %v8797_v1 }
0x1645   :  { %7811 = vmatmul.mubr.msk.f32.vlgmr.msra.gmra.mrb[26].mxu0 %vm543_vm4, %v2680_v13  ;;  %8300 = vmatprep.subr.bf16.mxu1 %v8795_v0 }
0x1646   :  { %8305 = vmatpush3.bf16.msra.mxu0 %v9066_v60  ;;  %7830 = vmatprep.mubr.msk.f32.mxu0 %vm8796_vm0, %v8797_v1 }
0x1647   :  { %7828 = vmatprep.subr.mxu0 %v8797_v1 }
0x1648   :  { %8302 = vmatpush3.bf16.msra.mxu1 %v9074_v2 }
0x1649   :  { %8312 = vmatprep.subr.bf16.mxu1 %v8795_v0 }
0x164a   :  { %7829 = vmatpush3.msk.msra.mxu0 %vm771_vm5, %v9078_v3 }
0x164b   :  { %8306 = vmatprep.subr.bf16.mxu0 %v8795_v0 }
0x1652   :  { %2905 = vrot.lane.b32.xlu1 %v9326_v39, %s8798_s25 }
0x16ce   :  { %v2350_v20 = vpop.xlane.xlu1 %2349 }
0x16cf   :  { %vm2351_vm6 = vcmp.eq.f32.partialorder %v2348_v5, %v2350_v20  ;;  %v2356_v35 = vcvt.f32.s32 %v2350_v20 }
0x16d0   :  { %v2352_v22 = vsel %vm2351_vm6, %v2347_v21, inf }
0x16d1   :  { %2353 = vmin.xlane.f32.xlu0 %v2352_v22  ;;  %v2357_v36 = vshll.u32 %v2356_v35, 16  ;;  %v9450_v35 = vld [vmem:[#allocation2 + $0x8] sm:$0xff] }
0x16d2   :  { %v2906_v48 = vpop.permute.xlu1 %2905 }
0x16e7   :  { %2915 = vrot.lane.b32.xlu0 %v9326_v39, %s8799_s3 }
0x1716   :  { %v2676_v26 = vpop.f32.mrb[32].mxu1 }
0x1717   :  { %v7807_v27 = vpop.f32.mrb[33].mxu1 }
0x1718   :  { %v2749_v29 = vpop.f32.mrb[26].mxu0 }
0x1719   :  { %v2754_v32 = vrot.slane %v2749_v29, 7  ;;  %v7812_v34 = vpop.f32.mrb[27].mxu0 }
0x171a   :  { %v9439_v34 = vld [vmem:[%s10099_s4] sm:$0x1] }
0x171b   :  { %v2756_v3 = vsel %vm528_vm2, %v2676_v26, %v2754_v32 }
0x171c   :  { %7822 = vmatmul.mubr.msk.f32.vlgmr.msra.gmra.mrb[34].mxu1 %vm134_vm1, %v2756_v3  ;;  %v9445_v3 = vld [vmem:[#allocation2] sm:$0xff] }
0x171d   :  { %8314 = vmatpush3.bf16.msra.mxu1 %v8971_v11  ;;  %7852 = vmatprep.mubr.msk.f32.mxu1 %vm8796_vm0, %v8797_v1 }
0x171e   :  { %8315 = vmatprep.subr.bf16.mxu1 %v8795_v0 }
0x1721   :  { %8317 = vmatpush3.bf16.msra.mxu1 %v8988_v15 }
0x1722   :  { %7860 = vmatprep.subr.mxu1 %v8797_v1 }
0x175e   :  { %v2354_v39 = vpop.xlane.xlu0 %2353 }
0x175f   :  { %v2355_v38 = vcvt.f32.s32 %v2354_v39 }
0x1761   :  { %v2358_v40 = vadd.s32 %v2357_v36, %v2355_v38 }
0x1762   :  { %v2916_v16 = vpop.permute.xlu0 %2915 }
0x1763   :  { %vm2359_vm9 = vcmp.eq.s32.totalorder %v9069_v61, %v2358_v40 }
0x1764   :  { %v7196_v41 = vsel %vm2359_vm9, 1.0, %v8797_v1 }
0x1765   :  { %7831 = vmatmul.mubr.msk.f32.vlgmr.msra.gmra.mrb[28].mxu0 %vm767_vm7, %v7196_v41 }
0x1766   :  { %8308 = vmatpush3.bf16.msra.mxu0 %v9110_v42  ;;  %7841 = vmatprep.mubr.msk.f32.mxu0 %vm8796_vm0, %v8797_v1 }
0x1767   :  { %8309 = vmatprep.subr.bf16.mxu0 %v8795_v0 }
0x176a   :  { %8311 = vmatpush3.bf16.msra.mxu0 %v9116_v44 }
0x176b   :  { %7855 = vmatprep.subr.mxu0 %v8797_v1 }
0x17ef   :  { %v2826_v43 = vpop.f32.mrb[34].mxu1 }
0x17f0   :  { %v7823_v45 = vpop.f32.mrb[35].mxu1 }
0x1838   :  { %v2899_v46 = vpop.f32.mrb[28].mxu0 }
0x1839   :  { %v2900_v51 = vadd.f32 %v2899_v46, %v2826_v43  ;;  %v7832_v23 = vpop.f32.mrb[29].mxu0 }
0x183b   :  { %v2903_v47 = vadd.f32 %v9097_v18, %v2900_v51 }
0x183d   :  { %v2908_v49 = vadd.f32 %v2906_v48, %v2903_v47 }
0x183f   :  { %v7208_v50 = vmul.f32 -1.442695, %v2908_v49 }
0x1841   :  { %8503 = vpow2.f32 %v7208_v50 }
0x184b   :  { %v8504_v37 = vpop.eup %8503 }
0x184c   :  { %v2912_v10 = vadd.f32 1.0, %v8504_v37 }
0x184e   :  { %8505 = vrcp.f32 %v2912_v10 }
0x1858   :  { %v8506_v52 = vpop.eup %8505 }
0x1859   :  { %v2918_v12 = vmul.f32 %v8506_v52, %v2916_v16  ;;  %v2925_v58 = vsub.f32 1.0, %v8506_v52  ;;  %v2931_v62 = vmul.f32 %v8506_v52, %v9315_v31  ;;  %v9421_v31 = vld [vmem:[%s10101_s6] ss:$0 sm:$0xff] }
0x185b   :  { %2920 = vrot.lane.b32.xlu1 %v2918_v12, %s8800_s20 }
0x18cd   :  { %v2921_v53 = vpop.permute.xlu1 %2920 }
0x18ce   :  { %v2923_v55 = vadd.f32 %v2921_v53, %v2903_v47 }
0x18d0   :  { %8507 = vtanh.f32 %v2923_v55 }
0x18da   :  { %v8508_v56 = vpop.eup %8507 }
0x18db   :  { %2927 = vrot.lane.b32.xlu1 %v8508_v56, %s8798_s25 }
0x194d   :  { %v2928_v18 = vpop.permute.xlu1 %2927 }
0x194e   :  { %v2930_v63 = vmul.f32 %v2928_v18, %v2925_v58  ;;  %v9487_v58 = vld [vmem:[#allocation5 + $0x10] sm:$0xf] }
0x1950   :  { %v9408_v4 = vadd.f32 %v2931_v62, %v2930_v63 }
0x1952   :  { %2934 = vrot.lane.b32.xlu0 %v9408_v4, %s8798_s25 }
0x19c4   :  { %v2935_v5 = vpop.permute.xlu0 %2934 }
0x19c5   :  { %7842 = vmatmul.mubr.msk.f32.vlgmr.msra.gmra.mrb[30].mxu0 %vm134_vm1, %v2935_v5  ;;  %7853 = vmatmul.mubr.msk.f32.vlgmr.msra.gmra.mrb[36].mxu1 %vm134_vm1, %v2935_v5 }
0x19c6   :  { %7862 = vmatprep.mubr.msk.f32.mxu1 %vm8796_vm0, %v8797_v1  ;;  %7857 = vmatprep.mubr.msk.f32.mxu0 %vm8796_vm0, %v8797_v1 }
0x1a98   :  { %v3004_v6 = vpop.f32.mrb[30].mxu0  ;;  %v3109_v8 = vpop.f32.mrb[36].mxu1 }
0x1a99   :  { %v9424_v13 = vadd.f32 %v9421_v31, %v3109_v8  ;;  %v7843_v14 = vpop.f32.mrb[31].mxu0  ;;  %v7854_v20 = vpop.f32.mrb[37].mxu1  ;;  %v9460_v48 = vadd.f32 %v9162_v9, %v3004_v6 }
0x1a9b   :  { %v3116_v21 = vrot.slane %v9424_v13, %v9012_v24  ;;  %v3195_v22 = vrot.slane %v9424_v13, %v9014_v25  ;;  %v3008_v50 = vsel %vm965_vm8, %v9460_v48, -inf }
0x1a9d   :  { %v3117_v26 = vadd.f32 %v3116_v21, %v9020_v30  ;;  %v3196_v27 = vadd.f32 %v3195_v22, %v9024_v33 }
0x1a9f   :  { %8509 = vtanh.f32 %v3117_v26 }
0x1aa0   :  { %8511 = vtanh.f32 %v3196_v27 }
0x1aa9   :  { %v8510_v29 = vpop.eup %8509 }
0x1aaa   :  { %v8512_v32 = vpop.eup %8511  ;;  %7856 = vmatpush3.xpose.msk.msra.mxu0 %vm134_vm1, %v8510_v29 }
0x1aab   :  { %7861 = vmatpush3.xpose.msk.msra.mxu1 %vm134_vm1, %v8512_v32  ;;  %7865 = vmatprep.subr.mxu0 %v8797_v1 }
0x1aac   :  { %7870 = vmatprep.subr.mxu1 %v8797_v1 }
0x1aad   :  { %7858 = vmatmul.mubr.msk.f32.vlgmr.msra.gmra.mrb[32].mxu0 %vm134_vm1, %v9439_v34 }
0x1aae   :  { %7863 = vmatmul.mubr.msk.f32.vlgmr.msra.gmra.mrb[38].mxu1 %vm134_vm1, %v9439_v34  ;;  %7866 = vmatpush3.msra.mxu0 %v9445_v3 }
0x1aaf   :  { %7867 = vmatprep.mubr.msk.f32.mxu0 %vm8796_vm0, %v8797_v1  ;;  %7871 = vmatpush3.msra.mxu1 %v9450_v35 }
0x1ab0   :  { %7872 = vmatprep.mubr.msk.f32.mxu1 %vm8796_vm0, %v8797_v1  ;;  %8318 = vmatprep.subr.bf16.mxu0 %v8795_v0 }
0x1ab1   :  { %8324 = vmatprep.subr.bf16.mxu1 %v8795_v0 }
0x1b80   :  { %v3188_v39 = vpop.f32.mrb[32].mxu0 }
0x1b81   :  { %v3267_v36 = vpop.f32.mrb[38].mxu1  ;;  %v7859_v38 = vpop.f32.mrb[33].mxu0 }
0x1b82   :  { %v3272_v40 = vrot.slane %v3267_v36, 7  ;;  %v7864_v41 = vpop.f32.mrb[39].mxu1 }
0x1b84   :  { %v3274_v43 = vsel %vm528_vm2, %v3188_v39, %v3272_v40 }
0x1b85   :  { %v3275_v45 = vsel %vm530_vm3, %v3274_v43, -inf }
0x1b86   :  { %3276 = vmax.xlane.f32.xlu1 %v3275_v45  ;;  %v9513_v45 = vld [vmem:[#allocation8] ss:$0 sm:$0xff] }
0x1c13   :  { %v3277_v46 = vpop.xlane.xlu1 %3276 }
0x1c14   :  { %v3278_v51 = vsub.f32 %v3274_v43, %v3277_v46 }
0x1c16   :  { %v3279_v23 = vmul.f32 1.442695, %v3278_v51 }
0x1c18   :  { %8513 = vpow2.f32 %v3279_v23 }
0x1c22   :  { %v8514_v47 = vpop.eup %8513 }
0x1c23   :  { %v3281_v49 = vsel %vm530_vm3, %v8514_v47, 0.0 }
0x1c24   :  { %3282 = vadd.xlane.f32.xlu0 %v3281_v49 }
0x1c28   :  { %3009 = vmax.xlane.f32.xlu0 %v3008_v50 }
0x1cb1   :  { %v3283_v37 = vpop.xlane.xlu0 %3282 }
0x1cb2   :  { %8515 = vrcp.f32 %v3283_v37 }
0x1cb5   :  { %v9465_v10 = vpop.xlane.xlu0 %3009 }
0x1cb6   :  { %vm3023_vm10 = vcmp.eq.f32.partialorder %v9460_v48, %v9465_v10 }
0x1cb7   :  { %v3024_v52 = vsel %vm3023_vm10, %v9069_v61, 20 }
0x1cb8   :  { %v3025_v16 = vsel %vm965_vm8, %v3024_v52, 2147483647 }
0x1cb9   :  { %v3027_v9 = vshra.s32 %v3025_v16, 16  ;;  %v3026_v18 = vand.u32 65535, %v3025_v16 }
0x1cbb   :  { %v3029_v12 = vcvt.s32.f32 %v3027_v9  ;;  %v3028_v63 = vcvt.s32.f32 %v3026_v18 }
0x1cbc   :  { %v8516_v53 = vpop.eup %8515 }
0x1cbd   :  { %v3285_v55 = vmul.f32 %v8516_v53, %v8514_v47  ;;  %3030 = vmin.xlane.f32.xlu1 %v3029_v12 }
0x1cbf   :  { %7216 = vst.msk [vmem:[%s10108_s13 + $0x8] sm:$0x3] %vm530_vm3, %v3285_v55  ;;  %7868 = vmatmul.mubr.msk.f32.vlgmr.msra.gmra.mrb[34].mxu0 %vm543_vm4, %v3285_v55  ;;  %v3361_v56 = vrot.slane %v3285_v55, 1 }
0x1cc0   :  { %8320 = vmatpush3.bf16.msra.mxu0 %v9064_v57  ;;  %7883 = vmatprep.mubr.msk.f32.mxu0 %vm8796_vm0, %v8797_v1 }
0x1cc1   :  { %7873 = vmatmul.mubr.msk.f32.vlgmr.msra.gmra.mrb[40].mxu1 %vm543_vm4, %v3361_v56  ;;  %8321 = vmatprep.subr.bf16.mxu0 %v8795_v0 }
0x1cc2   :  { %8326 = vmatpush3.bf16.msra.mxu1 %v9066_v60  ;;  %7892 = vmatprep.mubr.msk.f32.mxu1 %vm8796_vm0, %v8797_v1 }
0x1cc3   :  { %7890 = vmatprep.subr.mxu1 %v8797_v1 }
0x1cc4   :  { %8323 = vmatpush3.bf16.msra.mxu0 %v9074_v2 }
0x1cc5   :  { %8333 = vmatprep.subr.bf16.mxu0 %v8795_v0 }
0x1cc6   :  { %7891 = vmatpush3.msk.msra.mxu1 %vm771_vm5, %v9487_v58 }
0x1cc7   :  { %8327 = vmatprep.subr.bf16.mxu1 %v8795_v0 }
0x1cce   :  { %3586 = vrot.lane.b32.xlu1 %v9424_v13, %s8798_s25 }
0x1d4a   :  { %v3031_v62 = vpop.xlane.xlu1 %3030 }
0x1d4b   :  { %vm3032_vm11 = vcmp.eq.f32.partialorder %v3029_v12, %v3031_v62 }
0x1d4c   :  { %v3033_v5 = vsel %vm3032_vm11, %v3028_v63, inf }
0x1d4d   :  { %3034 = vmin.xlane.f32.xlu0 %v3033_v5 }
0x1d4e   :  { %v3587_v51 = vpop.permute.xlu1 %3586 }
0x1d63   :  { %3596 = vrot.lane.b32.xlu0 %v9424_v13, %s8799_s3  ;;  %v3037_v13 = vcvt.f32.s32 %v3031_v62 }
0x1d65   :  { %v3038_v27 = vshll.u32 %v3037_v13, 16 }
0x1d92   :  { %v3357_v6 = vpop.f32.mrb[34].mxu0 }
0x1d93   :  { %v7869_v8 = vpop.f32.mrb[35].mxu0 }
0x1d94   :  { %v3430_v14 = vpop.f32.mrb[40].mxu1 }
0x1d95   :  { %v3435_v20 = vrot.slane %v3430_v14, 7  ;;  %v7874_v21 = vpop.f32.mrb[41].mxu1 }
0x1d97   :  { %v3437_v22 = vsel %vm528_vm2, %v3357_v6, %v3435_v20 }
0x1d98   :  { %7884 = vmatmul.mubr.msk.f32.vlgmr.msra.gmra.mrb[36].mxu0 %vm134_vm1, %v3437_v22 }
0x1d99   :  { %8335 = vmatpush3.bf16.msra.mxu0 %v8971_v11  ;;  %7914 = vmatprep.mubr.msk.f32.mxu0 %vm8796_vm0, %v8797_v1 }
0x1d9a   :  { %8336 = vmatprep.subr.bf16.mxu0 %v8795_v0 }
0x1d9d   :  { %8338 = vmatpush3.bf16.msra.mxu0 %v8988_v15 }
0x1d9e   :  { %7922 = vmatprep.subr.mxu0 %v8797_v1 }
0x1dda   :  { %v3035_v26 = vpop.xlane.xlu0 %3034 }
0x1ddb   :  { %v3036_v29 = vcvt.f32.s32 %v3035_v26 }
0x1ddd   :  { %v3039_v32 = vadd.s32 %v3038_v27, %v3036_v29 }
0x1dde   :  { %v3597_v52 = vpop.permute.xlu0 %3596 }
0x1ddf   :  { %vm3040_vm12 = vcmp.eq.s32.totalorder %v9069_v61, %v3039_v32 }
0x1de0   :  { %v7210_v39 = vsel %vm3040_vm12, 1.0, %v8797_v1 }
0x1de1   :  { %7893 = vmatmul.mubr.msk.f32.vlgmr.msra.gmra.mrb[42].mxu1 %vm767_vm7, %v7210_v39 }
0x1de2   :  { %8329 = vmatpush3.bf16.msra.mxu1 %v9110_v42  ;;  %7903 = vmatprep.mubr.msk.f32.mxu1 %vm8796_vm0, %v8797_v1 }
0x1de3   :  { %8330 = vmatprep.subr.bf16.mxu1 %v8795_v0 }
0x1de6   :  { %8332 = vmatpush3.bf16.msra.mxu1 %v9116_v44 }
0x1de7   :  { %7917 = vmatprep.subr.mxu1 %v8797_v1 }
0x1e6b   :  { %v3507_v36 = vpop.f32.mrb[36].mxu0 }
0x1e6c   :  { %v7885_v38 = vpop.f32.mrb[37].mxu0 }
0x1eb4   :  { %v3580_v40 = vpop.f32.mrb[42].mxu1 }
0x1eb5   :  { %v3581_v41 = vadd.f32 %v3580_v40, %v3507_v36  ;;  %v7894_v43 = vpop.f32.mrb[43].mxu1 }
0x1eb7   :  { %v3584_v46 = vadd.f32 %v9513_v45, %v3581_v41 }
0x1eb9   :  { %v3589_v23 = vadd.f32 %v3587_v51, %v3584_v46 }
0x1ebb   :  { %v7222_v47 = vmul.f32 -1.442695, %v3589_v23 }
0x1ebd   :  { %8517 = vpow2.f32 %v7222_v47 }
0x1ec7   :  { %v8518_v49 = vpop.eup %8517 }
0x1ec8   :  { %v3593_v50 = vadd.f32 1.0, %v8518_v49  ;;  %v9559_v49 = vld [vmem:[%s10106_s11] ss:$0 sm:$0xff] }
0x1eca   :  { %8519 = vrcp.f32 %v3593_v50 }
0x1ed4   :  { %v8520_v37 = vpop.eup %8519 }
0x1ed5   :  { %v3599_v16 = vmul.f32 %v8520_v37, %v3597_v52  ;;  %v3606_v55 = vsub.f32 1.0, %v8520_v37  ;;  %v3612_v18 = vmul.f32 %v8520_v37, %v9408_v4 }
0x1ed7   :  { %3601 = vrot.lane.b32.xlu1 %v3599_v16, %s8800_s20 }
0x1f49   :  { %v3602_v9 = vpop.permute.xlu1 %3601 }
0x1f4a   :  { %v3604_v12 = vadd.f32 %v3602_v9, %v3584_v46 }
0x1f4c   :  { %8521 = vtanh.f32 %v3604_v12 }
0x1f56   :  { %v8522_v53 = vpop.eup %8521 }
0x1f57   :  { %3608 = vrot.lane.b32.xlu1 %v8522_v53, %s8798_s25 }
0x1fc9   :  { %v3609_v56 = vpop.permute.xlu1 %3608 }
0x1fca   :  { %v3611_v62 = vmul.f32 %v3609_v56, %v3606_v55 }
0x1fcc   :  { %v9519_v63 = vadd.f32 %v3612_v18, %v3611_v62 }
0x1fce   :  { %3615 = vrot.lane.b32.xlu0 %v9519_v63, %s8798_s25 }
0x2040   :  { %v3616_v5 = vpop.permute.xlu0 %3615 }
0x2041   :  { %7904 = vmatmul.mubr.msk.f32.vlgmr.msra.gmra.mrb[44].mxu1 %vm134_vm1, %v3616_v5  ;;  %7915 = vmatmul.mubr.msk.f32.vlgmr.msra.gmra.mrb[38].mxu0 %vm134_vm1, %v3616_v5 }
0x2042   :  { %7924 = vmatprep.mubr.msk.f32.mxu0 %vm8796_vm0, %v8797_v1  ;;  %7919 = vmatprep.mubr.msk.f32.mxu1 %vm8796_vm0, %v8797_v1 }
0x2114   :  { %v3685_v6 = vpop.f32.mrb[44].mxu1  ;;  %v3790_v8 = vpop.f32.mrb[38].mxu0 }
0x2115   :  { %v9530_v4 = vadd.f32 %v9421_v31, %v3790_v8  ;;  %v7905_v14 = vpop.f32.mrb[45].mxu1  ;;  %v7916_v20 = vpop.f32.mrb[39].mxu0  ;;  %v9562_v50 = vadd.f32 %v9559_v49, %v3685_v6 }
0x2117   :  { %v3797_v21 = vrot.slane %v9530_v4, %v9012_v24  ;;  %v3876_v22 = vrot.slane %v9530_v4, %v9014_v25  ;;  %v3689_v52 = vsel %vm965_vm8, %v9562_v50, -inf }
0x2119   :  { %v3798_v13 = vadd.f32 %v3797_v21, %v9020_v30  ;;  %v3877_v26 = vadd.f32 %v3876_v22, %v9024_v33 }
0x211b   :  { %8523 = vtanh.f32 %v3798_v13 }
0x211c   :  { %8525 = vtanh.f32 %v3877_v26 }
0x2125   :  { %v8524_v27 = vpop.eup %8523 }
0x2126   :  { %v8526_v29 = vpop.eup %8525  ;;  %7918 = vmatpush3.xpose.msk.msra.mxu1 %vm134_vm1, %v8524_v27 }
0x2127   :  { %7923 = vmatpush3.xpose.msk.msra.mxu0 %vm134_vm1, %v8526_v29  ;;  %7927 = vmatprep.subr.mxu1 %v8797_v1 }
0x2128   :  { %7932 = vmatprep.subr.mxu0 %v8797_v1 }
0x2129   :  { %7920 = vmatmul.mubr.msk.f32.vlgmr.msra.gmra.mrb[46].mxu1 %vm134_vm1, %v9439_v34 }
0x212a   :  { %7925 = vmatmul.mubr.msk.f32.vlgmr.msra.gmra.mrb[40].mxu0 %vm134_vm1, %v9439_v34  ;;  %7928 = vmatpush3.msra.mxu1 %v9445_v3 }
0x212b   :  { %7929 = vmatprep.mubr.msk.f32.mxu1 %vm8796_vm0, %v8797_v1  ;;  %7933 = vmatpush3.msra.mxu0 %v9450_v35 }
0x212c   :  { %7934 = vmatprep.mubr.msk.f32.mxu0 %vm8796_vm0, %v8797_v1  ;;  %8339 = vmatprep.subr.bf16.mxu1 %v8795_v0 }
0x212d   :  { %8345 = vmatprep.subr.bf16.mxu0 %v8795_v0 }
0x21fc   :  { %v3869_v32 = vpop.f32.mrb[46].mxu1 }
0x21fd   :  { %v3948_v39 = vpop.f32.mrb[40].mxu0  ;;  %v7921_v36 = vpop.f32.mrb[47].mxu1 }
0x21fe   :  { %v3953_v38 = vrot.slane %v3948_v39, 7  ;;  %v7926_v40 = vpop.f32.mrb[41].mxu0 }
0x2200   :  { %v3955_v41 = vsel %vm528_vm2, %v3869_v32, %v3953_v38 }
0x2201   :  { %v3956_v43 = vsel %vm530_vm3, %v3955_v41, -inf }
0x2202   :  { %3957 = vmax.xlane.f32.xlu1 %v3956_v43 }
0x228f   :  { %v3958_v46 = vpop.xlane.xlu1 %3957 }
0x2290   :  { %v3959_v51 = vsub.f32 %v3955_v41, %v3958_v46 }
0x2292   :  { %v3960_v23 = vmul.f32 1.442695, %v3959_v51 }
0x2294   :  { %8527 = vpow2.f32 %v3960_v23 }
0x229e   :  { %v8528_v47 = vpop.eup %8527 }
0x229f   :  { %v3962_v37 = vsel %vm530_vm3, %v8528_v47, 0.0 }
0x22a0   :  { %3963 = vadd.xlane.f32.xlu0 %v3962_v37 }
0x22a4   :  { %3690 = vmax.xlane.f32.xlu0 %v3689_v52 }
0x232d   :  { %v3964_v16 = vpop.xlane.xlu0 %3963 }
0x232e   :  { %8529 = vrcp.f32 %v3964_v16 }
0x2331   :  { %v9567_v9 = vpop.xlane.xlu0 %3690 }
0x2332   :  { %vm3704_vm13 = vcmp.eq.f32.partialorder %v9562_v50, %v9567_v9 }
0x2333   :  { %v3705_v12 = vsel %vm3704_vm13, %v9069_v61, 20 }
0x2334   :  { %v3706_v53 = vsel %vm965_vm8, %v3705_v12, 2147483647 }
0x2335   :  { %v3708_v55 = vshra.s32 %v3706_v53, 16  ;;  %v3707_v6 = vand.u32 65535, %v3706_v53 }
0x2337   :  { %v3710_v56 = vcvt.s32.f32 %v3708_v55  ;;  %v3709_v14 = vcvt.s32.f32 %v3707_v6 }
0x2338   :  { %v8530_v18 = vpop.eup %8529 }
0x2339   :  { %v3966_v62 = vmul.f32 %v8530_v18, %v8528_v47  ;;  %3711 = vmin.xlane.f32.xlu1 %v3710_v56 }
0x233b   :  { %7230 = vst.msk [vmem:[%s10108_s13 + $0xa] sm:$0x3] %vm530_vm3, %v3966_v62  ;;  %7930 = vmatmul.mubr.msk.f32.vlgmr.msra.gmra.mrb[48].mxu1 %vm543_vm4, %v3966_v62  ;;  %v4042_v5 = vrot.slane %v3966_v62, 1 }
0x233c   :  { %8341 = vmatpush3.bf16.msra.mxu1 %v9064_v57  ;;  %7945 = vmatprep.mubr.msk.f32.mxu1 %vm8796_vm0, %v8797_v1 }
0x233d   :  { %7935 = vmatmul.mubr.msk.f32.vlgmr.msra.gmra.mrb[42].mxu0 %vm543_vm4, %v4042_v5  ;;  %8342 = vmatprep.subr.bf16.mxu1 %v8795_v0 }
0x233e   :  { %8347 = vmatpush3.bf16.msra.mxu0 %v9066_v60  ;;  %7954 = vmatprep.mubr.msk.f32.mxu0 %vm8796_vm0, %v8797_v1 }
0x233f   :  { %7952 = vmatprep.subr.mxu0 %v8797_v1 }
0x2340   :  { %8344 = vmatpush3.bf16.msra.mxu1 %v9074_v2 }
0x2341   :  { %8354 = vmatprep.subr.bf16.mxu1 %v8795_v0 }
0x2342   :  { %7953 = vmatpush3.msk.msra.mxu0 %vm771_vm5, %v9487_v58 }
0x2343   :  { %8348 = vmatprep.subr.bf16.mxu0 %v8795_v0 }
0x234a   :  { %4267 = vrot.lane.b32.xlu1 %v9530_v4, %s8798_s25 }
0x23c6   :  { %v3712_v8 = vpop.xlane.xlu1 %3711 }
0x23c7   :  { %vm3713_vm14 = vcmp.eq.f32.partialorder %v3710_v56, %v3712_v8 }
0x23c8   :  { %v3714_v20 = vsel %vm3713_vm14, %v3709_v14, inf }
0x23c9   :  { %3715 = vmin.xlane.f32.xlu0 %v3714_v20 }
0x23ca   :  { %v4268_v37 = vpop.permute.xlu1 %4267 }
0x23df   :  { %4277 = vrot.lane.b32.xlu0 %v9530_v4, %s8799_s3  ;;  %v3718_v4 = vcvt.f32.s32 %v3712_v8 }
0x23e1   :  { %v3719_v39 = vshll.u32 %v3718_v4, 16 }
0x240e   :  { %v4038_v21 = vpop.f32.mrb[48].mxu1 }
0x240f   :  { %v7931_v22 = vpop.f32.mrb[49].mxu1 }
0x2410   :  { %v4111_v13 = vpop.f32.mrb[42].mxu0 }
0x2411   :  { %v4116_v26 = vrot.slane %v4111_v13, 7  ;;  %v7936_v27 = vpop.f32.mrb[43].mxu0 }
0x2413   :  { %v4118_v29 = vsel %vm528_vm2, %v4038_v21, %v4116_v26 }
0x2414   :  { %7946 = vmatmul.mubr.msk.f32.vlgmr.msra.gmra.mrb[50].mxu1 %vm134_vm1, %v4118_v29 }
0x2415   :  { %8356 = vmatpush3.bf16.msra.mxu1 %v8971_v11  ;;  %7976 = vmatprep.mubr.msk.f32.mxu1 %vm8796_vm0, %v8797_v1 }
0x2416   :  { %8357 = vmatprep.subr.bf16.mxu1 %v8795_v0 }
0x2419   :  { %8359 = vmatpush3.bf16.msra.mxu1 %v8988_v15 }
0x241a   :  { %7984 = vmatprep.subr.mxu1 %v8797_v1 }
0x2456   :  { %v3716_v32 = vpop.xlane.xlu0 %3715 }
0x2457   :  { %v3717_v36 = vcvt.f32.s32 %v3716_v32 }
0x2459   :  { %v3720_v38 = vadd.s32 %v3719_v39, %v3717_v36 }
0x245a   :  { %v4278_v56 = vpop.permute.xlu0 %4277 }
0x245b   :  { %vm3721_vm15 = vcmp.eq.s32.totalorder %v9069_v61, %v3720_v38 }
0x245c   :  { %v7224_v40 = vsel %vm3721_vm15, 1.0, %v8797_v1 }
0x245d   :  { %7955 = vmatmul.mubr.msk.f32.vlgmr.msra.gmra.mrb[44].mxu0 %vm767_vm7, %v7224_v40 }
0x245e   :  { %8350 = vmatpush3.bf16.msra.mxu0 %v9110_v42  ;;  %7965 = vmatprep.mubr.msk.f32.mxu0 %vm8796_vm0, %v8797_v1 }
0x245f   :  { %8351 = vmatprep.subr.bf16.mxu0 %v8795_v0 }
0x2462   :  { %8353 = vmatpush3.bf16.msra.mxu0 %v9116_v44 }
0x2463   :  { %7979 = vmatprep.subr.mxu0 %v8797_v1 }
0x24e7   :  { %v4188_v41 = vpop.f32.mrb[50].mxu1 }
0x24e8   :  { %v7947_v43 = vpop.f32.mrb[51].mxu1 }
0x2530   :  { %v4261_v46 = vpop.f32.mrb[44].mxu0 }
0x2531   :  { %v4262_v51 = vadd.f32 %v4261_v46, %v4188_v41  ;;  %v7956_v23 = vpop.f32.mrb[45].mxu0 }
0x2533   :  { %v4265_v47 = vadd.f32 %v9513_v45, %v4262_v51 }
0x2535   :  { %v4270_v52 = vadd.f32 %v4268_v37, %v4265_v47 }
0x2537   :  { %v7236_v16 = vmul.f32 -1.442695, %v4270_v52 }
0x2539   :  { %8531 = vpow2.f32 %v7236_v16 }
0x2543   :  { %v8532_v12 = vpop.eup %8531 }
0x2544   :  { %v4274_v53 = vadd.f32 1.0, %v8532_v12 }
0x2546   :  { %8533 = vrcp.f32 %v4274_v53 }
0x2550   :  { %v8534_v55 = vpop.eup %8533 }
0x2551   :  { %v4280_v18 = vmul.f32 %v8534_v55, %v4278_v56  ;;  %v4287_v8 = vsub.f32 1.0, %v8534_v55  ;;  %v4293_v20 = vmul.f32 %v8534_v55, %v9519_v63 }
0x2553   :  { %4282 = vrot.lane.b32.xlu1 %v4280_v18, %s8800_s20 }
0x25c5   :  { %v4283_v62 = vpop.permute.xlu1 %4282 }
0x25c6   :  { %v4285_v5 = vadd.f32 %v4283_v62, %v4265_v47 }
0x25c8   :  { %8535 = vtanh.f32 %v4285_v5 }
0x25d2   :  { %v8536_v6 = vpop.eup %8535 }
0x25d3   :  { %4289 = vrot.lane.b32.xlu1 %v8536_v6, %s8798_s25 }
0x2645   :  { %v4290_v14 = vpop.permute.xlu1 %4289 }
0x2646   :  { %v4292_v21 = vmul.f32 %v4290_v14, %v4287_v8 }
0x2648   :  { %v9617_v22 = vadd.f32 %v4293_v20, %v4292_v21 }
0x264a   :  { %4296 = vrot.lane.b32.xlu0 %v9617_v22, %s8798_s25 }
0x26bc   :  { %v4297_v13 = vpop.permute.xlu0 %4296 }
0x26bd   :  { %7966 = vmatmul.mubr.msk.f32.vlgmr.msra.gmra.mrb[46].mxu0 %vm134_vm1, %v4297_v13  ;;  %7977 = vmatmul.mubr.msk.f32.vlgmr.msra.gmra.mrb[52].mxu1 %vm134_vm1, %v4297_v13 }
0x26be   :  { %7986 = vmatprep.mubr.msk.f32.mxu1 %vm8796_vm0, %v8797_v1  ;;  %7981 = vmatprep.mubr.msk.f32.mxu0 %vm8796_vm0, %v8797_v1 }
0x2790   :  { %v4366_v26 = vpop.f32.mrb[46].mxu0  ;;  %v4471_v27 = vpop.f32.mrb[52].mxu1 }
0x2791   :  { %v9628_v63 = vadd.f32 %v9421_v31, %v4471_v27  ;;  %v7967_v29 = vpop.f32.mrb[47].mxu0  ;;  %v7978_v4 = vpop.f32.mrb[53].mxu1  ;;  %v9655_v56 = vadd.f32 %v9559_v49, %v4366_v26 }
0x2793   :  { %v4478_v32 = vrot.slane %v9628_v63, %v9012_v24  ;;  %v4557_v39 = vrot.slane %v9628_v63, %v9014_v25  ;;  %v4370_v62 = vsel %vm965_vm8, %v9655_v56, -inf }
0x2795   :  { %v4479_v36 = vadd.f32 %v4478_v32, %v9020_v30  ;;  %v4558_v38 = vadd.f32 %v4557_v39, %v9024_v33 }
0x2797   :  { %8537 = vtanh.f32 %v4479_v36 }
0x2798   :  { %8539 = vtanh.f32 %v4558_v38 }
0x27a1   :  { %v8538_v40 = vpop.eup %8537 }
0x27a2   :  { %v8540_v41 = vpop.eup %8539  ;;  %7980 = vmatpush3.xpose.msk.msra.mxu0 %vm134_vm1, %v8538_v40 }
0x27a3   :  { %7985 = vmatpush3.xpose.msk.msra.mxu1 %vm134_vm1, %v8540_v41  ;;  %7989 = vmatprep.subr.mxu0 %v8797_v1 }
0x27a4   :  { %7994 = vmatprep.subr.mxu1 %v8797_v1 }
0x27a5   :  { %7982 = vmatmul.mubr.msk.f32.vlgmr.msra.gmra.mrb[48].mxu0 %vm134_vm1, %v9439_v34 }
0x27a6   :  { %7987 = vmatmul.mubr.msk.f32.vlgmr.msra.gmra.mrb[54].mxu1 %vm134_vm1, %v9439_v34  ;;  %7990 = vmatpush3.msra.mxu0 %v9445_v3 }
0x27a7   :  { %7991 = vmatprep.mubr.msk.f32.mxu0 %vm8796_vm0, %v8797_v1  ;;  %7995 = vmatpush3.msra.mxu1 %v9450_v35 }
0x27a8   :  { %7996 = vmatprep.mubr.msk.f32.mxu1 %vm8796_vm0, %v8797_v1  ;;  %8360 = vmatprep.subr.bf16.mxu0 %v8795_v0 }
0x27a9   :  { %8366 = vmatprep.subr.bf16.mxu1 %v8795_v0 }
0x2878   :  { %v4550_v43 = vpop.f32.mrb[48].mxu0 }
0x2879   :  { %v4629_v46 = vpop.f32.mrb[54].mxu1  ;;  %v7983_v51 = vpop.f32.mrb[49].mxu0 }
0x287a   :  { %v4634_v23 = vrot.slane %v4629_v46, 7  ;;  %v7988_v47 = vpop.f32.mrb[55].mxu1 }
0x287c   :  { %v4636_v37 = vsel %vm528_vm2, %v4550_v43, %v4634_v23 }
0x287d   :  { %v4637_v52 = vsel %vm530_vm3, %v4636_v37, -inf }
0x287e   :  { %4638 = vmax.xlane.f32.xlu1 %v4637_v52 }
0x290b   :  { %v4639_v16 = vpop.xlane.xlu1 %4638 }
0x290c   :  { %v4640_v12 = vsub.f32 %v4636_v37, %v4639_v16 }
0x290e   :  { %v4641_v53 = vmul.f32 1.442695, %v4640_v12 }
0x2910   :  { %8541 = vpow2.f32 %v4641_v53 }
0x291a   :  { %v8542_v55 = vpop.eup %8541 }
0x291b   :  { %v4643_v18 = vsel %vm530_vm3, %v8542_v55, 0.0 }
0x291c   :  { %4644 = vadd.xlane.f32.xlu0 %v4643_v18 }
0x2920   :  { %4371 = vmax.xlane.f32.xlu0 %v4370_v62 }
0x29a9   :  { %v4645_v5 = vpop.xlane.xlu0 %4644 }
0x29aa   :  { %8543 = vrcp.f32 %v4645_v5 }
0x29ad   :  { %v9660_v6 = vpop.xlane.xlu0 %4371 }
0x29ae   :  { %vm4385_vm6 = vcmp.eq.f32.partialorder %v9655_v56, %v9660_v6 }
0x29af   :  { %v4386_v8 = vsel %vm4385_vm6, %v9069_v61, 20 }
0x29b0   :  { %v4387_v14 = vsel %vm965_vm8, %v4386_v8, 2147483647 }
0x29b1   :  { %v4389_v20 = vshra.s32 %v4387_v14, 16  ;;  %v4388_v29 = vand.u32 65535, %v4387_v14 }
0x29b3   :  { %v4391_v21 = vcvt.s32.f32 %v4389_v20  ;;  %v4390_v32 = vcvt.s32.f32 %v4388_v29 }
0x29b4   :  { %v8544_v13 = vpop.eup %8543 }
0x29b5   :  { %v4647_v26 = vmul.f32 %v8544_v13, %v8542_v55  ;;  %4392 = vmin.xlane.f32.xlu1 %v4391_v21 }
0x29b7   :  { %7244 = vst.msk [vmem:[%s10108_s13 + $0xc] sm:$0x3] %vm530_vm3, %v4647_v26  ;;  %7992 = vmatmul.mubr.msk.f32.vlgmr.msra.gmra.mrb[50].mxu0 %vm543_vm4, %v4647_v26  ;;  %v4723_v27 = vrot.slane %v4647_v26, 1 }
0x29b8   :  { %8362 = vmatpush3.bf16.msra.mxu0 %v9064_v57  ;;  %8007 = vmatprep.mubr.msk.f32.mxu0 %vm8796_vm0, %v8797_v1 }
0x29b9   :  { %7997 = vmatmul.mubr.msk.f32.vlgmr.msra.gmra.mrb[56].mxu1 %vm543_vm4, %v4723_v27  ;;  %8363 = vmatprep.subr.bf16.mxu0 %v8795_v0 }
0x29ba   :  { %8368 = vmatpush3.bf16.msra.mxu1 %v9066_v60  ;;  %8016 = vmatprep.mubr.msk.f32.mxu1 %vm8796_vm0, %v8797_v1 }
0x29bb   :  { %8014 = vmatprep.subr.mxu1 %v8797_v1 }
0x29bc   :  { %8365 = vmatpush3.bf16.msra.mxu0 %v9074_v2 }
0x29bd   :  { %8375 = vmatprep.subr.bf16.mxu0 %v8795_v0 }
0x29be   :  { %8015 = vmatpush3.msk.msra.mxu1 %vm771_vm5, %v9487_v58 }
0x29bf   :  { %8369 = vmatprep.subr.bf16.mxu1 %v8795_v0 }
0x29c6   :  { %4948 = vrot.lane.b32.xlu1 %v9628_v63, %s8798_s25 }
0x2a42   :  { %v4393_v4 = vpop.xlane.xlu1 %4392 }
0x2a43   :  { %vm4394_vm9 = vcmp.eq.f32.partialorder %v4391_v21, %v4393_v4 }
0x2a44   :  { %v4395_v39 = vsel %vm4394_vm9, %v4390_v32, inf }
0x2a45   :  { %4396 = vmin.xlane.f32.xlu0 %v4395_v39 }
0x2a46   :  { %v4949_v5 = vpop.permute.xlu1 %4948 }
0x2a5b   :  { %4958 = vrot.lane.b32.xlu0 %v9628_v63, %s8799_s3  ;;  %v4399_v63 = vcvt.f32.s32 %v4393_v4 }
0x2a5d   :  { %v4400_v23 = vshll.u32 %v4399_v63, 16 }
0x2a8a   :  { %v4719_v36 = vpop.f32.mrb[50].mxu0 }
0x2a8b   :  { %v7993_v38 = vpop.f32.mrb[51].mxu0 }
0x2a8c   :  { %v4792_v40 = vpop.f32.mrb[56].mxu1 }
0x2a8d   :  { %v4797_v41 = vrot.slane %v4792_v40, 7  ;;  %v7998_v43 = vpop.f32.mrb[57].mxu1 }
0x2a8f   :  { %v4799_v46 = vsel %vm528_vm2, %v4719_v36, %v4797_v41 }
0x2a90   :  { %8008 = vmatmul.mubr.msk.f32.vlgmr.msra.gmra.mrb[52].mxu0 %vm134_vm1, %v4799_v46 }
0x2a91   :  { %8377 = vmatpush3.bf16.msra.mxu0 %v8971_v11  ;;  %8038 = vmatprep.mubr.msk.f32.mxu0 %vm8796_vm0, %v8797_v1 }
0x2a92   :  { %8378 = vmatprep.subr.bf16.mxu0 %v8795_v0 }
0x2a95   :  { %8380 = vmatpush3.bf16.msra.mxu0 %v8988_v15 }
0x2a96   :  { %8046 = vmatprep.subr.mxu0 %v8797_v1 }
0x2ad2   :  { %v4397_v51 = vpop.xlane.xlu0 %4396 }
0x2ad3   :  { %v4398_v47 = vcvt.f32.s32 %v4397_v51 }
0x2ad5   :  { %v4401_v37 = vadd.s32 %v4400_v23, %v4398_v47 }
0x2ad6   :  { %v4959_v26 = vpop.permute.xlu0 %4958 }
0x2ad7   :  { %vm4402_vm10 = vcmp.eq.s32.totalorder %v9069_v61, %v4401_v37 }
0x2ad8   :  { %v7238_v52 = vsel %vm4402_vm10, 1.0, %v8797_v1 }
0x2ad9   :  { %8017 = vmatmul.mubr.msk.f32.vlgmr.msra.gmra.mrb[58].mxu1 %vm767_vm7, %v7238_v52 }
0x2ada   :  { %8371 = vmatpush3.bf16.msra.mxu1 %v9110_v42  ;;  %8027 = vmatprep.mubr.msk.f32.mxu1 %vm8796_vm0, %v8797_v1 }
0x2adb   :  { %8372 = vmatprep.subr.bf16.mxu1 %v8795_v0 }
0x2ade   :  { %8374 = vmatpush3.bf16.msra.mxu1 %v9116_v44 }
0x2adf   :  { %8041 = vmatprep.subr.mxu1 %v8797_v1 }
0x2b63   :  { %v4869_v16 = vpop.f32.mrb[52].mxu0 }
0x2b64   :  { %v8009_v12 = vpop.f32.mrb[53].mxu0 }
0x2bac   :  { %v4942_v53 = vpop.f32.mrb[58].mxu1 }
0x2bad   :  { %v4943_v55 = vadd.f32 %v4942_v53, %v4869_v16  ;;  %v8018_v18 = vpop.f32.mrb[59].mxu1 }
0x2baf   :  { %v4946_v62 = vadd.f32 %v9513_v45, %v4943_v55 }
0x2bb1   :  { %v4951_v8 = vadd.f32 %v4949_v5, %v4946_v62 }
0x2bb3   :  { %v7250_v14 = vmul.f32 -1.442695, %v4951_v8 }
0x2bb5   :  { %8545 = vpow2.f32 %v7250_v14 }
0x2bbf   :  { %v8546_v20 = vpop.eup %8545 }
0x2bc0   :  { %v4955_v21 = vadd.f32 1.0, %v8546_v20 }
0x2bc2   :  { %8547 = vrcp.f32 %v4955_v21 }
0x2bcc   :  { %v8548_v13 = vpop.eup %8547 }
0x2bcd   :  { %v4961_v27 = vmul.f32 %v8548_v13, %v4959_v26  ;;  %v4968_v39 = vsub.f32 1.0, %v8548_v13  ;;  %v4974_v38 = vmul.f32 %v8548_v13, %v9617_v22 }
0x2bcf   :  { %4963 = vrot.lane.b32.xlu1 %v4961_v27, %s8800_s20 }
0x2c41   :  { %v4964_v29 = vpop.permute.xlu1 %4963 }
0x2c42   :  { %v4966_v4 = vadd.f32 %v4964_v29, %v4946_v62 }
0x2c44   :  { %8549 = vtanh.f32 %v4966_v4 }
0x2c4e   :  { %v8550_v32 = vpop.eup %8549 }
0x2c4f   :  { %4970 = vrot.lane.b32.xlu1 %v8550_v32, %s8798_s25 }
0x2cc1   :  { %v4971_v36 = vpop.permute.xlu1 %4970 }
0x2cc2   :  { %v4973_v40 = vmul.f32 %v4971_v36, %v4968_v39 }
0x2cc4   :  { %v9710_v41 = vadd.f32 %v4974_v38, %v4973_v40 }
0x2cc6   :  { %4977 = vrot.lane.b32.xlu0 %v9710_v41, %s8798_s25 }
0x2d38   :  { %v4978_v43 = vpop.permute.xlu0 %4977 }
0x2d39   :  { %8028 = vmatmul.mubr.msk.f32.vlgmr.msra.gmra.mrb[60].mxu1 %vm134_vm1, %v4978_v43  ;;  %8039 = vmatmul.mubr.msk.f32.vlgmr.msra.gmra.mrb[54].mxu0 %vm134_vm1, %v4978_v43 }
0x2d3a   :  { %8048 = vmatprep.mubr.msk.f32.mxu0 %vm8796_vm0, %v8797_v1  ;;  %8043 = vmatprep.mubr.msk.f32.mxu1 %vm8796_vm0, %v8797_v1 }
0x2e0c   :  { %v5047_v46 = vpop.f32.mrb[60].mxu1  ;;  %v5152_v63 = vpop.f32.mrb[54].mxu0 }
0x2e0d   :  { %v9721_v22 = vadd.f32 %v9421_v31, %v5152_v63  ;;  %v8029_v51 = vpop.f32.mrb[61].mxu1  ;;  %v8040_v23 = vpop.f32.mrb[55].mxu0  ;;  %v9748_v21 = vadd.f32 %v9559_v49, %v5047_v46 }
0x2e0f   :  { %v5159_v47 = vrot.slane %v9721_v22, %v9012_v24  ;;  %v5238_v37 = vrot.slane %v9721_v22, %v9014_v25  ;;  %v5051_v26 = vsel %vm965_vm8, %v9748_v21, -inf }
0x2e11   :  { %v5160_v52 = vadd.f32 %v5159_v47, %v9020_v30  ;;  %v5239_v16 = vadd.f32 %v5238_v37, %v9024_v33 }
0x2e13   :  { %8551 = vtanh.f32 %v5160_v52 }
0x2e14   :  { %8553 = vtanh.f32 %v5239_v16 }
0x2e1d   :  { %v8552_v12 = vpop.eup %8551 }
0x2e1e   :  { %v8554_v53 = vpop.eup %8553  ;;  %8042 = vmatpush3.xpose.msk.msra.mxu1 %vm134_vm1, %v8552_v12 }
0x2e1f   :  { %8047 = vmatpush3.xpose.msk.msra.mxu0 %vm134_vm1, %v8554_v53  ;;  %8051 = vmatprep.subr.mxu1 %v8797_v1 }
0x2e20   :  { %8056 = vmatprep.subr.mxu0 %v8797_v1 }
0x2e21   :  { %8044 = vmatmul.mubr.msk.f32.vlgmr.msra.gmra.mrb[62].mxu1 %vm134_vm1, %v9439_v34 }
0x2e22   :  { %8049 = vmatmul.mubr.msk.f32.vlgmr.msra.gmra.mrb[56].mxu0 %vm134_vm1, %v9439_v34  ;;  %8052 = vmatpush3.msra.mxu1 %v9445_v3 }
0x2e23   :  { %8053 = vmatprep.mubr.msk.f32.mxu1 %vm8796_vm0, %v8797_v1  ;;  %8057 = vmatpush3.msra.mxu0 %v9450_v35 }
0x2e24   :  { %8058 = vmatprep.mubr.msk.f32.mxu0 %vm8796_vm0, %v8797_v1  ;;  %8381 = vmatprep.subr.bf16.mxu1 %v8795_v0 }
0x2e25   :  { %8387 = vmatprep.subr.bf16.mxu0 %v8795_v0 }
0x2ef4   :  { %v5231_v31 = vpop.f32.mrb[62].mxu1 }
0x2ef5   :  { %v5310_v55 = vpop.f32.mrb[56].mxu0  ;;  %v8045_v18 = vpop.f32.mrb[63].mxu1 }
0x2ef6   :  { %v5315_v62 = vrot.slane %v5310_v55, 7  ;;  %v8050_v5 = vpop.f32.mrb[57].mxu0 }
0x2ef8   :  { %v5317_v34 = vsel %vm528_vm2, %v5231_v31, %v5315_v62 }
0x2ef9   :  { %v5318_v3 = vsel %vm530_vm3, %v5317_v34, -inf }
0x2efa   :  { %5319 = vmax.xlane.f32.xlu1 %v5318_v3 }
0x2f87   :  { %v5320_v8 = vpop.xlane.xlu1 %5319 }
0x2f88   :  { %v5321_v14 = vsub.f32 %v5317_v34, %v5320_v8 }
0x2f8a   :  { %v5322_v35 = vmul.f32 1.442695, %v5321_v14 }
0x2f8c   :  { %8555 = vpow2.f32 %v5322_v35 }
0x2f96   :  { %v8556_v20 = vpop.eup %8555 }
0x2f97   :  { %v5324_v13 = vsel %vm530_vm3, %v8556_v20, 0.0 }
0x2f98   :  { %5325 = vadd.xlane.f32.xlu0 %v5324_v13 }
0x2f9c   :  { %5052 = vmax.xlane.f32.xlu0 %v5051_v26 }
0x3025   :  { %v5326_v27 = vpop.xlane.xlu0 %5325 }
0x3026   :  { %8557 = vrcp.f32 %v5326_v27 }
0x3029   :  { %v9753_v29 = vpop.xlane.xlu0 %5052 }
0x302a   :  { %vm5066_vm11 = vcmp.eq.f32.partialorder %v9748_v21, %v9753_v29 }
0x302b   :  { %v5067_v4 = vsel %vm5066_vm11, %v9069_v61, 20 }
0x302c   :  { %v5068_v32 = vsel %vm965_vm8, %v5067_v4, 2147483647 }
0x302d   :  { %v5070_v39 = vshra.s32 %v5068_v32, 16  ;;  %v5069_v46 = vand.u32 65535, %v5068_v32 }
0x302f   :  { %v5072_v36 = vcvt.s32.f32 %v5070_v39  ;;  %v5071_v51 = vcvt.s32.f32 %v5069_v46 }
0x3030   :  { %v8558_v38 = vpop.eup %8557 }
0x3031   :  { %v5328_v40 = vmul.f32 %v8558_v38, %v8556_v20  ;;  %5073 = vmin.xlane.f32.xlu1 %v5072_v36 }
0x3033   :  { %7258 = vst.msk [vmem:[%s10108_s13 + $0xe] sm:$0x3] %vm530_vm3, %v5328_v40  ;;  %8054 = vmatmul.mubr.msk.f32.vlgmr.msra.gmra.mrb[64].mxu1 %vm543_vm4, %v5328_v40  ;;  %v5404_v43 = vrot.slane %v5328_v40, 1 }
0x3034   :  { %8383 = vmatpush3.bf16.msra.mxu1 %v9064_v57  ;;  %8069 = vmatprep.mubr.msk.f32.mxu1 %vm8796_vm0, %v8797_v1 }
0x3035   :  { %8059 = vmatmul.mubr.msk.f32.vlgmr.msra.gmra.mrb[58].mxu0 %vm543_vm4, %v5404_v43  ;;  %8384 = vmatprep.subr.bf16.mxu1 %v8795_v0 }
0x3036   :  { %8389 = vmatpush3.bf16.msra.mxu0 %v9066_v60  ;;  %8078 = vmatprep.mubr.msk.f32.mxu0 %vm8796_vm0, %v8797_v1 }
0x3037   :  { %8076 = vmatprep.subr.mxu0 %v8797_v1 }
0x3038   :  { %8386 = vmatpush3.bf16.msra.mxu1 %v9074_v2 }
0x3039   :  { %8396 = vmatprep.subr.bf16.mxu1 %v8795_v0 }
0x303a   :  { %8077 = vmatpush3.msk.msra.mxu0 %vm771_vm5, %v9487_v58 }
0x303b   :  { %8390 = vmatprep.subr.bf16.mxu0 %v8795_v0 }
0x3042   :  { %5629 = vrot.lane.b32.xlu1 %v9721_v22, %s8798_s25 }
0x30be   :  { %v5074_v63 = vpop.xlane.xlu1 %5073 }
0x30bf   :  { %vm5075_vm12 = vcmp.eq.f32.partialorder %v5072_v36, %v5074_v63 }
0x30c0   :  { %v5076_v23 = vsel %vm5075_vm12, %v5071_v51, inf }
0x30c1   :  { %5077 = vmin.xlane.f32.xlu0 %v5076_v23 }
0x30c2   :  { %v5630_v20 = vpop.permute.xlu1 %5629 }
0x30d7   :  { %5639 = vrot.lane.b32.xlu0 %v9721_v22, %s8799_s3  ;;  %v5080_v22 = vcvt.f32.s32 %v5074_v63 }
0x30d9   :  { %v5081_v31 = vshll.u32 %v5080_v22, 16 }
0x3106   :  { %v5400_v47 = vpop.f32.mrb[64].mxu1 }
0x3107   :  { %v8055_v37 = vpop.f32.mrb[65].mxu1 }
0x3108   :  { %v5473_v52 = vpop.f32.mrb[58].mxu0 }
0x3109   :  { %v5478_v16 = vrot.slane %v5473_v52, 7  ;;  %v8060_v12 = vpop.f32.mrb[59].mxu0 }
0x310b   :  { %v5480_v58 = vsel %vm528_vm2, %v5400_v47, %v5478_v16 }
0x310c   :  { %8070 = vmatmul.mubr.msk.f32.vlgmr.msra.gmra.mrb[66].mxu1 %vm134_vm1, %v5480_v58 }
0x310d   :  { %8398 = vmatpush3.bf16.msra.mxu1 %v8971_v11  ;;  %8100 = vmatprep.mubr.msk.f32.mxu1 %vm8796_vm0, %v8797_v1 }
0x310e   :  { %8399 = vmatprep.subr.bf16.mxu1 %v8795_v0 }
0x3111   :  { %8401 = vmatpush3.bf16.msra.mxu1 %v8988_v15 }
0x3112   :  { %8108 = vmatprep.subr.mxu1 %v8797_v1 }
0x314e   :  { %v5078_v53 = vpop.xlane.xlu0 %5077 }
0x314f   :  { %v5079_v55 = vcvt.f32.s32 %v5078_v53 }
0x3151   :  { %v5082_v18 = vadd.s32 %v5081_v31, %v5079_v55 }
0x3152   :  { %v5640_v39 = vpop.permute.xlu0 %5639 }
0x3153   :  { %vm5083_vm13 = vcmp.eq.s32.totalorder %v9069_v61, %v5082_v18 }
0x3154   :  { %v7252_v62 = vsel %vm5083_vm13, 1.0, %v8797_v1 }
0x3155   :  { %8079 = vmatmul.mubr.msk.f32.vlgmr.msra.gmra.mrb[60].mxu0 %vm767_vm7, %v7252_v62 }
0x3156   :  { %8392 = vmatpush3.bf16.msra.mxu0 %v9110_v42  ;;  %8089 = vmatprep.mubr.msk.f32.mxu0 %vm8796_vm0, %v8797_v1 }
0x3157   :  { %8393 = vmatprep.subr.bf16.mxu0 %v8795_v0 }
0x315a   :  { %8395 = vmatpush3.bf16.msra.mxu0 %v9116_v44 }
0x315b   :  { %8103 = vmatprep.subr.mxu0 %v8797_v1 }
0x31df   :  { %v5550_v5 = vpop.f32.mrb[66].mxu1 }
0x31e0   :  { %v8071_v34 = vpop.f32.mrb[67].mxu1 }
0x31e1   :  { %v9840_v34 = vld [vmem:[#allocation2] sm:$0xff] }
0x3228   :  { %v5623_v3 = vpop.f32.mrb[60].mxu0 }
0x3229   :  { %v5624_v8 = vadd.f32 %v5623_v3, %v5550_v5  ;;  %v8080_v14 = vpop.f32.mrb[61].mxu0  ;;  %v9834_v5 = vld [vmem:[%s10099_s4] sm:$0x1]  ;;  %v9845_v3 = vld [vmem:[#allocation2 + $0x8] sm:$0xff] }
0x322b   :  { %v5627_v35 = vadd.f32 %v9513_v45, %v5624_v8 }
0x322d   :  { %v5632_v13 = vadd.f32 %v5630_v20, %v5627_v35 }
0x322f   :  { %v7264_v26 = vmul.f32 -1.442695, %v5632_v13 }
0x3231   :  { %8559 = vpow2.f32 %v7264_v26 }
0x323b   :  { %v8560_v27 = vpop.eup %8559 }
0x323c   :  { %v5636_v4 = vadd.f32 1.0, %v8560_v27 }
0x323e   :  { %8561 = vrcp.f32 %v5636_v4 }
0x3248   :  { %v8562_v32 = vpop.eup %8561 }
0x3249   :  { %v5642_v36 = vmul.f32 %v8562_v32, %v5640_v39  ;;  %v5649_v46 = vsub.f32 1.0, %v8562_v32  ;;  %v5655_v63 = vmul.f32 %v8562_v32, %v9710_v41  ;;  %v9816_v41 = vld [vmem:[%s10101_s6] ss:$0 sm:$0xff] }
0x324b   :  { %5644 = vrot.lane.b32.xlu1 %v5642_v36, %s8800_s20 }
0x32bd   :  { %v5645_v38 = vpop.permute.xlu1 %5644 }
0x32be   :  { %v5647_v40 = vadd.f32 %v5645_v38, %v5627_v35 }
0x32c0   :  { %8563 = vtanh.f32 %v5647_v40 }
0x32ca   :  { %v8564_v43 = vpop.eup %8563 }
0x32cb   :  { %5651 = vrot.lane.b32.xlu1 %v8564_v43, %s8798_s25 }
0x333d   :  { %v5652_v45 = vpop.permute.xlu1 %5651 }
0x333e   :  { %v5654_v51 = vmul.f32 %v5652_v45, %v5649_v46 }
0x3340   :  { %v9803_v23 = vadd.f32 %v5655_v63, %v5654_v51 }
0x3342   :  { %5658 = vrot.lane.b32.xlu0 %v9803_v23, %s8798_s25 }
0x33b4   :  { %v5659_v47 = vpop.permute.xlu0 %5658 }
0x33b5   :  { %8090 = vmatmul.mubr.msk.f32.vlgmr.msra.gmra.mrb[62].mxu0 %vm134_vm1, %v5659_v47  ;;  %8101 = vmatmul.mubr.msk.f32.vlgmr.msra.gmra.mrb[68].mxu1 %vm134_vm1, %v5659_v47 }
0x33b6   :  { %8110 = vmatprep.mubr.msk.f32.mxu1 %vm8796_vm0, %v8797_v1  ;;  %8105 = vmatprep.mubr.msk.f32.mxu0 %vm8796_vm0, %v8797_v1 }
0x3488   :  { %v5728_v37 = vpop.f32.mrb[62].mxu0  ;;  %v5833_v52 = vpop.f32.mrb[68].mxu1 }
0x3489   :  { %v9819_v16 = vadd.f32 %v9816_v41, %v5833_v52  ;;  %v8091_v12 = vpop.f32.mrb[63].mxu0  ;;  %v8102_v58 = vpop.f32.mrb[69].mxu1  ;;  %v9855_v38 = vadd.f32 %v9559_v49, %v5728_v37 }
0x348a   :  { %v9882_v58 = vld [vmem:[#allocation5 + $0x10] sm:$0xf] }
0x348b   :  { %v5840_v22 = vrot.slane %v9819_v16, %v9012_v24  ;;  %v5919_v53 = vrot.slane %v9819_v16, %v9014_v25  ;;  %v5732_v43 = vsel %vm965_vm8, %v9855_v38, -inf }
0x348d   :  { %v5841_v31 = vadd.f32 %v5840_v22, %v9020_v30  ;;  %v5920_v55 = vadd.f32 %v5919_v53, %v9024_v33 }
0x348f   :  { %8565 = vtanh.f32 %v5841_v31 }
0x3490   :  { %8567 = vtanh.f32 %v5920_v55 }
0x3499   :  { %v8566_v18 = vpop.eup %8565 }
0x349a   :  { %v8568_v62 = vpop.eup %8567  ;;  %8104 = vmatpush3.xpose.msk.msra.mxu0 %vm134_vm1, %v8566_v18 }
0x349b   :  { %8109 = vmatpush3.xpose.msk.msra.mxu1 %vm134_vm1, %v8568_v62  ;;  %8113 = vmatprep.subr.mxu0 %v8797_v1 }
0x349c   :  { %8118 = vmatprep.subr.mxu1 %v8797_v1 }
0x349d   :  { %8106 = vmatmul.mubr.msk.f32.vlgmr.msra.gmra.mrb[64].mxu0 %vm134_vm1, %v9834_v5 }
0x349e   :  { %8111 = vmatmul.mubr.msk.f32.vlgmr.msra.gmra.mrb[70].mxu1 %vm134_vm1, %v9834_v5  ;;  %8114 = vmatpush3.msra.mxu0 %v9840_v34 }
0x349f   :  { %8115 = vmatprep.mubr.msk.f32.mxu0 %vm8796_vm0, %v8797_v1  ;;  %8119 = vmatpush3.msra.mxu1 %v9845_v3 }
0x34a0   :  { %8120 = vmatprep.mubr.msk.f32.mxu1 %vm8796_vm0, %v8797_v1  ;;  %8402 = vmatprep.subr.bf16.mxu0 %v8795_v0 }
0x34a1   :  { %8408 = vmatprep.subr.bf16.mxu1 %v8795_v0 }
0x3570   :  { %v5912_v8 = vpop.f32.mrb[64].mxu0 }
0x3571   :  { %v5991_v14 = vpop.f32.mrb[70].mxu1  ;;  %v8107_v35 = vpop.f32.mrb[65].mxu0 }
0x3572   :  { %v5996_v20 = vrot.slane %v5991_v14, 7  ;;  %v8112_v13 = vpop.f32.mrb[71].mxu1 }
0x3574   :  { %v5998_v26 = vsel %vm528_vm2, %v5912_v8, %v5996_v20 }
0x3575   :  { %v5999_v27 = vsel %vm530_vm3, %v5998_v26, -inf }
0x3576   :  { %6000 = vmax.xlane.f32.xlu1 %v5999_v27 }
0x3603   :  { %v6001_v4 = vpop.xlane.xlu1 %6000 }
0x3604   :  { %v6002_v32 = vsub.f32 %v5998_v26, %v6001_v4 }
0x3606   :  { %v6003_v39 = vmul.f32 1.442695, %v6002_v32 }
0x3608   :  { %8569 = vpow2.f32 %v6003_v39 }
0x3612   :  { %v8570_v36 = vpop.eup %8569 }
0x3613   :  { %v6005_v40 = vsel %vm530_vm3, %v8570_v36, 0.0 }
0x3614   :  { %6006 = vadd.xlane.f32.xlu0 %v6005_v40 }
0x3618   :  { %5733 = vmax.xlane.f32.xlu0 %v5732_v43  ;;  %v9908_v43 = vld [vmem:[#allocation8] ss:$0 sm:$0xff] }
0x36a1   :  { %v6007_v46 = vpop.xlane.xlu0 %6006 }
0x36a2   :  { %8571 = vrcp.f32 %v6007_v46 }
0x36a5   :  { %v9860_v45 = vpop.xlane.xlu0 %5733 }
0x36a6   :  { %vm5747_vm14 = vcmp.eq.f32.partialorder %v9855_v38, %v9860_v45 }
0x36a7   :  { %v5748_v63 = vsel %vm5747_vm14, %v9069_v61, 20 }
0x36a8   :  { %v5749_v51 = vsel %vm965_vm8, %v5748_v63, 2147483647 }
0x36a9   :  { %v5751_v49 = vshra.s32 %v5749_v51, 16  ;;  %v5750_v22 = vand.u32 65535, %v5749_v51 }
0x36ab   :  { %v5753_v47 = vcvt.s32.f32 %v5751_v49  ;;  %v5752_v31 = vcvt.s32.f32 %v5750_v22 }
0x36ac   :  { %v8572_v37 = vpop.eup %8571 }
0x36ad   :  { %v6009_v52 = vmul.f32 %v8572_v37, %v8570_v36  ;;  %5754 = vmin.xlane.f32.xlu1 %v5753_v47 }
0x36af   :  { %7272 = vst.msk [vmem:[%s10108_s13 + $0x10] sm:$0x3] %vm530_vm3, %v6009_v52  ;;  %8116 = vmatmul.mubr.msk.f32.vlgmr.msra.gmra.mrb[66].mxu0 %vm543_vm4, %v6009_v52  ;;  %v6085_v12 = vrot.slane %v6009_v52, 1 }
0x36b0   :  { %8404 = vmatpush3.bf16.msra.mxu0 %v9064_v57  ;;  %8131 = vmatprep.mubr.msk.f32.mxu0 %vm8796_vm0, %v8797_v1 }
0x36b1   :  { %8121 = vmatmul.mubr.msk.f32.vlgmr.msra.gmra.mrb[72].mxu1 %vm543_vm4, %v6085_v12  ;;  %8405 = vmatprep.subr.bf16.mxu0 %v8795_v0 }
0x36b2   :  { %8410 = vmatpush3.bf16.msra.mxu1 %v9066_v60  ;;  %8140 = vmatprep.mubr.msk.f32.mxu1 %vm8796_vm0, %v8797_v1 }
0x36b3   :  { %8138 = vmatprep.subr.mxu1 %v8797_v1 }
0x36b4   :  { %8407 = vmatpush3.bf16.msra.mxu0 %v9074_v2 }
0x36b5   :  { %8417 = vmatprep.subr.bf16.mxu0 %v8795_v0 }
0x36b6   :  { %8139 = vmatpush3.msk.msra.mxu1 %vm771_vm5, %v9882_v58 }
0x36b7   :  { %8411 = vmatprep.subr.bf16.mxu1 %v8795_v0 }
0x36be   :  { %6310 = vrot.lane.b32.xlu1 %v9819_v16, %s8798_s25 }
0x373a   :  { %v5755_v53 = vpop.xlane.xlu1 %5754 }
0x373b   :  { %vm5756_vm15 = vcmp.eq.f32.partialorder %v5753_v47, %v5755_v53 }
0x373c   :  { %v5757_v55 = vsel %vm5756_vm15, %v5752_v31, inf }
0x373d   :  { %5758 = vmin.xlane.f32.xlu0 %v5757_v55 }
0x373e   :  { %v6311_v63 = vpop.permute.xlu1 %6310 }
0x3753   :  { %6320 = vrot.lane.b32.xlu0 %v9819_v16, %s8799_s3  ;;  %v5761_v16 = vcvt.f32.s32 %v5755_v53 }
0x3755   :  { %v5762_v26 = vshll.u32 %v5761_v16, 16 }
0x3782   :  { %v6081_v18 = vpop.f32.mrb[66].mxu0 }
0x3783   :  { %v8117_v62 = vpop.f32.mrb[67].mxu0 }
0x3784   :  { %v6154_v8 = vpop.f32.mrb[72].mxu1 }
0x3785   :  { %v6159_v14 = vrot.slane %v6154_v8, 7  ;;  %v8122_v35 = vpop.f32.mrb[73].mxu1 }
0x3787   :  { %v6161_v20 = vsel %vm528_vm2, %v6081_v18, %v6159_v14 }
0x3788   :  { %8132 = vmatmul.mubr.msk.f32.vlgmr.msra.gmra.mrb[68].mxu0 %vm134_vm1, %v6161_v20 }
0x3789   :  { %8419 = vmatpush3.bf16.msra.mxu0 %v8971_v11  ;;  %8162 = vmatprep.mubr.msk.f32.mxu0 %vm8796_vm0, %v8797_v1 }
0x378a   :  { %8420 = vmatprep.subr.bf16.mxu0 %v8795_v0 }
0x378d   :  { %8422 = vmatpush3.bf16.msra.mxu0 %v8988_v15 }
0x378e   :  { %8170 = vmatprep.subr.mxu0 %v8797_v1 }
0x37ca   :  { %v5759_v13 = vpop.xlane.xlu0 %5758 }
0x37cb   :  { %v5760_v27 = vcvt.f32.s32 %v5759_v13 }
0x37cd   :  { %v5763_v4 = vadd.s32 %v5762_v26, %v5760_v27 }
0x37ce   :  { %v6321_v12 = vpop.permute.xlu0 %6320 }
0x37cf   :  { %vm5764_vm6 = vcmp.eq.s32.totalorder %v9069_v61, %v5763_v4 }
0x37d0   :  { %v7266_v32 = vsel %vm5764_vm6, 1.0, %v8797_v1 }
0x37d1   :  { %8141 = vmatmul.mubr.msk.f32.vlgmr.msra.gmra.mrb[74].mxu1 %vm767_vm7, %v7266_v32 }
0x37d2   :  { %8413 = vmatpush3.bf16.msra.mxu1 %v9110_v42  ;;  %8151 = vmatprep.mubr.msk.f32.mxu1 %vm8796_vm0, %v8797_v1 }
0x37d3   :  { %8414 = vmatprep.subr.bf16.mxu1 %v8795_v0 }
0x37d6   :  { %8416 = vmatpush3.bf16.msra.mxu1 %v9116_v44 }
0x37d7   :  { %8165 = vmatprep.subr.mxu1 %v8797_v1 }
0x385b   :  { %v6231_v11 = vpop.f32.mrb[68].mxu0 }
0x385c   :  { %v8133_v15 = vpop.f32.mrb[69].mxu0 }
0x38a4   :  { %v6304_v39 = vpop.f32.mrb[74].mxu1 }
0x38a5   :  { %v6305_v36 = vadd.f32 %v6304_v39, %v6231_v11  ;;  %v8142_v40 = vpop.f32.mrb[75].mxu1 }
0x38a7   :  { %v6308_v46 = vadd.f32 %v9908_v43, %v6305_v36 }
0x38a9   :  { %v6313_v51 = vadd.f32 %v6311_v63, %v6308_v46 }
0x38ab   :  { %v7278_v49 = vmul.f32 -1.442695, %v6313_v51  ;;  %v9954_v51 = vld [vmem:[%s10106_s11] ss:$0 sm:$0xff] }
0x38ad   :  { %8573 = vpow2.f32 %v7278_v49 }
0x38b7   :  { %v8574_v47 = vpop.eup %8573 }
0x38b8   :  { %v6317_v37 = vadd.f32 1.0, %v8574_v47 }
0x38ba   :  { %8575 = vrcp.f32 %v6317_v37 }
0x38c4   :  { %v8576_v52 = vpop.eup %8575 }
0x38c5   :  { %v6323_v22 = vmul.f32 %v8576_v52, %v6321_v12  ;;  %v6330_v18 = vsub.f32 1.0, %v8576_v52  ;;  %v6336_v8 = vmul.f32 %v8576_v52, %v9803_v23 }
0x38c7   :  { %6325 = vrot.lane.b32.xlu1 %v6323_v22, %s8800_s20 }
0x3939   :  { %v6326_v53 = vpop.permute.xlu1 %6325 }
0x393a   :  { %v6328_v31 = vadd.f32 %v6326_v53, %v6308_v46 }
0x393c   :  { %8577 = vtanh.f32 %v6328_v31 }
0x3946   :  { %v8578_v55 = vpop.eup %8577 }
0x3947   :  { %6332 = vrot.lane.b32.xlu1 %v8578_v55, %s8798_s25 }
0x39b9   :  { %v6333_v62 = vpop.permute.xlu1 %6332 }
0x39ba   :  { %v6335_v14 = vmul.f32 %v6333_v62, %v6330_v18 }
0x39bc   :  { %v9914_v35 = vadd.f32 %v6336_v8, %v6335_v14 }
0x39be   :  { %6339 = vrot.lane.b32.xlu0 %v9914_v35, %s8798_s25 }
0x3a30   :  { %v6340_v20 = vpop.permute.xlu0 %6339 }
0x3a31   :  { %8152 = vmatmul.mubr.msk.f32.vlgmr.msra.gmra.mrb[76].mxu1 %vm134_vm1, %v6340_v20  ;;  %8163 = vmatmul.mubr.msk.f32.vlgmr.msra.gmra.mrb[70].mxu0 %vm134_vm1, %v6340_v20 }
0x3a32   :  { %8172 = vmatprep.mubr.msk.f32.mxu0 %vm8796_vm0, %v8797_v1  ;;  %8167 = vmatprep.mubr.msk.f32.mxu1 %vm8796_vm0, %v8797_v1 }
0x3b04   :  { %v6409_v16 = vpop.f32.mrb[76].mxu1  ;;  %v6514_v13 = vpop.f32.mrb[70].mxu0 }
0x3b05   :  { %v9925_v23 = vadd.f32 %v9816_v41, %v6514_v13  ;;  %v8153_v26 = vpop.f32.mrb[77].mxu1  ;;  %v8164_v27 = vpop.f32.mrb[71].mxu0  ;;  %v9957_v49 = vadd.f32 %v9954_v51, %v6409_v16 }
0x3b07   :  { %v6521_v4 = vrot.slane %v9925_v23, %v9012_v24  ;;  %v6600_v32 = vrot.slane %v9925_v23, %v9014_v25  ;;  %v6413_v37 = vsel %vm965_vm8, %v9957_v49, -inf }
0x3b09   :  { %v6522_v11 = vadd.f32 %v6521_v4, %v9020_v30  ;;  %v6601_v15 = vadd.f32 %v6600_v32, %v9024_v33 }
0x3b0b   :  { %8579 = vtanh.f32 %v6522_v11 }
0x3b0c   :  { %8581 = vtanh.f32 %v6601_v15 }
0x3b15   :  { %v8580_v39 = vpop.eup %8579 }
0x3b16   :  { %v8582_v36 = vpop.eup %8581  ;;  %8166 = vmatpush3.xpose.msk.msra.mxu1 %vm134_vm1, %v8580_v39 }
0x3b17   :  { %8171 = vmatpush3.xpose.msk.msra.mxu0 %vm134_vm1, %v8582_v36  ;;  %8175 = vmatprep.subr.mxu1 %v8797_v1 }
0x3b18   :  { %8180 = vmatprep.subr.mxu0 %v8797_v1 }
0x3b19   :  { %8168 = vmatmul.mubr.msk.f32.vlgmr.msra.gmra.mrb[78].mxu1 %vm134_vm1, %v9834_v5 }
0x3b1a   :  { %8173 = vmatmul.mubr.msk.f32.vlgmr.msra.gmra.mrb[72].mxu0 %vm134_vm1, %v9834_v5  ;;  %8176 = vmatpush3.msra.mxu1 %v9840_v34 }
0x3b1b   :  { %8177 = vmatprep.mubr.msk.f32.mxu1 %vm8796_vm0, %v8797_v1  ;;  %8181 = vmatpush3.msra.mxu0 %v9845_v3 }
0x3b1c   :  { %8182 = vmatprep.mubr.msk.f32.mxu0 %vm8796_vm0, %v8797_v1  ;;  %8423 = vmatprep.subr.bf16.mxu1 %v8795_v0 }
0x3b1d   :  { %8429 = vmatprep.subr.bf16.mxu0 %v8795_v0 }
0x3bec   :  { %v6593_v24 = vpop.f32.mrb[78].mxu1 }
0x3bed   :  { %v6672_v25 = vpop.f32.mrb[72].mxu0  ;;  %v8169_v30 = vpop.f32.mrb[79].mxu1 }
0x3bee   :  { %v6677_v33 = vrot.slane %v6672_v25, 7  ;;  %v8174_v41 = vpop.f32.mrb[73].mxu0 }
0x3bf0   :  { %v6679_v5 = vsel %vm528_vm2, %v6593_v24, %v6677_v33 }
0x3bf1   :  { %v6680_v34 = vsel %vm530_vm3, %v6679_v5, -inf }
0x3bf2   :  { %6681 = vmax.xlane.f32.xlu1 %v6680_v34 }
0x3c7f   :  { %v6682_v40 = vpop.xlane.xlu1 %6681 }
0x3c80   :  { %v6683_v46 = vsub.f32 %v6679_v5, %v6682_v40 }
0x3c82   :  { %v6684_v3 = vmul.f32 1.442695, %v6683_v46 }
0x3c84   :  { %8583 = vpow2.f32 %v6684_v3 }
0x3c8e   :  { %v8584_v63 = vpop.eup %8583 }
0x3c8f   :  { %v6686_v47 = vsel %vm530_vm3, %v8584_v63, 0.0 }
0x3c90   :  { %6687 = vadd.xlane.f32.xlu0 %v6686_v47 }
0x3c94   :  { %6414 = vmax.xlane.f32.xlu0 %v6413_v37 }
0x3d1d   :  { %v6688_v52 = vpop.xlane.xlu0 %6687 }
0x3d1e   :  { %8585 = vrcp.f32 %v6688_v52 }
0x3d21   :  { %v9962_v12 = vpop.xlane.xlu0 %6414 }
0x3d22   :  { %vm6428_vm9 = vcmp.eq.f32.partialorder %v9957_v49, %v9962_v12 }
0x3d23   :  { %v6429_v22 = vsel %vm6428_vm9, %v9069_v61, 20 }
0x3d24   :  { %v6430_v53 = vsel %vm965_vm8, %v6429_v22, 2147483647 }
0x3d25   :  { %v6432_v31 = vshra.s32 %v6430_v53, 16 }
0x3d27   :  { %v6434_v55 = vcvt.s32.f32 %v6432_v31 }
0x3d28   :  { %v8586_v18 = vpop.eup %8585 }
0x3d29   :  { %v6690_v62 = vmul.f32 %v8586_v18, %v8584_v63  ;;  %6435 = vmin.xlane.f32.xlu1 %v6434_v55 }
0x3d2b   :  { %7286 = vst.msk [vmem:[%s10108_s13 + $0x12] sm:$0x3] %vm530_vm3, %v6690_v62  ;;  %8178 = vmatmul.mubr.msk.f32.vlgmr.msra.gmra.mrb[80].mxu1 %vm543_vm4, %v6690_v62  ;;  %v6766_v8 = vrot.slane %v6690_v62, 1  ;;  %v3011_v62 = vsub.f32 %v9460_v48, %v9465_v10  ;;  %s8801_s13 = smov [#allocation11]  }
0x3d2c   :  { %8425 = vmatpush3.bf16.msra.mxu1 %v9064_v57  ;;  %8193 = vmatprep.mubr.msk.f32.mxu1 %vm8796_vm0, %v8797_v1  ;;  %v6431_v57 = vand.u32 65535, %v6430_v53  ;;  %v969_v53 = vsub.f32 %v9166_v19, %v9171_v28 }
0x3d2d   :  { %8183 = vmatmul.mubr.msk.f32.vlgmr.msra.gmra.mrb[74].mxu0 %vm543_vm4, %v6766_v8  ;;  %8426 = vmatprep.subr.bf16.mxu1 %v8795_v0  ;;  %v3012_v8 = vmul.f32 1.442695, %v3011_v62 }
0x3d2e   :  { %8431 = vmatpush3.bf16.msra.mxu0 %v9066_v60  ;;  %8202 = vmatprep.mubr.msk.f32.mxu0 %vm8796_vm0, %v8797_v1  ;;  %v6433_v20 = vcvt.s32.f32 %v6431_v57  ;;  %v970_v31 = vmul.f32 1.442695, %v969_v53 }
0x3d2f   :  { %8200 = vmatprep.subr.mxu0 %v8797_v1 }
0x3d30   :  { %8428 = vmatpush3.bf16.msra.mxu1 %v9074_v2 }
0x3d32   :  { %8201 = vmatpush3.msk.msra.mxu0 %vm771_vm5, %v9882_v58 }
0x3d33   :  { %8432 = vmatprep.subr.bf16.mxu0 %v8795_v0 }
0x3d3a   :  { %6991 = vrot.lane.b32.xlu1 %v9925_v23, %s8798_s25 }
0x3db6   :  { %v6436_v14 = vpop.xlane.xlu1 %6435 }
0x3db7   :  { %vm6437_vm3 = vcmp.eq.f32.partialorder %v6434_v55, %v6436_v14  ;;  %v6442_v4 = vcvt.f32.s32 %v6436_v14  ;;  %v1649_v55 = vsub.f32 %v9260_v7, %v9265_v17  ;;  %v5735_v14 = vsub.f32 %v9855_v38, %v9860_v45 }
0x3db8   :  { %v6438_v60 = vsel %vm6437_vm3, %v6433_v20, inf }
0x3db9   :  { %6439 = vmin.xlane.f32.xlu0 %v6438_v60  ;;  %v6443_v11 = vshll.u32 %v6442_v4, 16  ;;  %v1650_v18 = vmul.f32 1.442695, %v1649_v55  ;;  %v5736_v60 = vmul.f32 1.442695, %v5735_v14 }
0x3dba   :  { %v6992_v41 = vpop.permute.xlu1 %6991 }
0x3dcf   :  { %7001 = vrot.lane.b32.xlu0 %v9925_v23, %s8799_s3 }
0x3dfe   :  { %v6762_v16 = vpop.f32.mrb[80].mxu1 }
0x3dff   :  { %v8179_v13 = vpop.f32.mrb[81].mxu1 }
0x3e00   :  { %v6835_v2 = vpop.f32.mrb[74].mxu0 }
0x3e01   :  { %v6840_v26 = vrot.slane %v6835_v2, 7  ;;  %v8184_v27 = vpop.f32.mrb[75].mxu0 }
0x3e03   :  { %v6842_v58 = vsel %vm528_vm2, %v6762_v16, %v6840_v26 }
0x3e04   :  { %8194 = vmatmul.mubr.msk.f32.vlgmr.msra.gmra.mrb[82].mxu1 %vm134_vm1, %v6842_v58 }
0x3e46   :  { %v6440_v32 = vpop.xlane.xlu0 %6439 }
0x3e47   :  { %v6441_v15 = vcvt.f32.s32 %v6440_v32 }
0x3e49   :  { %v6444_v39 = vadd.s32 %v6443_v11, %v6441_v15 }
0x3e4b   :  { %vm6445_vm4 = vcmp.eq.s32.totalorder %v9069_v61, %v6444_v39 }
0x3e4c   :  { %v7280_v36 = vsel %vm6445_vm4, 1.0, %v8797_v1 }
0x3e4d   :  { %8203 = vmatmul.mubr.msk.f32.vlgmr.msra.gmra.mrb[76].mxu0 %vm767_vm7, %v7280_v36 }
0x3e4e   :  { %8434 = vmatpush3.bf16.msra.mxu0 %v9110_v42  ;;  %8213 = vmatprep.mubr.msk.f32.mxu0 %vm8796_vm0, %v8797_v1  ;;  %v7002_v1 = vpop.permute.xlu0 %7001  ;;  %vm7110_vm0 = vcmask 254976  }
0x3e4f   :  { %8435 = vmatprep.subr.bf16.mxu0 %v8795_v0 }
0x3e52   :  { %8437 = vmatpush3.bf16.msra.mxu0 %v9116_v44 }
0x3ed7   :  { %v6912_v23 = vpop.f32.mrb[82].mxu1 }
0x3ed8   :  { %v8195_v24 = vpop.f32.mrb[83].mxu1 }
0x3f20   :  { %v6985_v25 = vpop.f32.mrb[76].mxu0 }
0x3f21   :  { %v6986_v30 = vadd.f32 %v6985_v25, %v6912_v23  ;;  %v8204_v33 = vpop.f32.mrb[77].mxu0 }
0x3f23   :  { %v6989_v61 = vadd.f32 %v9908_v43, %v6986_v30 }
0x3f25   :  { %v6994_v5 = vadd.f32 %v6992_v41, %v6989_v61 }
0x3f27   :  { %v7292_v34 = vmul.f32 -1.442695, %v6994_v5 }
0x3f29   :  { %8587 = vpow2.f32 %v7292_v34 }
0x3f33   :  { %v8588_v40 = vpop.eup %8587 }
0x3f34   :  { %v6998_v42 = vadd.f32 1.0, %v8588_v40 }
0x3f36   :  { %8589 = vrcp.f32 %v6998_v42 }
0x3f40   :  { %v8590_v46 = vpop.eup %8589 }
0x3f41   :  { %v7004_v3 = vmul.f32 %v8590_v46, %v7002_v1  ;;  %v7011_v47 = vsub.f32 1.0, %v8590_v46  ;;  %v7017_v37 = vmul.f32 %v8590_v46, %v9914_v35  ;;  %v4373_v35 = vsub.f32 %v9655_v56, %v9660_v6 }
0x3f43   :  { %7006 = vrot.lane.b32.xlu1 %v7004_v3, %s8800_s20  ;;  %v4374_v57 = vmul.f32 1.442695, %v4373_v35 }
0x3fb5   :  { %v7007_v0 = vpop.permute.xlu1 %7006 }
0x3fb6   :  { %v7009_v44 = vadd.f32 %v7007_v0, %v6989_v61 }
0x3fb8   :  { %8591 = vtanh.f32 %v7009_v44 }
0x3fb9   :  { %8593 = vpow2.f32 %v970_v31 }
0x3fba   :  { %8595 = vpow2.f32 %v1650_v18 }
0x3fbb   :  { %8597 = vpow2.f32 %v3012_v8 }
0x3fbc   :  { %8599 = vpow2.f32 %v4374_v57 }
0x3fbd   :  { %8601 = vpow2.f32 %v5736_v60 }
0x3fc2   :  { %v8592_v63 = vpop.eup %8591 }
0x3fc3   :  { %7013 = vrot.lane.b32.xlu1 %v8592_v63, %s8798_s25  ;;  %v8594_v20 = vpop.eup %8593 }
0x3fc4   :  { %v972_v16 = vsel %vm965_vm8, %v8594_v20, 0.0  ;;  %v8596_v13 = vpop.eup %8595 }
0x3fc5   :  { %v1652_v2 = vsel %vm965_vm8, %v8596_v13, 0.0  ;;  %v8598_v26 = vpop.eup %8597 }
0x3fc6   :  { %v3014_v27 = vsel %vm965_vm8, %v8598_v26, 0.0  ;;  %v8600_v58 = vpop.eup %8599 }
0x3fc7   :  { %v4376_v4 = vsel %vm965_vm8, %v8600_v58, 0.0  ;;  %v8602_v32 = vpop.eup %8601 }
0x3fc8   :  { %v5738_v11 = vsel %vm965_vm8, %v8602_v32, 0.0 }
0x4035   :  { %v7014_v43 = vpop.permute.xlu1 %7013 }
0x4036   :  { %v7016_v52 = vmul.f32 %v7014_v43, %v7011_v47 }
0x4038   :  { %v7018_v22 = vadd.f32 %v7017_v37, %v7016_v52  ;;  %v3692_v37 = vsub.f32 %v9562_v50, %v9567_v9 }
0x403a   :  { %7020 = vrot.lane.b32.xlu0 %v7018_v22, %s8798_s25  ;;  %s7132_s25 = sshll.u32 %s8801_s13, 4  ;;  %s7133_s25 = int_to_ptr.vmem [resolvable:$true] %s7132_s25 }
0x403b   :  { %s8735_s20 = scalar_lea.vmem %s7133_s25, 32  ;;  %p8740_p5 = scmp.lt.s32.totalorder %s7133_s25, %s7133_s25 }
0x403c   :  { %p8736_p4 = scmp.ne.s32.totalorder %s7133_s25, %s8735_s20  ;;  %p8741_p6 = scmp.lt.s32.totalorder %s8735_s20, %s8735_s20 }
0x403e   :  { %p8742_p7 = por %p8741_p6, %p8740_p5 }
0x4040   :  { %p8743_p8 = pnand %p8742_p7, %p8736_p4 }
0x4059   :  { %973 = vadd.xlane.f32.xlu0 %v972_v16 }
0x405d   :  { %1653 = vadd.xlane.f32.xlu0 %v1652_v2 }
0x4061   :  { %3015 = vadd.xlane.f32.xlu0 %v3014_v27 }
0x4065   :  { %4377 = vadd.xlane.f32.xlu0 %v4376_v4 }
0x4069   :  { %5739 = vadd.xlane.f32.xlu0 %v5738_v11 }
0x40ac   :  { %v7021_v15 = vpop.permute.xlu0 %7020 }
0x40ad   :  { %8214 = vmatmul.mubr.msk.f32.vlgmr.msra.gmra.mrb[78].mxu0 %vm134_vm1, %v7021_v15  ;;  %7111 = vst.msk [vmem:[#allocation11] sm:$0x3] %vm7110_vm0, %v7021_v15 }
0x40e6   :  { %v974_v39 = vpop.xlane.xlu0 %973 }
0x40e7   :  { %8603 = vlog2.f32 %v974_v39 }
0x40ea   :  { %v1654_v36 = vpop.xlane.xlu0 %1653 }
0x40eb   :  { %8605 = vlog2.f32 %v1654_v36 }
0x40ee   :  { %v3016_v23 = vpop.xlane.xlu0 %3015 }
0x40ef   :  { %8607 = vlog2.f32 %v3016_v23 }
0x40f1   :  { %v8604_v24 = vpop.eup %8603 }
0x40f2   :  { %v976_v25 = vmul.f32 0.6931472, %v8604_v24  ;;  %v4378_v30 = vpop.xlane.xlu0 %4377 }
0x40f3   :  { %8609 = vlog2.f32 %v4378_v30 }
0x40f4   :  { %v977_v33 = vadd.f32 %v976_v25, %v9171_v28 }
0x40f5   :  { %v8606_v61 = vpop.eup %8605 }
0x40f6   :  { %v978_v41 = vsub.f32 %v9166_v19, %v977_v33  ;;  %v1656_v5 = vmul.f32 0.6931472, %v8606_v61  ;;  %v5740_v34 = vpop.xlane.xlu0 %5739 }
0x40f7   :  { %8611 = vlog2.f32 %v5740_v34 }
0x40f8   :  { %979 = vst.msk [vmem:[#allocation10] sm:$0x3] %vm965_vm8, %v978_v41  ;;  %v1657_v40 = vadd.f32 %v1656_v5, %v9265_v17 }
0x40f9   :  { %v8608_v42 = vpop.eup %8607 }
0x40fa   :  { %v1658_v46 = vsub.f32 %v9260_v7, %v1657_v40  ;;  %v3018_v1 = vmul.f32 0.6931472, %v8608_v42 }
0x40fc   :  { %1660 = vst.msk [vmem:[#allocation10 + $0x2] sm:$0x3] %vm965_vm8, %v1658_v46  ;;  %v3019_v3 = vadd.f32 %v3018_v1, %v9465_v10 }
0x40fd   :  { %v8610_v0 = vpop.eup %8609 }
0x40fe   :  { %v3020_v28 = vsub.f32 %v9460_v48, %v3019_v3  ;;  %v4380_v44 = vmul.f32 0.6931472, %v8610_v0  ;;  %v2330_v48 = vsub.f32 %v9353_v54, %v9358_v59 }
0x4100   :  { %3022 = vst.msk [vmem:[#allocation10 + $0x6] sm:$0x3] %vm965_vm8, %v3020_v28  ;;  %v4381_v19 = vadd.f32 %v4380_v44, %v9660_v6  ;;  %v2331_v10 = vmul.f32 1.442695, %v2330_v48  ;;  %v3693_v6 = vmul.f32 1.442695, %v3692_v37 }
0x4101   :  { %v8612_v63 = vpop.eup %8611 }
0x4102   :  { %v4382_v47 = vsub.f32 %v9655_v56, %v4381_v19  ;;  %v5742_v17 = vmul.f32 0.6931472, %v8612_v63  ;;  %8613 = vpow2.f32 %v2331_v10  ;;  %v5054_v56 = vsub.f32 %v9748_v21, %v9753_v29 }
0x4103   :  { %8615 = vpow2.f32 %v3693_v6 }
0x4104   :  { %4384 = vst.msk [vmem:[#allocation10 + $0xa] sm:$0x3] %vm965_vm8, %v4382_v47  ;;  %v5743_v7 = vadd.f32 %v5742_v17, %v9860_v45  ;;  %v5055_v52 = vmul.f32 1.442695, %v5054_v56  ;;  %v6416_v45 = vsub.f32 %v9957_v49, %v9962_v12 }
0x4106   :  { %v5744_v43 = vsub.f32 %v9855_v38, %v5743_v7  ;;  %8617 = vpow2.f32 %v5055_v52  ;;  %v6417_v31 = vmul.f32 1.442695, %v6416_v45 }
0x4108   :  { %5746 = vst.msk [vmem:[#allocation10 + $0xe] sm:$0x3] %vm965_vm8, %v5744_v43  ;;  %8619 = vpow2.f32 %v6417_v31 }
0x410c   :  { %v8614_v18 = vpop.eup %8613 }
0x410d   :  { %v2333_v62 = vsel %vm965_vm8, %v8614_v18, 0.0  ;;  %v8616_v8 = vpop.eup %8615 }
0x410e   :  { %v3695_v35 = vsel %vm965_vm8, %v8616_v8, 0.0 }
0x4110   :  { %v8618_v57 = vpop.eup %8617 }
0x4112   :  { %v8620_v14 = vpop.eup %8619 }
0x4113   :  { %v6419_v20 = vsel %vm965_vm8, %v8620_v14, 0.0 }
0x4180   :  { %v7090_v38 = vpop.f32.mrb[78].mxu0 }
0x4181   :  { %v10045_v22 = vadd.f32 %v9954_v51, %v7090_v38  ;;  %v8215_v53 = vpop.f32.mrb[79].mxu0  ;;  %v5057_v51 = vsel %vm965_vm8, %v8618_v57, 0.0 }
0x4183   :  { %v7094_v55 = vsel %vm965_vm8, %v10045_v22, -inf }
0x4184   :  { %7095 = vmax.xlane.f32.xlu1 %v7094_v55 }
0x4188   :  { %2334 = vadd.xlane.f32.xlu1 %v2333_v62 }
0x418c   :  { %3696 = vadd.xlane.f32.xlu1 %v3695_v35 }
0x4190   :  { %5058 = vadd.xlane.f32.xlu1 %v5057_v51 }
0x4194   :  { %6420 = vadd.xlane.f32.xlu1 %v6419_v20 }
0x4211   :  { %v7096_v60 = vpop.xlane.xlu1 %7095 }
0x4212   :  { %v7097_v16 = vsub.f32 %v10045_v22, %v7096_v60 }
0x4214   :  { %v7098_v13 = vmul.f32 1.442695, %v7097_v16 }
0x4215   :  { %v2335_v2 = vpop.xlane.xlu1 %2334 }
0x4216   :  { %8621 = vpow2.f32 %v7098_v13 }
0x4217   :  { %8623 = vlog2.f32 %v2335_v2 }
0x4219   :  { %v3697_v26 = vpop.xlane.xlu1 %3696 }
0x421a   :  { %8625 = vlog2.f32 %v3697_v26 }
0x421d   :  { %v5059_v27 = vpop.xlane.xlu1 %5058 }
0x421e   :  { %8627 = vlog2.f32 %v5059_v27 }
0x4220   :  { %v8622_v58 = vpop.eup %8621 }
0x4221   :  { %v8624_v4 = vpop.eup %8623  ;;  %v6421_v32 = vpop.xlane.xlu1 %6420  ;;  %v7100_v11 = vsel %vm965_vm8, %v8622_v58, 0.0 }
0x4222   :  { %v2337_v15 = vmul.f32 0.6931472, %v8624_v4  ;;  %8629 = vlog2.f32 %v6421_v32  ;;  %7101 = vadd.xlane.f32.xlu0 %v7100_v11 }
0x4224   :  { %v8626_v39 = vpop.eup %8625  ;;  %v2338_v36 = vadd.f32 %v2337_v15, %v9358_v59 }
0x4225   :  { %v3699_v23 = vmul.f32 0.6931472, %v8626_v39 }
0x4226   :  { %v2339_v24 = vsub.f32 %v9353_v54, %v2338_v36 }
0x4227   :  { %v3700_v25 = vadd.f32 %v3699_v23, %v9567_v9 }
0x4228   :  { %v8628_v30 = vpop.eup %8627  ;;  %2341 = vst.msk [vmem:[#allocation10 + $0x4] sm:$0x3] %vm965_vm8, %v2339_v24 }
0x4229   :  { %v3701_v33 = vsub.f32 %v9562_v50, %v3700_v25  ;;  %v5061_v61 = vmul.f32 0.6931472, %v8628_v30 }
0x422b   :  { %3703 = vst.msk [vmem:[#allocation10 + $0x8] sm:$0x3] %vm965_vm8, %v3701_v33  ;;  %v5062_v41 = vadd.f32 %v5061_v61, %v9753_v29 }
0x422c   :  { %v8630_v5 = vpop.eup %8629 }
0x422d   :  { %v5063_v34 = vsub.f32 %v9748_v21, %v5062_v41  ;;  %v6423_v40 = vmul.f32 0.6931472, %v8630_v5 }
0x422f   :  { %5065 = vst.msk [vmem:[#allocation10 + $0xc] sm:$0x3] %vm965_vm8, %v5063_v34  ;;  %v6424_v54 = vadd.f32 %v6423_v40, %v9962_v12 }
0x4231   :  { %v6425_v59 = vsub.f32 %v9957_v49, %v6424_v54 }
0x4233   :  { %6427 = vst.msk [vmem:[#allocation10 + $0x10] sm:$0x3] %vm965_vm8, %v6425_v59 }
0x4234   :  { %8746 = shalt.err (!%p8743_p8)
}
0x4235   :  { %s8747_s8 = scalar_lea.hbm %s10109_s14, 32 }
0x4236   :  { %p8748_p9 = scmp.ne.s32.totalorder %s10109_s14, %s8747_s8  ;;  %p8751_p10 = scmp.lt.u32.totalorder %s8747_s8, %s10109_s14 }
0x4238   :  { %p8753_p11 = pnand %p8751_p10, %p8748_p9 }
0x423a   :  { %8756 = shalt.err (!%p8753_p11)
}
0x423b   :  { %7135 = dma.vmem_to_hbm [thread:$0]  %s7133_s25, 32, %s10109_s14, [#allocation12]  }
0x423c   :  { %s8802_s16 = smov [#allocation10]  }
0x423d   :  { %s7117_s22 = sshll.u32 %s8802_s16, 4  ;;  %s7118_s22 = int_to_ptr.vmem [resolvable:$true] %s7117_s22 }
0x423e   :  { %s8757_s7 = scalar_lea.vmem %s7118_s22, 320  ;;  %p8762_p13 = scmp.lt.s32.totalorder %s7118_s22, %s7118_s22 }
0x423f   :  { %p8758_p12 = scmp.ne.s32.totalorder %s7118_s22, %s8757_s7  ;;  %p8763_p0 = scmp.lt.s32.totalorder %s8757_s7, %s8757_s7 }
0x4241   :  { %p8764_p1 = por %p8763_p0, %p8762_p13 }
0x4243   :  { %p8765_p2 = pnand %p8764_p1, %p8758_p12 }
0x42af   :  { %v7102_v50 = vpop.xlane.xlu0 %7101 }
0x42b0   :  { %8631 = vlog2.f32 %v7102_v50 }
0x42ba   :  { %v8632_v9 = vpop.eup %8631 }
0x42bb   :  { %v7104_v21 = vmul.f32 0.6931472, %v8632_v9 }
0x42bd   :  { %v7105_v29 = vadd.f32 %v7104_v21, %v7096_v60 }
0x42bf   :  { %v7106_v49 = vsub.f32 %v10045_v22, %v7105_v29 }
0x42c1   :  { %7108 = vst.msk [vmem:[#allocation10 + $0x12] sm:$0x3] %vm965_vm8, %v7106_v49 }
0x42c2   :  { %8768 = shalt.err (!%p8765_p2)
}
0x42c3   :  { %s8769_s23 = scalar_lea.hbm %s10107_s12, 320 }
0x42c4   :  { %p8770_p3 = scmp.ne.s32.totalorder %s10107_s12, %s8769_s23  ;;  %p8773_p4 = scmp.lt.u32.totalorder %s8769_s23, %s10107_s12 }
0x42c6   :  { %p8775_p5 = pnand %p8773_p4, %p8770_p3 }
0x42c8   :  { %8778 = shalt.err (!%p8775_p5)
}
0x42c9   :  { %s8803_s29 = smov 2  }
0x42ca   :  { %7123 = dma.vmem_to_hbm [thread:$0]  %s7118_s22, 320, %s10107_s12, [#allocation4], %s8799_s3, %s8799_s3, %s8803_s29  }
0x42cb   :  { %8785 = dma.done.wait [#allocation4], 320  }
0x42cc   :  { %8786 = vsyncadd [#allocation4], 4294966976 }
0x42cd   :  { %8787 = dma.done.wait [#allocation12], 32  }
0x42ce   :  { %8788 = vsyncadd [#allocation12], 4294967264 }
0x42cf   :  { %7144 = vsyncpa [#allocation3], 1 }
0x42d0   :  { %7145 = vsyncpa [#allocation6], 1 }
0x42d1   :  { %7146 = vsyncpa [#allocation9], 1 }
0x42d2   :  { %7147 = vsyncpa [#allocation4], 1 }
0x42d3   :  { %7148 = vsyncpa [#allocation12], 1 }

</bundles_post_ra>
